<compile_context>
chip_gen: v6e
topology: v6e:2x2x1
jax: 0.10.0
libtpu: 0.0.40
codegen_flags: <defaults>
</compile_context>

<pallas_src>
import math

import jax
import jax.numpy as jnp
from jax.experimental import pallas as pl
from jax.experimental.pallas import tpu as pltpu


def make_ffn_kernel(num_hidden_layers, threshold):
    """Fused FFN forward kernel for a fixed hidden-layer count.

    Kernel refs (in order):
      coords_T (C, tm), projT (F, C), W0_sin (H, F), W0_cos (H, F), b0 (H, 1),
      then (W_i (H, H), b_i (H, 1)) for i = 1..num_hidden_layers-1,
      then (W_final (O, H), b_final (O, 1)), then out (O, tm).

    Scaling convention: hidden activations are carried as s = beta * softplus_beta(z);
    beta has been folded into the weights/biases host-side, so the kernel contains no
    beta multiplies or divides.
    """

    def softplus_scaled(z):
        # z = beta * pre-activation.  Returns beta * Softplus(beta, threshold)(pre-act):
        #   z               if z > threshold         (linear region)
        #   log1p(exp(z))   otherwise                (exp kept finite on the dead branch)
        return jnp.where(z > threshold, z,
                         jnp.log1p(jnp.exp(jnp.minimum(z, threshold))))

    def kernel(*refs):
        coords_ref = refs[0]                          # (C, tm)
        projT_ref = refs[1]                           # (F, C)
        w0s_ref, w0c_ref, b0_ref = refs[2], refs[3], refs[4]
        rest = refs[5:-1]                             # interleaved (W, b) pairs
        out_ref = refs[-1]                            # (O, tm)

        x = coords_ref[...]                                             # (C, tm)
        pe = jnp.dot(projT_ref[...], x,
                     preferred_element_type=jnp.float32)                # (F, tm)

        # First hidden layer: split-weight accumulation replaces concat([sin, cos]).
        z0 = (jnp.dot(w0s_ref[...], jnp.sin(pe),
                      preferred_element_type=jnp.float32)
              + jnp.dot(w0c_ref[...], jnp.cos(pe),
                        preferred_element_type=jnp.float32)
              + b0_ref[...])                                            # (H, tm)
        s = softplus_scaled(z0)                                         # beta * act

        # Remaining hidden layers (weights unchanged, biases pre-scaled by beta).
        for i in range(num_hidden_layers - 1):
            w = rest[2 * i][...]
            b = rest[2 * i + 1][...]
            s = softplus_scaled(
                jnp.dot(w, s, preferred_element_type=jnp.float32) + b)

        # Final linear layer (weight pre-divided by beta).  Lane-dense (O, tm) store.
        wf = rest[2 * (num_hidden_layers - 1)][...]
        bf = rest[2 * (num_hidden_layers - 1) + 1][...]
        out_ref[...] = jnp.dot(wf, s, preferred_element_type=jnp.float32) + bf

    return kernel


def init_ffn_params(key, in_features=3, out_features=1, hidden_features=64,
                    num_layers=4, num_frequencies=32, rff_range=2.0):
    """Parameter init mirroring the PyTorch module (weights in PyTorch (out, in) layout)."""
    keys = jax.random.split(key, 2 * (num_layers + 1) + 1)
    # RandFourierFeature.proj: randn(in, F) * (2*pi / range)
    proj = jax.random.normal(keys[0], (in_features, num_frequencies),
                             dtype=jnp.float32) * (2.0 * math.pi / rff_range)

    layers = []
    fan_in = 2 * num_frequencies
    k_idx = 1
    for _ in range(num_layers):
        bound = 1.0 / math.sqrt(fan_in)
        w = jax.random.uniform(keys[k_idx], (hidden_features, fan_in),
                               minval=-bound, maxval=bound, dtype=jnp.float32)
        b = jax.random.uniform(keys[k_idx + 1], (hidden_features,),
                               minval=-bound, maxval=bound, dtype=jnp.float32)
        layers.append((w, b))
        fan_in = hidden_features
        k_idx += 2
    bound = 1.0 / math.sqrt(fan_in)
    wf = jax.random.uniform(keys[k_idx], (out_features, fan_in),
                            minval=-bound, maxval=bound, dtype=jnp.float32)
    bf = jax.random.uniform(keys[k_idx + 1], (out_features,),
                            minval=-bound, maxval=bound, dtype=jnp.float32)
    layers.append((wf, bf))
    return {"proj": proj, "layers": layers}


def ffn_forward(coords, params, *, sigma=1.0, scale=-1.0,
                beta=100.0, threshold=20.0, tm=2048):
    B, N, C = coords.shape
    M = B * N
    proj = params["proj"]
    layers = params["layers"]
    num_hidden = len(layers) - 1
    assert num_hidden >= 1
    F = proj.shape[1]
    hidden = layers[0][0].shape[0]
    out_features = layers[-1][0].shape[0]

    # Row tile: lane-dense (multiple of 128); capped so small inputs don't over-pad and
    # the grid keeps >= 2 steps whenever possible (both v7x TensorCores get work).
    half = -(-M // 2)
    tm_cap = ((half + 127) // 128) * 128
    tm_eff = max(128, min(tm, tm_cap))
    M_pad = -(-M // tm_eff) * tm_eff

    flat = coords.reshape(M, C).astype(jnp.float32)
    if M_pad != M:
        flat = jnp.pad(flat, ((0, M_pad - M), (0, 0)))
    coords_T = flat.T                                   # (C, M_pad): samples on lanes

    # ---- constant folding (done once, outside the kernel) ----
    projT = (proj * sigma).T                            # (F, C)
    scale_f = 1.0 if scale == -1 else scale / math.sqrt(F)
    w0, b0 = layers[0]
    w0_eff = (beta * scale_f) * w0                      # (H, 2F): beta & fourier scale folded
    w0_sin = w0_eff[:, :F]
    w0_cos = w0_eff[:, F:]
    b0_eff = (beta * b0).reshape(hidden, 1)

    args = [coords_T, projT, w0_sin, w0_cos, b0_eff]
    in_specs = [
        pl.BlockSpec((C, tm_eff), lambda i: (0, i)),    # coords tile (samples on lanes)
        pl.BlockSpec(projT.shape, lambda i: (0, 0)),    # weights: fully VMEM-resident
        pl.BlockSpec(w0_sin.shape, lambda i: (0, 0)),
        pl.BlockSpec(w0_cos.shape, lambda i: (0, 0)),
        pl.BlockSpec(b0_eff.shape, lambda i: (0, 0)),
    ]
    for (w, b) in layers[1:-1]:
        b_eff = (beta * b).reshape(-1, 1)               # bias carries the beta factor
        args += [w, b_eff]
        in_specs += [pl.BlockSpec(w.shape, lambda i: (0, 0)),
                     pl.BlockSpec(b_eff.shape, lambda i: (0, 0))]
    wf, bf = layers[-1]
    wf_eff = wf / beta                                  # undo the beta carried in s
    bf_eff = bf.reshape(out_features, 1)
    args += [wf_eff, bf_eff]
    in_specs += [pl.BlockSpec(wf_eff.shape, lambda i: (0, 0)),
                 pl.BlockSpec(bf_eff.shape, lambda i: (0, 0))]

    kernel = make_ffn_kernel(num_hidden, threshold)

    out = pl.pallas_call(
        kernel,
        out_shape=jax.ShapeDtypeStruct((out_features, M_pad), jnp.float32),
        grid=(M_pad // tm_eff,),
        in_specs=in_specs,
        out_specs=pl.BlockSpec((out_features, tm_eff), lambda i: (0, i)),
        compiler_params=pltpu.CompilerParams(
            dimension_semantics=("parallel",)),
    )(*args)

    return out[:, :M].T.reshape(B, N, out_features)


def ffn_reference(coords, params, *, sigma=1.0, scale=-1.0,
                  beta=100.0, threshold=20.0):
    """Plain-JAX reference mirroring the PyTorch forward (sanity check)."""
    B, N, C = coords.shape
    flat = coords.reshape(B * N, C)
    pe = flat @ (params["proj"] * sigma)
    h = jnp.concatenate([jnp.sin(pe), jnp.cos(pe)], axis=-1)
    if scale != -1:
        h = h * (scale / math.sqrt(params["proj"].shape[1]))
    for (w, b) in params["layers"][:-1]:
        z = h @ w.T + b
        bz = beta * z
        h = jnp.where(bz > threshold, z,
                      jnp.log1p(jnp.exp(jnp.minimum(bz, threshold))) / beta)
    wf, bf = params["layers"][-1]
    out = h @ wf.T + bf
    return out.reshape(B, N, -1)


if __name__ == "__main__":
    # Small shapes consistent with FFN: coords (batch, num_points, 3)
    B, N, C = 2, 256, 3          # M = 512 -> tile 256, grid of 2 parallel steps
    hidden_features = 64
    num_layers = 4
    num_frequencies = 32
    out_features = 1

    key = jax.random.PRNGKey(0)
    k_coords, k_params = jax.random.split(key)
    coords = jax.random.uniform(k_coords, (B, N, C), minval=-1.0, maxval=1.0,
                                dtype=jnp.float32)
    params = init_ffn_params(k_params, in_features=C, out_features=out_features,
                             hidden_features=hidden_features,
                             num_layers=num_layers,
                             num_frequencies=num_frequencies)

    out = ffn_forward(coords, params, sigma=1.0, scale=-1.0)
    out = jax.block_until_ready(out)

    ref = ffn_reference(coords, params, sigma=1.0, scale=-1.0)
    assert out.shape == (B, N, out_features)
    assert jnp.allclose(out, ref, atol=2e-4, rtol=1e-4), "mismatch vs reference"

    print("KERNEL_OK")
</pallas_src>

<mosaic_0001>
module attributes {stable_mosaic.version = 11 : i64} {
  func.func @kernel(%arg0: i32, %arg1: memref<3x256xf32, #tpu.memory_space<vmem>>, %arg2: memref<32x3xf32, #tpu.memory_space<vmem>>, %arg3: memref<64x32xf32, #tpu.memory_space<vmem>>, %arg4: memref<64x32xf32, #tpu.memory_space<vmem>>, %arg5: memref<64x1xf32, #tpu.memory_space<vmem>>, %arg6: memref<64x64xf32, #tpu.memory_space<vmem>>, %arg7: memref<64x1xf32, #tpu.memory_space<vmem>>, %arg8: memref<64x64xf32, #tpu.memory_space<vmem>>, %arg9: memref<64x1xf32, #tpu.memory_space<vmem>>, %arg10: memref<64x64xf32, #tpu.memory_space<vmem>>, %arg11: memref<64x1xf32, #tpu.memory_space<vmem>>, %arg12: memref<1x64xf32, #tpu.memory_space<vmem>>, %arg13: memref<1x1xf32, #tpu.memory_space<vmem>>, %arg14: memref<1x256xf32, #tpu.memory_space<vmem>>) attributes {dimension_semantics = [#tpu.dimension_semantics<parallel>], iteration_bounds = array<i64: 2>, scalar_prefetch = 0 : i64, scratch_operands = 0 : i64, tpu.core_type = #tpu.core_type<tc>, window_params = [{transform_indices = @transform_0, window_bounds = array<i64: 3, 256>}, {pipeline_mode = #tpu.pipeline_mode<synchronous>, transform_indices = @transform_1, window_bounds = array<i64: 32, 3>}, {pipeline_mode = #tpu.pipeline_mode<synchronous>, transform_indices = @transform_2, window_bounds = array<i64: 64, 32>}, {pipeline_mode = #tpu.pipeline_mode<synchronous>, transform_indices = @transform_3, window_bounds = array<i64: 64, 32>}, {pipeline_mode = #tpu.pipeline_mode<synchronous>, transform_indices = @transform_4, window_bounds = array<i64: 64, 1>}, {pipeline_mode = #tpu.pipeline_mode<synchronous>, transform_indices = @transform_5, window_bounds = array<i64: 64, 64>}, {pipeline_mode = #tpu.pipeline_mode<synchronous>, transform_indices = @transform_6, window_bounds = array<i64: 64, 1>}, {pipeline_mode = #tpu.pipeline_mode<synchronous>, transform_indices = @transform_7, window_bounds = array<i64: 64, 64>}, {pipeline_mode = #tpu.pipeline_mode<synchronous>, transform_indices = @transform_8, window_bounds = array<i64: 64, 1>}, {pipeline_mode = #tpu.pipeline_mode<synchronous>, transform_indices = @transform_9, window_bounds = array<i64: 64, 64>}, {pipeline_mode = #tpu.pipeline_mode<synchronous>, transform_indices = @transform_10, window_bounds = array<i64: 64, 1>}, {pipeline_mode = #tpu.pipeline_mode<synchronous>, transform_indices = @transform_11, window_bounds = array<i64: 1, 64>}, {pipeline_mode = #tpu.pipeline_mode<synchronous>, transform_indices = @transform_12, window_bounds = array<i64: 1, 1>}, {transform_indices = @transform_13, window_bounds = array<i64: 1, 256>}]} {
    %c0 = arith.constant 0 : index
    %c0_0 = arith.constant 0 : index
    %0 = vector.load %arg1[%c0, %c0_0] : memref<3x256xf32, #tpu.memory_space<vmem>>, vector<3x256xf32>
    %c0_1 = arith.constant 0 : index
    %c0_2 = arith.constant 0 : index
    %1 = vector.load %arg2[%c0_1, %c0_2] : memref<32x3xf32, #tpu.memory_space<vmem>>, vector<32x3xf32>
    %cst = arith.constant dense<0.000000e+00> : vector<32x256xf32>
    %2 = tpu.matmul %1, %0, %cst {dimension_numbers = #tpu.dot_dimension_numbers<[1], [0], [0], [1], [0, 0, 1, 1], [], []>} : vector<32x3xf32>, vector<3x256xf32>, vector<32x256xf32> -> vector<32x256xf32>
    %c0_3 = arith.constant 0 : index
    %c0_4 = arith.constant 0 : index
    %3 = vector.load %arg3[%c0_3, %c0_4] : memref<64x32xf32, #tpu.memory_space<vmem>>, vector<64x32xf32>
    %4 = math.sin %2 : vector<32x256xf32>
    %cst_5 = arith.constant dense<0.000000e+00> : vector<64x256xf32>
    %5 = tpu.matmul %3, %4, %cst_5 {dimension_numbers = #tpu.dot_dimension_numbers<[1], [0], [0], [1], [0, 0, 1, 1], [], []>} : vector<64x32xf32>, vector<32x256xf32>, vector<64x256xf32> -> vector<64x256xf32>
    %c0_6 = arith.constant 0 : index
    %c0_7 = arith.constant 0 : index
    %6 = vector.load %arg4[%c0_6, %c0_7] : memref<64x32xf32, #tpu.memory_space<vmem>>, vector<64x32xf32>
    %7 = math.cos %2 : vector<32x256xf32>
    %cst_8 = arith.constant dense<0.000000e+00> : vector<64x256xf32>
    %8 = tpu.matmul %6, %7, %cst_8 {dimension_numbers = #tpu.dot_dimension_numbers<[1], [0], [0], [1], [0, 0, 1, 1], [], []>} : vector<64x32xf32>, vector<32x256xf32>, vector<64x256xf32> -> vector<64x256xf32>
    %9 = arith.addf %5, %8 : vector<64x256xf32>
    %c0_9 = arith.constant 0 : index
    %c0_10 = arith.constant 0 : index
    %10 = vector.load %arg5[%c0_9, %c0_10] : memref<64x1xf32, #tpu.memory_space<vmem>>, vector<64x1xf32>
    %11 = vector.broadcast %10 : vector<64x1xf32> to vector<64x256xf32>
    %12 = arith.addf %9, %11 : vector<64x256xf32>
    %cst_11 = arith.constant 2.000000e+01 : f32
    %13 = vector.broadcast %cst_11 : f32 to vector<64x256xf32>
    %14 = arith.cmpf ogt, %12, %13 : vector<64x256xf32>
    %cst_12 = arith.constant 2.000000e+01 : f32
    %15 = vector.broadcast %cst_12 : f32 to vector<64x256xf32>
    %16 = arith.minimumf %12, %15 : vector<64x256xf32>
    %17 = math.exp %16 : vector<64x256xf32>
    %18 = math.log1p %17 : vector<64x256xf32>
    %19 = arith.select %14, %12, %18 : vector<64x256xi1>, vector<64x256xf32>
    %c0_13 = arith.constant 0 : index
    %c0_14 = arith.constant 0 : index
    %20 = vector.load %arg6[%c0_13, %c0_14] : memref<64x64xf32, #tpu.memory_space<vmem>>, vector<64x64xf32>
    %c0_15 = arith.constant 0 : index
    %c0_16 = arith.constant 0 : index
    %21 = vector.load %arg7[%c0_15, %c0_16] : memref<64x1xf32, #tpu.memory_space<vmem>>, vector<64x1xf32>
    %cst_17 = arith.constant dense<0.000000e+00> : vector<64x256xf32>
    %22 = tpu.matmul %20, %19, %cst_17 {dimension_numbers = #tpu.dot_dimension_numbers<[1], [0], [0], [1], [0, 0, 1, 1], [], []>} : vector<64x64xf32>, vector<64x256xf32>, vector<64x256xf32> -> vector<64x256xf32>
    %23 = vector.broadcast %21 : vector<64x1xf32> to vector<64x256xf32>
    %24 = arith.addf %22, %23 : vector<64x256xf32>
    %cst_18 = arith.constant 2.000000e+01 : f32
    %25 = vector.broadcast %cst_18 : f32 to vector<64x256xf32>
    %26 = arith.cmpf ogt, %24, %25 : vector<64x256xf32>
    %cst_19 = arith.constant 2.000000e+01 : f32
    %27 = vector.broadcast %cst_19 : f32 to vector<64x256xf32>
    %28 = arith.minimumf %24, %27 : vector<64x256xf32>
    %29 = math.exp %28 : vector<64x256xf32>
    %30 = math.log1p %29 : vector<64x256xf32>
    %31 = arith.select %26, %24, %30 : vector<64x256xi1>, vector<64x256xf32>
    %c0_20 = arith.constant 0 : index
    %c0_21 = arith.constant 0 : index
    %32 = vector.load %arg8[%c0_20, %c0_21] : memref<64x64xf32, #tpu.memory_space<vmem>>, vector<64x64xf32>
    %c0_22 = arith.constant 0 : index
    %c0_23 = arith.constant 0 : index
    %33 = vector.load %arg9[%c0_22, %c0_23] : memref<64x1xf32, #tpu.memory_space<vmem>>, vector<64x1xf32>
    %cst_24 = arith.constant dense<0.000000e+00> : vector<64x256xf32>
    %34 = tpu.matmul %32, %31, %cst_24 {dimension_numbers = #tpu.dot_dimension_numbers<[1], [0], [0], [1], [0, 0, 1, 1], [], []>} : vector<64x64xf32>, vector<64x256xf32>, vector<64x256xf32> -> vector<64x256xf32>
    %35 = vector.broadcast %33 : vector<64x1xf32> to vector<64x256xf32>
    %36 = arith.addf %34, %35 : vector<64x256xf32>
    %cst_25 = arith.constant 2.000000e+01 : f32
    %37 = vector.broadcast %cst_25 : f32 to vector<64x256xf32>
    %38 = arith.cmpf ogt, %36, %37 : vector<64x256xf32>
    %cst_26 = arith.constant 2.000000e+01 : f32
    %39 = vector.broadcast %cst_26 : f32 to vector<64x256xf32>
    %40 = arith.minimumf %36, %39 : vector<64x256xf32>
    %41 = math.exp %40 : vector<64x256xf32>
    %42 = math.log1p %41 : vector<64x256xf32>
    %43 = arith.select %38, %36, %42 : vector<64x256xi1>, vector<64x256xf32>
    %c0_27 = arith.constant 0 : index
    %c0_28 = arith.constant 0 : index
    %44 = vector.load %arg10[%c0_27, %c0_28] : memref<64x64xf32, #tpu.memory_space<vmem>>, vector<64x64xf32>
    %c0_29 = arith.constant 0 : index
    %c0_30 = arith.constant 0 : index
    %45 = vector.load %arg11[%c0_29, %c0_30] : memref<64x1xf32, #tpu.memory_space<vmem>>, vector<64x1xf32>
    %cst_31 = arith.constant dense<0.000000e+00> : vector<64x256xf32>
    %46 = tpu.matmul %44, %43, %cst_31 {dimension_numbers = #tpu.dot_dimension_numbers<[1], [0], [0], [1], [0, 0, 1, 1], [], []>} : vector<64x64xf32>, vector<64x256xf32>, vector<64x256xf32> -> vector<64x256xf32>
    %47 = vector.broadcast %45 : vector<64x1xf32> to vector<64x256xf32>
    %48 = arith.addf %46, %47 : vector<64x256xf32>
    %cst_32 = arith.constant 2.000000e+01 : f32
    %49 = vector.broadcast %cst_32 : f32 to vector<64x256xf32>
    %50 = arith.cmpf ogt, %48, %49 : vector<64x256xf32>
    %cst_33 = arith.constant 2.000000e+01 : f32
    %51 = vector.broadcast %cst_33 : f32 to vector<64x256xf32>
    %52 = arith.minimumf %48, %51 : vector<64x256xf32>
    %53 = math.exp %52 : vector<64x256xf32>
    %54 = math.log1p %53 : vector<64x256xf32>
    %55 = arith.select %50, %48, %54 : vector<64x256xi1>, vector<64x256xf32>
    %c0_34 = arith.constant 0 : index
    %c0_35 = arith.constant 0 : index
    %56 = vector.load %arg12[%c0_34, %c0_35] : memref<1x64xf32, #tpu.memory_space<vmem>>, vector<1x64xf32>
    %c0_36 = arith.constant 0 : index
    %c0_37 = arith.constant 0 : index
    %57 = vector.load %arg13[%c0_36, %c0_37] : memref<1x1xf32, #tpu.memory_space<vmem>>, vector<1x1xf32>
    %cst_38 = arith.constant dense<0.000000e+00> : vector<1x256xf32>
    %58 = tpu.matmul %56, %55, %cst_38 {dimension_numbers = #tpu.dot_dimension_numbers<[1], [0], [0], [1], [0, 0, 1, 1], [], []>} : vector<1x64xf32>, vector<64x256xf32>, vector<1x256xf32> -> vector<1x256xf32>
    %59 = vector.broadcast %57 : vector<1x1xf32> to vector<1x256xf32>
    %60 = arith.addf %58, %59 : vector<1x256xf32>
    %c0_39 = arith.constant 0 : index
    %c0_40 = arith.constant 0 : index
    %61 = vector.load %arg14[%c0_39, %c0_40] : memref<1x256xf32, #tpu.memory_space<vmem>>, vector<1x256xf32>
    tpu.vector_store %arg14[%c0_39, %c0_40], %60 {strides = array<i32>} : memref<1x256xf32, #tpu.memory_space<vmem>>, vector<1x256xf32>,
    return
  }
  func.func @transform_0(%arg0: i32) -> (i32, i32) {
    %c0_i32 = arith.constant 0 : i32
    %c0_i32_0 = arith.constant 0 : i32
    return %c0_i32, %arg0 : i32, i32
  }
  func.func @transform_1(%arg0: i32) -> (i32, i32) {
    %c0_i32 = arith.constant 0 : i32
    %c0_i32_0 = arith.constant 0 : i32
    %c0_i32_1 = arith.constant 0 : i32
    return %c0_i32, %c0_i32_0 : i32, i32
  }
  func.func @transform_2(%arg0: i32) -> (i32, i32) {
    %c0_i32 = arith.constant 0 : i32
    %c0_i32_0 = arith.constant 0 : i32
    %c0_i32_1 = arith.constant 0 : i32
    return %c0_i32, %c0_i32_0 : i32, i32
  }
  func.func @transform_3(%arg0: i32) -> (i32, i32) {
    %c0_i32 = arith.constant 0 : i32
    %c0_i32_0 = arith.constant 0 : i32
    %c0_i32_1 = arith.constant 0 : i32
    return %c0_i32, %c0_i32_0 : i32, i32
  }
  func.func @transform_4(%arg0: i32) -> (i32, i32) {
    %c0_i32 = arith.constant 0 : i32
    %c0_i32_0 = arith.constant 0 : i32
    %c0_i32_1 = arith.constant 0 : i32
    return %c0_i32, %c0_i32_0 : i32, i32
  }
  func.func @transform_5(%arg0: i32) -> (i32, i32) {
    %c0_i32 = arith.constant 0 : i32
    %c0_i32_0 = arith.constant 0 : i32
    %c0_i32_1 = arith.constant 0 : i32
    return %c0_i32, %c0_i32_0 : i32, i32
  }
  func.func @transform_6(%arg0: i32) -> (i32, i32) {
    %c0_i32 = arith.constant 0 : i32
    %c0_i32_0 = arith.constant 0 : i32
    %c0_i32_1 = arith.constant 0 : i32
    return %c0_i32, %c0_i32_0 : i32, i32
  }
  func.func @transform_7(%arg0: i32) -> (i32, i32) {
    %c0_i32 = arith.constant 0 : i32
    %c0_i32_0 = arith.constant 0 : i32
    %c0_i32_1 = arith.constant 0 : i32
    return %c0_i32, %c0_i32_0 : i32, i32
  }
  func.func @transform_8(%arg0: i32) -> (i32, i32) {
    %c0_i32 = arith.constant 0 : i32
    %c0_i32_0 = arith.constant 0 : i32
    %c0_i32_1 = arith.constant 0 : i32
    return %c0_i32, %c0_i32_0 : i32, i32
  }
  func.func @transform_9(%arg0: i32) -> (i32, i32) {
    %c0_i32 = arith.constant 0 : i32
    %c0_i32_0 = arith.constant 0 : i32
    %c0_i32_1 = arith.constant 0 : i32
    return %c0_i32, %c0_i32_0 : i32, i32
  }
  func.func @transform_10(%arg0: i32) -> (i32, i32) {
    %c0_i32 = arith.constant 0 : i32
    %c0_i32_0 = arith.constant 0 : i32
    %c0_i32_1 = arith.constant 0 : i32
    return %c0_i32, %c0_i32_0 : i32, i32
  }
  func.func @transform_11(%arg0: i32) -> (i32, i32) {
    %c0_i32 = arith.constant 0 : i32
    %c0_i32_0 = arith.constant 0 : i32
    %c0_i32_1 = arith.constant 0 : i32
    return %c0_i32, %c0_i32_0 : i32, i32
  }
  func.func @transform_12(%arg0: i32) -> (i32, i32) {
    %c0_i32 = arith.constant 0 : i32
    %c0_i32_0 = arith.constant 0 : i32
    %c0_i32_1 = arith.constant 0 : i32
    return %c0_i32, %c0_i32_0 : i32, i32
  }
  func.func @transform_13(%arg0: i32) -> (i32, i32) {
    %c0_i32 = arith.constant 0 : i32
    %c0_i32_0 = arith.constant 0 : i32
    return %c0_i32, %arg0 : i32, i32
  }
}

</mosaic_0001>

<bundles_post_ra>
// kernel: tpu_custom_call.1
= control target key start
LH: loop header
LB: loop body
LE: loop exit
PB: predicated region body
PF: predicated region fallthrough
CT: control target
= control target key end

     0   :  { %s7567_s0 = inlined_call_operand.vmem [shape: f32[3,512], index: 0, kind: input, shape index: {}]   ;;  %s7568_s1 = inlined_call_operand.vmem [shape: f32[32,3], index: 1, kind: input, shape index: {}]   ;;  %s7569_s2 = inlined_call_operand.vmem [shape: f32[64,32], index: 2, kind: input, shape index: {}]   ;;  %s7570_s3 = inlined_call_operand.vmem [shape: f32[64,32], index: 3, kind: input, shape index: {}]   ;;  %s7571_s4 = inlined_call_operand.vmem [shape: f32[64,1], index: 4, kind: input, shape index: {}]   ;;  %s7572_s5 = inlined_call_operand.vmem [shape: f32[64,64], index: 5, kind: input, shape index: {}]   ;;  %s7573_s6 = inlined_call_operand.vmem [shape: f32[64,1], index: 6, kind: input, shape index: {}]   ;;  %s7574_s7 = inlined_call_operand.vmem [shape: f32[64,64], index: 7, kind: input, shape index: {}]   ;;  %s7575_s8 = inlined_call_operand.vmem [shape: f32[64,1], index: 8, kind: input, shape index: {}]   ;;  %s7576_s9 = inlined_call_operand.vmem [shape: f32[64,64], index: 9, kind: input, shape index: {}]   ;;  %s7577_s10 = inlined_call_operand.vmem [shape: f32[64,1], index: 10, kind: input, shape index: {}]   ;;  %s7578_s11 = inlined_call_operand.vmem [shape: f32[1,64], index: 11, kind: input, shape index: {}]   ;;  %s7579_s12 = inlined_call_operand.<no memory space> [shape: f32[1,1], index: 12, kind: input, shape index: {}]   ;;  %s7580_s13 = inlined_call_operand.hbm [shape: f32[1,512], index: 13, kind: output, shape index: {}]  }
   0x1   :  { %7675 = sst [smem:[#allocation14_spill]] %s7567_s0  ;;  %v18_v0 = vstv %s7579_s12 }
   0x2   :  { %7676 = sst [smem:[#allocation15_spill]] %s7568_s1  ;;  %19 = vst [vmem:[#allocation2] sm:$0x1] %v18_v0 }
   0x3   :  { %7677 = sst [smem:[#allocation16_spill]] %s7569_s2 }
   0x4   :  { %20 = vsyncpa [#allocation4], 0 }
   0x5   :  { %22 = vsyncpa [#allocation4 + $0x1], 0  ;;  %s4875_s27 = smov 0   ;;  %s4877_s28 = smov 0  }
   0x6   :  { %s4879_s29 = smov 0   ;;  %s4881_s30 = smov 0  }
   0x7 LB: > { %s4896_s12 = sadd.s32 4294967295, %s4790_s30   ;;  %s4227_s14 = sadd.s32 4294967294, %s4790_s30   ;;  %s4790_s30 = sphi %s4881_s30, %s7957_s30   ;;  %s4786_s29 = sphi %s4879_s29, %s7956_s29   ;;  %s4782_s28 = sphi %s4877_s28, %s7955_s28   ;;  %s4778_s27 = sphi %s4875_s27, %s7954_s27  }
   0x8   : > { %s4900_s15 = sadd.s32 1, %s4790_s30   ;;  %s313_s16 = sadd.s32 1, %s4786_s29 }
   0x9   : > { %s310_s17 = ssub.s32 %s4790_s30, %s4900_s15  ;;  %p323_p0 = scmp.ne.s32.totalorder %s4786_s29, %s4782_s28 }
   0xa   : > { %p311_p1 = scmp.eq.s32.totalorder %s310_s17, 0  ;;  %p324_p2 = scmp.eq.s32.totalorder %s4896_s12, 1 }
   0xb   : > { %p329_p3 = scmp.ne.s32.totalorder %s4782_s28, %s4778_s27  ;;  %p330_p4 = scmp.eq.s32.totalorder %s4227_s14, 1 }
   0xc   : > { %s4911_s18 = scalar_select %p311_p1, %s4786_s29, %s313_s16  }
   0xd   : > { %p4913_p5 = por %p324_p2, %p323_p0  ;;  %p4917_p6 = por %p330_p4, %p329_p3 }
   0xe   : > { %p4230_p7 = scmp.ge.s32.totalorder %s4790_s30, 1  ;;  %p393_p8 = scmp.lt.s32.totalorder %s4790_s30, 3 }
  0x10   : > { %p394_p9 = pnand %p4230_p7, %p393_p8 }
  0x12   : > { %397 = sbr.rel (%p394_p9) target bundleno = 1794 (0x702), region = 72 }
  0x17   : > { %s4232_s21 = sshll.u32 %s4896_s12, 1  ;;  %v7581_v1 = vmov 0.0   ;;  %s7680_s0 = sld [smem:[#allocation14_spill]]  ;;  %vm464_vm0 = vcmask 1042432   ;;  %vm451_vm1 = vcmask 23552  }
  0x18   : > { %p438_p10 = scmp.lt.s32.totalorder %s4232_s21, 3  ;;  %533 = vmatprep.mubr.f32.mxu0 %v7581_v1  ;;  %2331 = vmatprep.mubr.f32.mxu1 %v7581_v1  ;;  %s7681_s1 = sld [smem:[#allocation15_spill]]  ;;  %v7598_v27 = vmov 683565275   ;;  %v7594_v29 = vmov 2475754826  }
  0x19   : > { %v4795_v32 = vmov 2131351028   ;;  %v7596_v35 = vmov 2102212464   ;;  %v7591_v38 = vmov 920167782  }
  0x1a   : > { %s7959_s21 = smov (!%p438_p10, %s4232_s21), 3  ;;  %v7589_v41 = vmov 1326507024   ;;  %s7725_s2 = sld [smem:[#allocation16_spill]] }
  0x1b   : > { %s4233_s22 = sshll.u32 %s7959_s21, 2  ;;  %s434_s14 = sand.u32 1, %s4782_s28  }
  0x1c   : > { %s4231_s16 = sshll.u32 %s434_s14, 1  ;;  %s4350_s17 = sshll.u32 %s4896_s12, 5 }
  0x1d   : > { %s441_s25 = scalar_lea.vmem %s7680_s0, %s4233_s22  ;;  %s436_s21 = scalar_lea.vmem [#allocation3], %s4231_s16 }
  0x1e   : > { %v444_v2 = vld [vmem:[%s441_s25] sm:$0x77]  ;;  %v446_v5 = vld [vmem:[%s7681_s1 + $0x8] sm:$0xff]  ;;  %v447_v6 = vld [vmem:[%s7681_s1 + $0x10] sm:$0xff]  ;;  %s4168_s22 = sshll.u32 %s436_s21, 4  ;;  %s4166_s25 = scalar_lea.hbm %s7580_s13, %s4350_s17  ;;  %s4169_s22 = int_to_ptr.vmem [resolvable:$true] %s4168_s22 }
  0x1f   : > { %v450_v3 = vcombine.high %v444_v2, %v444_v2  ;;  %v445_v4 = vld [vmem:[%s7681_s1] sm:$0xff]  ;;  %v448_v7 = vld [vmem:[%s7681_s1 + $0x18] sm:$0xff]  ;;  %s4154_s26 = scalar_lea.sflag [#allocation4], %s434_s14  ;;  %s4730_s0 = scalar_lea.vmem %s4169_s22, 32 }
  0x20   : > { %p4731_p11 = scmp.ne.s32.totalorder %s4169_s22, %s4730_s0  ;;  %s4801_s1 = smov [#allocation3]  }
  0x21   : > { %4234 = vmatprep.subr.msk.mxu0 %vm464_vm0, %v450_v3 }
  0x22   : > { %4235 = vmatpush1.msk.msra.mxu0 %vm464_vm0, %v444_v2  ;;  %p4732_p12 = pnand %p4731_p11, %p4913_p5 }
  0x23   : > { %4236 = vmatmul.mubr.msk.f32.vlgmr.msra.gmra.mxu0 %vm451_vm1, %v445_v4 }
  0x24   : > { %539 = vmatprep.mubr.f32.mxu0 %v7581_v1  ;;  %p4733_p13 = pneg %p4732_p12 }
  0x27   : > { %4237 = vmatmul.mubr.msk.f32.gmra.mxu0 %vm451_vm1, %v446_v5 }
  0x28   : > { %545 = vmatprep.mubr.f32.mxu0 %v7581_v1 }
  0x2b   : > { %4238 = vmatmul.mubr.msk.f32.gmra.mxu0 %vm451_vm1, %v447_v6 }
  0x2c   : > { %551 = vmatprep.mubr.f32.mxu0 %v7581_v1 }
  0x2f   : > { %4239 = vmatmul.mubr.msk.f32.gmra.mxu0 %vm451_vm1, %v448_v7 }
  0x30   : > { %2319 = vmatprep.mubr.f32.mxu0 %v7581_v1 }
  0xe3   : > { %v4945_v8 = vpop.f32.mrf.mxu0 }
  0xe4   : > { %v569_v9 = vand.u32 2139095040, %v4945_v8  ;;  %v7584_v13 = vand.u32 2147483647, %v4945_v8 }
  0xe5   : > { %v4948_v10 = vpop.f32.mrf.mxu0 }
  0xe6   : > { %v570_v11 = vshrl.u32 %v569_v9, 23  ;;  %v673_v12 = vand.u32 2139095040, %v4948_v10  ;;  %v573_v18 = vand.u32 8388607, %v7584_v13  ;;  %v7586_v61 = vand.u32 2147483647, %v4948_v10 }
  0xe7   : > { %v4954_v21 = vpop.f32.mrf.mxu0 }
  0xe8   : > { %v4240_v14 = vadd.s32 4294967169, %v570_v11  ;;  %v674_v15 = vshrl.u32 %v673_v12, 23  ;;  %v574_v23 = vor.u32 8388608, %v573_v18  ;;  %v777_v25 = vand.u32 2139095040, %v4954_v21 }
  0xea   : > { %v576_v16 = vadd.s32 1, %v4240_v14  ;;  %v4244_v17 = vadd.s32 4294967169, %v674_v15  ;;  %v778_v52 = vshrl.u32 %v777_v25, 23  ;;  %v614_v60 = vshll.u32 %v574_v23, 8 }
  0xec   : > { %vm577_vm2 = vcmp.gt.s32.totalorder %v576_v16, 0  ;;  %v680_v20 = vadd.s32 1, %v4244_v17  ;;  %v4248_v63 = vadd.s32 4294967169, %v778_v52 }
  0xed   : > { %v578_v19 = vsel %vm577_vm2, %v576_v16, 0 }
  0xee   : > { %v580_v22 = vand.u32 31, %v578_v19  ;;  %v4959_v26 = vshrl.u32 %v578_v19, 5  ;;  %vm681_vm3 = vcmp.gt.s32.totalorder %v680_v20, 0  ;;  %v784_v18 = vadd.s32 1, %v4248_v63 }
  0xef   : > { %v682_v46 = vsel %vm681_vm3, %v680_v20, 0  ;;  %v677_v20 = vand.u32 8388607, %v7586_v61 }
  0xf0   : > { %v4956_v24 = vsub.s32 32, %v580_v22  ;;  %v583_v28 = vshll.u32 %v7598_v27, %v580_v22  ;;  %v586_v30 = vshll.u32 %v7594_v29, %v580_v22  ;;  %v589_v34 = vshll.u32 %v4795_v32, %v580_v22 }
  0xf1   : > { %v592_v37 = vshll.u32 %v7596_v35, %v580_v22  ;;  %v595_v40 = vshll.u32 %v7591_v38, %v580_v22  ;;  %vm598_vm4 = vcmp.lt.s32.totalorder %v4959_v26, 1  ;;  %v684_v49 = vand.u32 31, %v682_v46 }
  0xf2   : > { %v584_v31 = vshrl.u32 %v7594_v29, %v4956_v24  ;;  %v587_v33 = vshrl.u32 %v4795_v32, %v4956_v24  ;;  %v590_v36 = vshrl.u32 %v7596_v35, %v4956_v24  ;;  %v593_v39 = vshrl.u32 %v7591_v38, %v4956_v24 }
  0xf3   : > { %v596_v42 = vshrl.u32 %v7589_v41, %v4956_v24  ;;  %vm601_vm5 = vcmp.lt.s32.totalorder %v4959_v26, 4  ;;  %vm600_vm6 = vcmp.lt.s32.totalorder %v4959_v26, 3  ;;  %vm599_vm7 = vcmp.lt.s32.totalorder %v4959_v26, 2 }
  0xf4   : > { %v585_v43 = vor.u32 %v584_v31, %v583_v28  ;;  %v588_v44 = vor.u32 %v587_v33, %v586_v30  ;;  %v591_v45 = vor.u32 %v590_v36, %v589_v34  ;;  %v594_v47 = vor.u32 %v593_v39, %v592_v37 }
  0xf5   : > { %v597_v48 = vor.u32 %v596_v42, %v595_v40  ;;  %v4993_v57 = vsub.s32 32, %v684_v49  ;;  %v5000_v62 = vshrl.u32 %v682_v46, 5  ;;  %v696_v11 = vshll.u32 %v7596_v35, %v684_v49 }
  0xf6   : > { %v606_v50 = vsel %vm598_vm4, %v585_v43, %v588_v44  ;;  %v610_v51 = vsel %vm598_vm4, %v588_v44, %v591_v45  ;;  %v607_v53 = vsel %vm601_vm5, %v594_v47, 920167782  ;;  %v699_v12 = vshll.u32 %v7591_v38, %v684_v49 }
  0xf7   : > { %v611_v54 = vsel %vm601_vm5, %v597_v48, 1326507024  ;;  %v608_v55 = vsel %vm600_vm6, %v591_v45, %v607_v53  ;;  %v688_v5 = vshrl.u32 %v7594_v29, %v4993_v57  ;;  %v691_v6 = vshrl.u32 %v4795_v32, %v4993_v57  ;;  %v5059_v48 = vpop.f32.mrf.mxu0 }
  0xf8   : > { %v612_v56 = vsel %vm600_vm6, %v594_v47, %v611_v54  ;;  %v609_v58 = vsel %vm599_vm7, %v606_v50, %v608_v55  ;;  %v694_v7 = vshrl.u32 %v7596_v35, %v4993_v57  ;;  %v697_v9 = vshrl.u32 %v7591_v38, %v4993_v57 }
  0xf9   : > { %v613_v59 = vsel %vm599_vm7, %v610_v51, %v612_v56  ;;  %v5005_v3 = vmul.u32.u64.low %v614_v60, %v609_v58  ;;  %v5006_v4 = vmul.u32.u64.high %v614_v60, %v609_v58, %v5005_v3  ;;  %v700_v14 = vshrl.u32 %v7589_v41, %v4993_v57 }
  0xfa   : > { %v5002_v0 = vmul.u32.u64.low %v614_v60, %v613_v59  ;;  %v5003_v2 = vmul.u32.u64.high %v614_v60, %v613_v59, %v5002_v0  ;;  %v687_v15 = vshll.u32 %v7598_v27, %v684_v49  ;;  %v690_v16 = vshll.u32 %v7594_v29, %v684_v49 }
  0xfb   : > { %v693_v17 = vshll.u32 %v4795_v32, %v684_v49  ;;  %v603_v19 = vsel %vm601_vm5, %v591_v45, 2102212464  ;;  %v698_v22 = vor.u32 %v697_v9, %v696_v11  ;;  %v701_v23 = vor.u32 %v700_v14, %v699_v12 }
  0xfc   : > { %v689_v25 = vor.u32 %v688_v5, %v687_v15  ;;  %v5028_v28 = vor.u32 %v691_v6, %v690_v16  ;;  %vm705_vm8 = vcmp.lt.s32.totalorder %v5000_v62, 4  ;;  %v582_v31 = vshrl.u32 %v7598_v27, %v4956_v24 }
  0xfd   : > { %v695_v30 = vor.u32 %v694_v7, %v693_v17  ;;  %v711_v33 = vsel %vm705_vm8, %v698_v22, 920167782  ;;  %v715_v34 = vsel %vm705_vm8, %v701_v23, 1326507024  ;;  %vm785_vm9 = vcmp.gt.s32.totalorder %v784_v18, 0 }
  0xfe   : > { %v602_v36 = vsel %vm598_vm4, %v582_v31, %v585_v43  ;;  %v604_v37 = vsel %vm600_vm6, %v588_v44, %v603_v19  ;;  %vm702_vm10 = vcmp.lt.s32.totalorder %v5000_v62, 1  ;;  %vm704_vm11 = vcmp.lt.s32.totalorder %v5000_v62, 3 }
  0xff   : > { %v624_v39 = vadd.s32 1, %v5006_v4  ;;  %v678_v24 = vor.u32 8388608, %v677_v20  ;;  %v710_v40 = vsel %vm702_vm10, %v689_v25, %v5028_v28  ;;  %v712_v42 = vsel %vm704_vm11, %v695_v30, %v711_v33 }
 0x100   : > { %vm623_vm12 = vc.u32 %v5003_v2, %v5005_v3  ;;  %v714_v43 = vsel %vm702_vm10, %v5028_v28, %v695_v30  ;;  %v716_v44 = vsel %vm704_vm11, %v698_v22, %v715_v34  ;;  %v786_v45 = vsel %vm785_vm9, %v784_v18, 0 }
 0x101   : > { %v605_v46 = vsel %vm599_vm7, %v602_v36, %v604_v37  ;;  %vm703_vm13 = vcmp.lt.s32.totalorder %v5000_v62, 2  ;;  %v788_v47 = vand.u32 31, %v786_v45  ;;  %v625_v50 = vsel %vm623_vm12, %v624_v39, %v5006_v4 }
 0x102   : > { %v713_v49 = vsel %vm703_vm13, %v710_v40, %v712_v42  ;;  %v717_v51 = vsel %vm703_vm13, %v714_v43, %v716_v44  ;;  %v718_v52 = vshll.u32 %v678_v24, 8  ;;  %v621_v54 = vmul.u32 %v614_v60, %v605_v46 }
 0x103   : > { %v5066_v53 = vsub.s32 32, %v788_v47  ;;  %v881_v26 = vand.u32 2139095040, %v5059_v48  ;;  %v7585_v58 = vand.u32 2147483647, %v4954_v21  ;;  %v800_v6 = vshll.u32 %v7596_v35, %v788_v47 }
 0x104   : > { %v5069_v55 = vmul.u32.u64.low %v718_v52, %v713_v49  ;;  %v5070_v56 = vmul.u32.u64.high %v718_v52, %v713_v49, %v5069_v55  ;;  %v626_v59 = vadd.s32 %v625_v50, %v621_v54  ;;  %v5086_v9 = vshrl.u32 %v786_v45, 5 }
 0x105   : > { %v5074_v63 = vmul.u32.u64.low %v718_v52, %v717_v51  ;;  %v5075_v0 = vmul.u32.u64.high %v718_v52, %v717_v51, %v5074_v63  ;;  %v792_v4 = vshrl.u32 %v7594_v29, %v5066_v53  ;;  %v795_v5 = vshrl.u32 %v4795_v32, %v5066_v53 }
 0x106   : > { %v798_v60 = vshrl.u32 %v7596_v35, %v5066_v53  ;;  %v801_v7 = vshrl.u32 %v7591_v38, %v5066_v53  ;;  %v791_v11 = vshll.u32 %v7598_v27, %v788_v47  ;;  %v794_v12 = vshll.u32 %v7594_v29, %v788_v47 }
 0x107   : > { %v882_v14 = vshrl.u32 %v881_v26, 23  ;;  %v797_v15 = vshll.u32 %v4795_v32, %v788_v47  ;;  %v803_v17 = vshll.u32 %v7591_v38, %v788_v47  ;;  %v804_v18 = vshrl.u32 %v7589_v41, %v5066_v53 }
 0x108   : > { %v802_v16 = vor.u32 %v801_v7, %v800_v6  ;;  %v627_v19 = vadd.s32 536870912, %v626_v59  ;;  %v686_v20 = vshrl.u32 %v7598_v27, %v4993_v57  ;;  %v707_v22 = vsel %vm705_vm8, %v695_v30, 2102212464 }
 0x109   : > { %v781_v23 = vand.u32 8388607, %v7585_v58  ;;  %v793_v31 = vor.u32 %v792_v4, %v791_v11  ;;  %v796_v33 = vor.u32 %v795_v5, %v794_v12  ;;  %v799_v34 = vor.u32 %v798_v60, %v797_v15 }
 0x10a   : > { %v805_v36 = vor.u32 %v804_v18, %v803_v17  ;;  %vm809_vm14 = vcmp.lt.s32.totalorder %v5086_v9, 4  ;;  %v706_v37 = vsel %vm702_vm10, %v686_v20, %v689_v25  ;;  %v4252_v24 = vadd.s32 4294967169, %v882_v14 }
 0x10b   : > { %v815_v39 = vsel %vm809_vm14, %v802_v16, 920167782  ;;  %v5107_v30 = vshrl.u32 %v627_v19, 30  ;;  %v708_v40 = vsel %vm704_vm11, %v5028_v28, %v707_v22  ;;  %vm806_vm15 = vcmp.lt.s32.totalorder %v5086_v9, 1 }
 0x10c   : > { %v819_v57 = vsel %vm809_vm14, %v805_v36, 1326507024  ;;  %vm808_vm0 = vcmp.lt.s32.totalorder %v5086_v9, 3  ;;  %v728_v42 = vadd.s32 1, %v5070_v56  ;;  %v782_v25 = vor.u32 8388608, %v781_v23 }
 0x10d   : > { %v814_v43 = vsel %vm806_vm15, %v793_v31, %v796_v33  ;;  %v816_v44 = vsel %vm808_vm0, %v799_v34, %v815_v39  ;;  %vm727_vm1 = vc.u32 %v5075_v0, %v5069_v55  ;;  %v818_v45 = vsel %vm806_vm15, %v796_v33, %v799_v34 }
 0x10e   : > { %v820_v28 = vsel %vm808_vm0, %v802_v16, %v819_v57  ;;  %v709_v46 = vsel %vm703_vm13, %v706_v37, %v708_v40  ;;  %vm807_vm2 = vcmp.lt.s32.totalorder %v5086_v9, 2  ;;  %v888_v47 = vadd.s32 1, %v4252_v24 }
 0x10f   : > { %v629_v49 = vshll.u32 %v5107_v30, 30  ;;  %v817_v50 = vsel %vm807_vm2, %v814_v43, %v816_v44  ;;  %v729_v51 = vsel %vm727_vm1, %v728_v42, %v5070_v56  ;;  %v821_v54 = vsel %vm807_vm2, %v818_v45, %v820_v28 }
 0x110   : > { %v822_v26 = vshll.u32 %v782_v25, 8  ;;  %v725_v63 = vmul.u32 %v718_v52, %v709_v46  ;;  %vm889_vm3 = vcmp.gt.s32.totalorder %v888_v47, 0  ;;  %v811_v56 = vsel %vm809_vm14, %v799_v34, 2102212464  ;;  %v5171_v25 = vpop.f32.mrf.mxu0 }
 0x111   : > { %v890_v62 = vsel %vm889_vm3, %v888_v47, 0  ;;  %v5138_v60 = vsub.s32 %v626_v59, %v629_v49  ;;  %v7588_v14 = vand.u32 2147483647, %v5059_v48  ;;  %v790_v52 = vshrl.u32 %v7598_v27, %v5066_v53 }
 0x112   : > { %v5134_v4 = vmul.u32.u64.low %v822_v26, %v817_v50  ;;  %v5135_v5 = vmul.u32.u64.high %v822_v26, %v817_v50, %v5134_v4  ;;  %v730_v6 = vadd.s32 %v729_v51, %v725_v63  ;;  %v892_v12 = vand.u32 31, %v890_v62 }
 0x113   : > { %v5140_v7 = vmul.u32.u64.low %v822_v26, %v821_v54  ;;  %v5141_v11 = vmul.u32.u64.high %v822_v26, %v821_v54, %v5140_v7  ;;  %v632_v16 = vsub.s32 0, %v5138_v60  ;;  %v810_v59 = vsel %vm806_vm15, %v790_v52, %v793_v31 }
 0x114   : > { %v893_v15 = vsub.s32 32, %v892_v12  ;;  %v731_v17 = vadd.s32 536870912, %v730_v6  ;;  %v812_v18 = vsel %vm808_vm0, %v796_v33, %v811_v56  ;;  %v885_v19 = vand.u32 8388607, %v7588_v14 }
 0x115   : > { %v832_v20 = vadd.s32 1, %v5135_v5  ;;  %v4241_v34 = vmin.u32 %v632_v16, %v5138_v60  ;;  %v813_v31 = vsel %vm807_vm2, %v810_v59, %v812_v18  ;;  %vm831_vm4 = vc.u32 %v5141_v11, %v5134_v4 }
 0x116   : > { %v896_v22 = vshrl.u32 %v7594_v29, %v893_v15  ;;  %v899_v23 = vshrl.u32 %v4795_v32, %v893_v15  ;;  %v902_v53 = vshrl.u32 %v7596_v35, %v893_v15  ;;  %v5160_v36 = vshrl.u32 %v731_v17, 30 }
 0x117   : > { %v891_v33 = vshrl.u32 %v890_v62, 5  ;;  %v895_v37 = vshll.u32 %v7598_v27, %v892_v12  ;;  %v898_v39 = vshll.u32 %v7594_v29, %v892_v12  ;;  %v901_v57 = vshll.u32 %v4795_v32, %v892_v12 }
 0x118   : > { %v886_v24 = vor.u32 8388608, %v885_v19  ;;  %v904_v40 = vshll.u32 %v7596_v35, %v892_v12  ;;  %v905_v42 = vshrl.u32 %v7591_v38, %v893_v15  ;;  %v833_v9 = vsel %vm831_vm4, %v832_v20, %v5135_v5 }
 0x119   : > { %v897_v43 = vor.u32 %v896_v22, %v895_v37  ;;  %v900_v44 = vor.u32 %v899_v23, %v898_v39  ;;  %v903_v45 = vor.u32 %v902_v53, %v901_v57  ;;  %v829_v28 = vmul.u32 %v822_v26, %v813_v31 }
 0x11a   : > { %v906_v46 = vor.u32 %v905_v42, %v904_v40  ;;  %v907_v47 = vshll.u32 %v7591_v38, %v892_v12  ;;  %v908_v49 = vshrl.u32 %v7589_v41, %v893_v15  ;;  %v634_v50 = vclz %v4241_v34 }
 0x11b   : > { %v733_v51 = vshll.u32 %v5160_v36, 30  ;;  %vm910_vm5 = vcmp.lt.s32.totalorder %v891_v33, 1  ;;  %v985_v54 = vand.u32 2139095040, %v5171_v25  ;;  %v834_v63 = vadd.s32 %v833_v9, %v829_v28 }
 0x11c   : > { %v894_v62 = vshrl.u32 %v7598_v27, %v893_v15  ;;  %v909_v7 = vor.u32 %v908_v49, %v907_v47  ;;  %vm913_vm6 = vcmp.lt.s32.totalorder %v891_v33, 4  ;;  %vm912_vm7 = vcmp.lt.s32.totalorder %v891_v33, 3 }
 0x11d   : > { %v915_v5 = vsel %vm913_vm6, %v903_v45, 2102212464  ;;  %v918_v56 = vsel %vm910_vm5, %v897_v43, %v900_v44  ;;  %v919_v26 = vsel %vm913_vm6, %v906_v46, 920167782  ;;  %vm911_vm8 = vcmp.lt.s32.totalorder %v891_v33, 2 }
 0x11e   : > { %v920_v52 = vsel %vm912_vm7, %v903_v45, %v919_v26  ;;  %v922_v12 = vsel %vm910_vm5, %v900_v44, %v903_v45  ;;  %v926_v16 = vshll.u32 %v886_v24, 8  ;;  %v5179_v17 = vsub.s32 %v730_v6, %v733_v51 }
 0x11f   : > { %v914_v59 = vsel %vm910_vm5, %v894_v62, %v897_v43  ;;  %v921_v18 = vsel %vm911_vm8, %v918_v56, %v920_v52  ;;  %v923_v19 = vsel %vm913_vm6, %v909_v7, 1326507024  ;;  %v916_v20 = vsel %vm912_vm7, %v900_v44, %v915_v5  ;;  %v5195_v44 = vpop.f32.mrf.mxu0 }
 0x120   : > { %v924_v22 = vsel %vm912_vm7, %v906_v46, %v923_v19  ;;  %v5182_v23 = vmul.u32.u64.low %v926_v16, %v921_v18  ;;  %v5183_v15 = vmul.u32.u64.high %v926_v16, %v921_v18, %v5182_v23  ;;  %v835_v53 = vadd.s32 536870912, %v834_v63 }
 0x121   : > { %v925_v34 = vsel %vm911_vm8, %v922_v12, %v924_v22  ;;  %v986_v31 = vshrl.u32 %v985_v54, 23  ;;  %v4242_v57 = vadd.s32 4294967294, %v634_v50  ;;  %v917_v6 = vsel %vm911_vm8, %v914_v59, %v916_v20 }
 0x122   : > { %v5187_v37 = vmul.u32.u64.low %v926_v16, %v925_v34  ;;  %v5188_v39 = vmul.u32.u64.high %v926_v16, %v925_v34, %v5187_v37  ;;  %v736_v40 = vsub.s32 0, %v5179_v17  ;;  %v936_v42 = vadd.s32 1, %v5183_v15 }
 0x123   : > { %v4256_v24 = vadd.s32 4294967169, %v986_v31  ;;  %v5193_v9 = vshrl.u32 %v835_v53, 30  ;;  %v933_v45 = vmul.u32 %v926_v16, %v917_v6  ;;  %vm4243_vm10 = vcmp.lt.s32.totalorder %v4242_v57, 0 }
 0x124   : > { %vm935_vm9 = vc.u32 %v5188_v39, %v5182_v23  ;;  %v4245_v33 = vmin.u32 %v736_v40, %v5179_v17  ;;  %v1089_v47 = vand.u32 2139095040, %v5195_v44  ;;  %v7587_v50 = vand.u32 2147483647, %v5171_v25 }
 0x125   : > { %v992_v43 = vadd.s32 1, %v4256_v24  ;;  %v937_v28 = vsel %vm935_vm9, %v936_v42, %v5183_v15  ;;  %v837_v49 = vshll.u32 %v5193_v9, 30  ;;  %v5204_v7 = vsel %vm4243_vm10, 0, %v4242_v57 }
 0x126   : > { %v938_v46 = vadd.s32 %v937_v28, %v933_v45  ;;  %v738_v5 = vclz %v4245_v33  ;;  %v1090_v52 = vshrl.u32 %v1089_v47, 23  ;;  %v989_v16 = vand.u32 8388607, %v7587_v50 }
 0x127   : > { %vm993_vm11 = vcmp.gt.s32.totalorder %v992_v43, 0  ;;  %v5208_v12 = vsub.s32 %v834_v63, %v837_v49 }
 0x128   : > { %v994_v51 = vsel %vm993_vm11, %v992_v43, 0  ;;  %v939_v54 = vadd.s32 536870912, %v938_v46  ;;  %v4260_v57 = vadd.s32 4294967169, %v1090_v52  ;;  %v638_v43 = vsub.s32 32, %v5204_v7 }
 0x129   : > { %v996_v62 = vand.u32 31, %v994_v51  ;;  %v995_v59 = vshrl.u32 %v994_v51, 5  ;;  %v840_v6 = vsub.s32 0, %v5208_v12  ;;  %v4246_v33 = vadd.s32 4294967294, %v738_v5 }
 0x12a   : > { %v5206_v56 = vshrl.u32 %v939_v54, 30  ;;  %v990_v49 = vor.u32 8388608, %v989_v16  ;;  %v1096_v52 = vadd.s32 1, %v4260_v57 }
 0x12b   : > { %v997_v26 = vsub.s32 32, %v996_v62  ;;  %v999_v18 = vshll.u32 %v7598_v27, %v996_v62  ;;  %v1002_v20 = vshll.u32 %v7594_v29, %v996_v62  ;;  %v1005_v22 = vshll.u32 %v4795_v32, %v996_v62 }
 0x12c   : > { %v1008_v15 = vshll.u32 %v7596_v35, %v996_v62  ;;  %v941_v53 = vshll.u32 %v5206_v56, 30  ;;  %v1011_v45 = vshll.u32 %v7591_v38, %v996_v62  ;;  %vm1014_vm12 = vcmp.lt.s32.totalorder %v995_v59, 1 }
 0x12d   : > { %v1000_v19 = vshrl.u32 %v7594_v29, %v997_v26  ;;  %v1003_v34 = vshrl.u32 %v4795_v32, %v997_v26  ;;  %v1006_v63 = vshrl.u32 %v7596_v35, %v997_v26  ;;  %v1009_v31 = vshrl.u32 %v7591_v38, %v997_v26 }
 0x12e   : > { %v1012_v28 = vshrl.u32 %v7589_v41, %v997_v26  ;;  %v5225_v47 = vsub.s32 %v938_v46, %v941_v53  ;;  %vm1017_vm13 = vcmp.lt.s32.totalorder %v995_v59, 4  ;;  %vm1016_vm14 = vcmp.lt.s32.totalorder %v995_v59, 3 }
 0x12f   : > { %v1001_v37 = vor.u32 %v1000_v19, %v999_v18  ;;  %v1004_v24 = vor.u32 %v1003_v34, %v1002_v20  ;;  %v1007_v40 = vor.u32 %v1006_v63, %v1005_v22  ;;  %v1010_v42 = vor.u32 %v1009_v31, %v1008_v15 }
 0x130   : > { %v1013_v51 = vor.u32 %v1012_v28, %v1011_v45  ;;  %v4249_v18 = vmin.u32 %v840_v6, %v5208_v12  ;;  %v998_v22 = vshrl.u32 %v7598_v27, %v997_v26  ;;  %vm1015_vm15 = vcmp.lt.s32.totalorder %v995_v59, 2 }
 0x131   : > { %v1022_v54 = vsel %vm1014_vm12, %v1001_v37, %v1004_v24  ;;  %v1019_v19 = vsel %vm1017_vm13, %v1007_v40, 2102212464  ;;  %v1023_v20 = vsel %vm1017_vm13, %v1010_v42, 920167782  ;;  %v1026_v5 = vsel %vm1014_vm12, %v1004_v24, %v1007_v40 }
 0x132   : > { %v1024_v62 = vsel %vm1016_vm14, %v1007_v40, %v1023_v20  ;;  %v944_v46 = vsub.s32 0, %v5225_v47  ;;  %v1027_v15 = vsel %vm1017_vm13, %v1013_v51, 1326507024  ;;  %v1030_v53 = vshll.u32 %v990_v49, 8 }
 0x133   : > { %v1025_v16 = vsel %vm1015_vm15, %v1022_v54, %v1024_v62  ;;  %v1018_v34 = vsel %vm1014_vm12, %v998_v22, %v1001_v37  ;;  %v1020_v63 = vsel %vm1016_vm14, %v1004_v24, %v1019_v19  ;;  %v1028_v31 = vsel %vm1016_vm14, %v1010_v42, %v1027_v15 }
 0x134   : > { %vm1097_vm0 = vcmp.gt.s32.totalorder %v1096_v52, 0  ;;  %v1029_v57 = vsel %vm1015_vm15, %v1026_v5, %v1028_v31  ;;  %v5235_v6 = vmul.u32.u64.low %v1030_v53, %v1025_v16  ;;  %v5236_v45 = vmul.u32.u64.high %v1030_v53, %v1025_v16, %v5235_v6 }
 0x135   : > { %v1098_v26 = vsel %vm1097_vm0, %v1096_v52, 0  ;;  %v622_v40 = vadd.s32 %v5005_v3, %v5003_v2  ;;  %v642_v28 = vsub.s32 4294967266, %v5204_v7  ;;  %vm4247_vm1 = vcmp.lt.s32.totalorder %v4246_v33, 0 }
 0x136   : > { %v5242_v54 = vmul.u32.u64.low %v1030_v53, %v1029_v57  ;;  %v5243_v51 = vmul.u32.u64.high %v1030_v53, %v1029_v57, %v5242_v54  ;;  %v842_v37 = vclz %v4249_v18  ;;  %v1021_v24 = vsel %vm1015_vm15, %v1018_v34, %v1020_v63 }
 0x137   : > { %v1100_v42 = vand.u32 31, %v1098_v26  ;;  %v5248_v49 = vadd.s32 %v5069_v55, %v5075_v0  ;;  %v4253_v19 = vmin.u32 %v944_v46, %v5225_v47  ;;  %v7583_v52 = vand.u32 2147483647, %v5195_v44 }
 0x138   : > { %v639_v2 = vshll.u32 %v5138_v60, %v5204_v7  ;;  %v5254_v3 = vshrl.u32 %v622_v40, %v638_v43  ;;  %v1040_v20 = vadd.s32 1, %v5236_v45  ;;  %v5257_v18 = vadd.s32 127, %v642_v28 }
 0x139   : > { %v1101_v22 = vsub.s32 32, %v1100_v42  ;;  %v5259_v59 = vsel %vm4247_vm1, 0, %v4246_v33  ;;  %v1037_v62 = vmul.u32 %v1030_v53, %v1021_v24  ;;  %vm1039_vm2 = vc.u32 %v5243_v51, %v5235_v6 }
 0x13a   : > { %v4250_v55 = vadd.s32 4294967294, %v842_v37  ;;  %v1041_v0 = vsel %vm1039_vm2, %v1040_v20, %v5236_v45  ;;  %v946_v43 = vclz %v4253_v19  ;;  %v1093_v15 = vand.u32 8388607, %v7583_v52  ;;  %v5276_v20 = vpop.f32.mrf.mxu0 }
 0x13b   : > { %v1104_v5 = vshrl.u32 %v7594_v29, %v1101_v22  ;;  %v1107_v46 = vshrl.u32 %v4795_v32, %v1101_v22  ;;  %v1042_v16 = vadd.s32 %v1041_v0, %v1037_v62  ;;  %v1103_v34 = vshll.u32 %v7598_v27, %v1100_v42  ;;  %7682 = vst [vmem:[#allocation6_spill] sm:$0xff] %v5276_v20 }
 0x13c   : > { %v1099_v33 = vshrl.u32 %v1098_v26, 5  ;;  %v1106_v53 = vshll.u32 %v7594_v29, %v1100_v42  ;;  %v1109_v63 = vshll.u32 %v4795_v32, %v1100_v42  ;;  %v1110_v31 = vshrl.u32 %v7596_v35, %v1101_v22 }
 0x13d   : > { %v1043_v57 = vadd.s32 536870912, %v1042_v16  ;;  %v1105_v45 = vor.u32 %v1104_v5, %v1103_v34  ;;  %v1112_v40 = vshll.u32 %v7596_v35, %v1100_v42  ;;  %v1113_v28 = vshrl.u32 %v7591_v38, %v1101_v22 }
 0x13e   : > { %v1108_v54 = vor.u32 %v1107_v46, %v1106_v53  ;;  %v1111_v37 = vor.u32 %v1110_v31, %v1109_v63  ;;  %v1115_v24 = vshll.u32 %v7591_v38, %v1100_v42  ;;  %v1116_v19 = vshrl.u32 %v7589_v41, %v1101_v22 }
 0x13f   : > { %v742_v26 = vsub.s32 32, %v5259_v59  ;;  %v746_v62 = vsub.s32 4294967266, %v5259_v59  ;;  %v5280_v0 = vshrl.u32 %v1043_v57, 30  ;;  %v1114_v1 = vor.u32 %v1113_v28, %v1112_v40 }
 0x140   : > { %vm4251_vm3 = vcmp.lt.s32.totalorder %v4250_v55, 0  ;;  %v4254_v5 = vadd.s32 4294967294, %v946_v43  ;;  %v1094_v34 = vor.u32 8388608, %v1093_v15  ;;  %v1117_v52 = vor.u32 %v1116_v19, %v1115_v24 }
 0x141   : > { %v1045_v46 = vshll.u32 %v5280_v0, 30  ;;  %vm1118_vm4 = vcmp.lt.s32.totalorder %v1099_v33, 1  ;;  %vm1121_vm5 = vcmp.lt.s32.totalorder %v1099_v33, 4  ;;  %v1193_v42 = vand.u32 2139095040, %v5276_v20 }
 0x142   : > { %v1126_v53 = vsel %vm1118_vm4, %v1105_v45, %v1108_v54  ;;  %v1127_v63 = vsel %vm1121_vm5, %v1114_v1, 920167782  ;;  %v1130_v31 = vsel %vm1118_vm4, %v1108_v54, %v1111_v37  ;;  %v1131_v13 = vsel %vm1121_vm5, %v1117_v52, 1326507024 }
 0x143   : > { %v5286_v58 = vsub.s32 %v1042_v16, %v1045_v46  ;;  %v1102_v57 = vshrl.u32 %v7598_v27, %v1101_v22  ;;  %vm1120_vm6 = vcmp.lt.s32.totalorder %v1099_v33, 3  ;;  %v1123_v43 = vsel %vm1121_vm5, %v1111_v37, 2102212464 }
 0x144   : > { %vm1119_vm7 = vcmp.lt.s32.totalorder %v1099_v33, 2  ;;  %v1128_v15 = vsel %vm1120_vm6, %v1111_v37, %v1127_v63  ;;  %v1132_v40 = vsel %vm1120_vm6, %v1114_v1, %v1131_v13  ;;  %v1134_v28 = vshll.u32 %v1094_v34, 8 }
 0x145   : > { %v1048_v24 = vsub.s32 0, %v5286_v58  ;;  %v1122_v19 = vsel %vm1118_vm4, %v1102_v57, %v1105_v45  ;;  %v1129_v61 = vsel %vm1119_vm7, %v1126_v53, %v1128_v15  ;;  %v1133_v50 = vsel %vm1119_vm7, %v1130_v31, %v1132_v40 }
 0x146   : > { %v1124_v14 = vsel %vm1120_vm6, %v1108_v54, %v1123_v43  ;;  %v5293_v52 = vmul.u32.u64.low %v1134_v28, %v1133_v50  ;;  %v5294_v16 = vmul.u32.u64.high %v1134_v28, %v1133_v50, %v5293_v52  ;;  %v1194_v46 = vshrl.u32 %v1193_v42, 23  ;;  %v5318_v42 = vpop.f32.mrf.mxu0 }
 0x147   : > { %v747_v22 = vadd.s32 127, %v746_v62  ;;  %vm4255_vm8 = vcmp.lt.s32.totalorder %v4254_v5, 0  ;;  %v5296_v41 = vmul.u32.u64.low %v1134_v28, %v1129_v61  ;;  %v5297_v38 = vmul.u32.u64.high %v1134_v28, %v1129_v61, %v5296_v41 }
 0x148   : > { %v5301_v1 = vsel %vm4251_vm3, 0, %v4250_v55  ;;  %v4257_v13 = vmin.u32 %v1048_v24, %v5286_v58  ;;  %v7593_v45 = vand.u32 2147483647, %v5276_v20  ;;  %v4264_v37 = vadd.s32 4294967169, %v1194_v46 }
 0x149   : > { %v5309_v50 = vor.u32 %v5254_v3, %v639_v2  ;;  %v1125_v61 = vsel %vm1119_vm7, %v1122_v19, %v1124_v14  ;;  %v744_v62 = vshrl.u32 %v5248_v49, %v742_v26  ;;  %v5314_v34 = vsel %vm4255_vm8, 0, %v4254_v5 }
 0x14a   : > { %vm1143_vm9 = vc.u32 %v5294_v16, %v5296_v41  ;;  %v1200_v55 = vadd.s32 1, %v4264_v37  ;;  %v743_v60 = vshll.u32 %v5179_v17, %v5259_v59  ;;  %v748_v7 = vshll.u32 %v747_v22, 23 }
 0x14b   : > { %v850_v2 = vsub.s32 4294967266, %v5301_v1  ;;  %v1144_v3 = vadd.s32 1, %v5297_v38  ;;  %v1050_v33 = vclz %v4257_v13  ;;  %v1141_v14 = vmul.u32 %v1134_v28, %v1125_v61 }
 0x14c   : > { %v1197_v49 = vand.u32 8388607, %v7593_v45  ;;  %vm1201_vm10 = vcmp.gt.s32.totalorder %v1200_v55, 0  ;;  %v954_v26 = vsub.s32 4294967266, %v5314_v34  ;;  %v1297_v63 = vand.u32 2139095040, %v5318_v42 }
 0x14d   : > { %v1145_v5 = vsel %vm1143_vm9, %v1144_v3, %v5297_v38  ;;  %v1202_v53 = vsel %vm1201_vm10, %v1200_v55, 0  ;;  %v5329_v31 = vor.u32 %v744_v62, %v743_v60  ;;  %v5333_v17 = vadd.s32 %v5134_v4, %v5141_v11 }
 0x14e   : > { %v1146_v59 = vadd.s32 %v1145_v5, %v1141_v14  ;;  %v1204_v57 = vand.u32 31, %v1202_v53  ;;  %v5335_v43 = vor.u32 4788187, %v748_v7  ;;  %v5338_v40 = vadd.s32 127, %v850_v2 }
 0x14f   : > { %v934_v38 = vadd.s32 %v5182_v23, %v5188_v39  ;;  %v950_v28 = vsub.s32 32, %v5314_v34  ;;  %v4258_v24 = vadd.s32 4294967294, %v1050_v33  ;;  %v955_v11 = vadd.s32 127, %v954_v26 }
 0x150   : > { %v1147_v19 = vadd.s32 536870912, %v1146_v59  ;;  %v1205_v52 = vsub.s32 32, %v1204_v57  ;;  %v1198_v46 = vor.u32 8388608, %v1197_v49  ;;  %v1298_v22 = vshrl.u32 %v1297_v63, 23 }
 0x151   : > { %v1207_v37 = vshll.u32 %v7598_v27, %v1204_v57  ;;  %v1210_v23 = vshll.u32 %v7594_v29, %v1204_v57  ;;  %v1216_v55 = vshll.u32 %v7596_v35, %v1204_v57  ;;  %v7683_v60 = vmov 920167782  }
 0x152   : > { %v5345_v13 = vshrl.u32 %v1147_v19, 30  ;;  %v1208_v61 = vshrl.u32 %v7594_v29, %v1205_v52  ;;  %v1211_v62 = vshrl.u32 %v4795_v32, %v1205_v52  ;;  %v1214_v39 = vshrl.u32 %v7596_v35, %v1205_v52 }
 0x153   : > { %v1217_v7 = vshrl.u32 %v7683_v60, %v1205_v52  ;;  %vm4259_vm11 = vcmp.lt.s32.totalorder %v4258_v24, 0  ;;  %v1203_v3 = vshrl.u32 %v1202_v53, 5  ;;  %v1213_v33 = vshll.u32 %v4795_v32, %v1204_v57 }
 0x154   : > { %v1149_v2 = vshll.u32 %v5345_v13, 30  ;;  %v952_v14 = vshrl.u32 %v934_v38, %v950_v28  ;;  %v1209_v49 = vor.u32 %v1208_v61, %v1207_v37  ;;  %v1212_v26 = vor.u32 %v1211_v62, %v1210_v23 }
 0x155   : > { %v1218_v5 = vor.u32 %v1217_v7, %v1216_v55  ;;  %v1215_v19 = vor.u32 %v1214_v39, %v1213_v33  ;;  %v1219_v45 = vshll.u32 %v7683_v60, %v1204_v57  ;;  %v7684_v54 = vmov 1326507024  }
 0x156   : > { %v5356_v63 = vsub.s32 %v1146_v59, %v1149_v2  ;;  %v1220_v29 = vshrl.u32 %v7684_v54, %v1205_v52  ;;  %v956_v35 = vshll.u32 %v955_v11, 23  ;;  %v5360_v4 = vsel %vm4259_vm11, 0, %v4258_v24 }
 0x157   : > { %v1238_v15 = vshll.u32 %v1198_v46, 8  ;;  %v4268_v27 = vadd.s32 4294967169, %v1298_v22  ;;  %vm1222_vm12 = vcmp.lt.s32.totalorder %v1203_v3, 1  ;;  %vm1225_vm13 = vcmp.lt.s32.totalorder %v1203_v3, 4 }
 0x158   : > { %v1152_v53 = vsub.s32 0, %v5356_v63  ;;  %v1221_v20 = vor.u32 %v1220_v29, %v1219_v45  ;;  %vm1223_vm14 = vcmp.lt.s32.totalorder %v1203_v3, 2  ;;  %vm1224_vm15 = vcmp.lt.s32.totalorder %v1203_v3, 3 }
 0x159   : > { %v1230_v59 = vsel %vm1222_vm12, %v1209_v49, %v1212_v26  ;;  %v1231_v38 = vsel %vm1225_vm13, %v1218_v5, 920167782  ;;  %v1227_v57 = vsel %vm1225_vm13, %v1215_v19, 2102212464  ;;  %v1234_v11 = vsel %vm1222_vm12, %v1212_v26, %v1215_v19 }
 0x15a   : > { %v4261_v28 = vmin.u32 %v1152_v53, %v5356_v63  ;;  %v1232_v37 = vsel %vm1224_vm15, %v1215_v19, %v1231_v38  ;;  %v1058_v24 = vsub.s32 4294967266, %v5360_v4  ;;  %v7685_v46 = vmov 683565275  }
 0x15b   : > { %v1206_v22 = vshrl.u32 %v7685_v46, %v1205_v52  ;;  %v1233_v61 = vsel %vm1223_vm14, %v1230_v59, %v1232_v37  ;;  %v1235_v29 = vsel %vm1225_vm13, %v1221_v20, 1326507024  ;;  %v1228_v7 = vsel %vm1224_vm15, %v1212_v26, %v1227_v57 }
 0x15c   : > { %v1154_v45 = vclz %v4261_v28  ;;  %v1236_v62 = vsel %vm1224_vm15, %v1218_v5, %v1235_v29  ;;  %v5369_v23 = vmul.u32.u64.low %v1238_v15, %v1233_v61  ;;  %v5370_v39 = vmul.u32.u64.high %v1238_v15, %v1233_v61, %v5369_v23 }
 0x15d   : > { %v1226_v55 = vsel %vm1222_vm12, %v1206_v22, %v1209_v49  ;;  %v1237_v2 = vsel %vm1223_vm14, %v1234_v11, %v1236_v62  ;;  %v1304_v33 = vadd.s32 1, %v4268_v27  ;;  %v5375_v19 = vor.u32 4788187, %v956_v35 }
 0x15e   : > { %v4262_v53 = vadd.s32 4294967294, %v1154_v45  ;;  %v5377_v38 = vmul.u32.u64.low %v1238_v15, %v1237_v2  ;;  %v5378_v52 = vmul.u32.u64.high %v1238_v15, %v1237_v2, %v5377_v38  ;;  %v1054_v20 = vsub.s32 32, %v5360_v4 }
 0x15f   : > { %v1059_v59 = vadd.s32 127, %v1058_v24  ;;  %v7602_v5 = vand.u32 2147483647, %v5318_v42  ;;  %vm1305_vm0 = vcmp.gt.s32.totalorder %v1304_v33, 0  ;;  %v1229_v28 = vsel %vm1223_vm14, %v1226_v55, %v1228_v7 }
 0x160   : > { %vm4263_vm1 = vcmp.lt.s32.totalorder %v4262_v53, 0  ;;  %v1248_v49 = vadd.s32 1, %v5370_v39  ;;  %v1306_v26 = vsel %vm1305_vm0, %v1304_v33, 0  ;;  %v7686_v35 = vsub.s32 32, %v5301_v1 }
 0x161   : > { %v852_v37 = vshll.u32 %v5338_v40, 23  ;;  %v1308_v11 = vand.u32 31, %v1306_v26  ;;  %v7687_v24 = vshll.u32 %v5225_v47, %v5314_v34  ;;  %v1038_v61 = vadd.s32 %v5235_v6, %v5243_v51 }
 0x162   : > { %v5389_v57 = vshrl.u32 %v5333_v17, %v7686_v35  ;;  %v5400_v29 = vsel %vm4263_vm1, 0, %v4262_v53  ;;  %v1142_v45 = vadd.s32 %v5296_v41, %v5294_v16  ;;  %v1245_v17 = vmul.u32 %v1238_v15, %v1229_v28 }
 0x163   : > { %v5395_v22 = vor.u32 %v952_v14, %v7687_v24  ;;  %vm1247_vm2 = vc.u32 %v5378_v52, %v5369_v23  ;;  %v1309_v40 = vsub.s32 32, %v1308_v11  ;;  %v1056_v62 = vshrl.u32 %v1038_v61, %v1054_v20 }
 0x164   : > { %v1060_v55 = vshll.u32 %v1059_v59, 23  ;;  %v1249_v47 = vsel %vm1247_vm2, %v1248_v49, %v5370_v39  ;;  %v1301_v34 = vand.u32 8388607, %v7602_v5  ;;  %v1162_v14 = vsub.s32 4294967266, %v5400_v29 }
 0x165   : > { %v1250_v6 = vadd.s32 %v1249_v47, %v1245_v17  ;;  %v7688_v51 = vmov 2475754826   ;;  %v1315_v2 = vshrl.u32 %v4795_v32, %v1309_v40  ;;  %v1311_v41 = vshll.u32 %v7685_v46, %v1308_v11 }
 0x166   : > { %v1312_v7 = vshrl.u32 %v7688_v51, %v1309_v40  ;;  %v1314_v16 = vshll.u32 %v7688_v51, %v1308_v11  ;;  %v1317_v15 = vshll.u32 %v4795_v32, %v1308_v11  ;;  %v7689_v33 = vmov 2102212464  }
 0x167   : > { %v1318_v53 = vshrl.u32 %v7689_v33, %v1309_v40  ;;  %v1251_v38 = vadd.s32 536870912, %v1250_v6  ;;  %v1307_v39 = vshrl.u32 %v1306_v26, 5  ;;  %v1320_v20 = vshll.u32 %v7689_v33, %v1308_v11 }
 0x168   : > { %v1321_v59 = vshrl.u32 %v7683_v60, %v1309_v40  ;;  %v1055_v28 = vshll.u32 %v5286_v58, %v5360_v4  ;;  %v1313_v49 = vor.u32 %v1312_v7, %v1311_v41  ;;  %v1316_v35 = vor.u32 %v1315_v2, %v1314_v16 }
 0x169   : > { %v1319_v24 = vor.u32 %v1318_v53, %v1317_v15  ;;  %v5420_v61 = vshrl.u32 %v1251_v38, 30  ;;  %v1323_v47 = vshll.u32 %v7683_v60, %v1308_v11  ;;  %v1324_v32 = vshrl.u32 %v7684_v54, %v1309_v40 }
 0x16a   : > { %v1322_v17 = vor.u32 %v1321_v59, %v1320_v20  ;;  %v1057_v51 = vor.u32 %v1056_v62, %v1055_v28  ;;  %v1061_v5 = vor.u32 4788187, %v1060_v55  ;;  %v1163_v26 = vadd.s32 127, %v1162_v14 }
 0x16b   : > { %v1302_v3 = vor.u32 8388608, %v1301_v34  ;;  %v1253_v33 = vshll.u32 %v5420_v61, 30  ;;  %v1325_v27 = vor.u32 %v1324_v32, %v1323_v47  ;;  %vm1326_vm3 = vcmp.lt.s32.totalorder %v1307_v39, 1 }
 0x16c   : > { %vm1329_vm4 = vcmp.lt.s32.totalorder %v1307_v39, 4  ;;  %v1310_v58 = vshrl.u32 %v7685_v46, %v1309_v40  ;;  %vm1328_vm5 = vcmp.lt.s32.totalorder %v1307_v39, 3  ;;  %v1334_v4 = vsel %vm1326_vm3, %v1313_v49, %v1316_v35 }
 0x16d   : > { %v1335_v7 = vsel %vm1329_vm4, %v1322_v17, 920167782  ;;  %v5428_v2 = vsub.s32 %v1250_v6, %v1253_v33  ;;  %vm1327_vm6 = vcmp.lt.s32.totalorder %v1307_v39, 2  ;;  %v1331_v54 = vsel %vm1329_vm4, %v1319_v24, 2102212464 }
 0x16e   : > { %v1336_v60 = vsel %vm1328_vm5, %v1319_v24, %v1335_v7  ;;  %v1158_v11 = vsub.s32 32, %v5400_v29  ;;  %v1164_v62 = vshll.u32 %v1163_v26, 23  ;;  %v1342_v34 = vshll.u32 %v1302_v3, 8 }
 0x16f   : > { %v1337_v55 = vsel %vm1327_vm6, %v1334_v4, %v1336_v60  ;;  %v1256_v46 = vsub.s32 0, %v5428_v2  ;;  %v1330_v40 = vsel %vm1326_vm3, %v1310_v58, %v1313_v49  ;;  %v1338_v14 = vsel %vm1326_vm3, %v1316_v35, %v1319_v24 }
 0x170   : > { %v1339_v6 = vsel %vm1329_vm4, %v1325_v27, 1326507024  ;;  %v1332_v41 = vsel %vm1328_vm5, %v1316_v35, %v1331_v54  ;;  %v5440_v15 = vmul.u32.u64.low %v1342_v34, %v1337_v55  ;;  %v5441_v53 = vmul.u32.u64.high %v1342_v34, %v1337_v55, %v5440_v15 }
 0x171   : > { %v1340_v16 = vsel %vm1328_vm5, %v1322_v17, %v1339_v6  ;;  %v853_v38 = vor.u32 4788187, %v852_v37  ;;  %v1062_v20 = vand.u32 2147483647, %v1061_v5  ;;  %v4265_v3 = vmin.u32 %v1256_v46, %v5428_v2 }
 0x172   : > { %v1341_v59 = vsel %vm1327_vm6, %v1338_v14, %v1340_v16  ;;  %v960_v28 = vcvt.s32.f32 %v5395_v22  ;;  %v1160_v49 = vshrl.u32 %v1142_v45, %v1158_v11  ;;  %v7690_v27 = vshll.u32 %v5208_v12, %v5301_v1 }
 0x173   : > { %v5447_v24 = vmul.u32.u64.low %v1342_v34, %v1341_v59  ;;  %v5448_v47 = vmul.u32.u64.high %v1342_v34, %v1341_v59, %v5447_v24  ;;  %v1064_v17 = vcvt.s32.f32 %v1057_v51  ;;  %v1258_v32 = vclz %v4265_v3 }
 0x174   : > { %v849_v35 = vor.u32 %v5389_v57, %v7690_v27  ;;  %v1333_v37 = vsel %vm1327_vm6, %v1330_v40, %v1332_v41  ;;  %v7691_v5 = vand.u32 2147483647, %v5375_v19  ;;  %v1159_v33 = vshll.u32 %v5356_v63, %v5400_v29 }
 0x175   : > { %v1165_v22 = vor.u32 4788187, %v1164_v62  ;;  %v1352_v45 = vadd.s32 1, %v5441_v53  ;;  %v7692_v58 = vshll.u32 %v5257_v18, 23  ;;  %v750_v12 = vand.u32 2147483647, %v5335_v43 }
 0x176   : > { %v961_v26 = vmul.f32 %v960_v28, %v7691_v5  ;;  %v1065_v1 = vmul.f32 %v1064_v17, %v1062_v20  ;;  %v4266_v57 = vadd.s32 4294967294, %v1258_v32  ;;  %v854_v51 = vand.u32 2147483647, %v853_v38 }
 0x177   : > { %v645_v4 = vor.u32 4788187, %v7692_v58  ;;  %v1161_v7 = vor.u32 %v1160_v49, %v1159_v33  ;;  %v1349_v39 = vmul.u32 %v1342_v34, %v1333_v37  ;;  %vm1351_vm7 = vc.u32 %v5448_v47, %v5440_v15 }
 0x178   : > { %v752_v19 = vcvt.s32.f32 %v5329_v31  ;;  %v856_v54 = vcvt.s32.f32 %v849_v35  ;;  %vm4267_vm8 = vcmp.lt.s32.totalorder %v4266_v57, 0  ;;  %v1353_v63 = vsel %vm1351_vm7, %v1352_v45, %v5441_v53 }
 0x179   : > { %vm672_vm9 = vcmp.lt.s32.totalorder %v4948_v10, 0  ;;  %v962_v18 = vxor.u32 2147483648, %v961_v26  ;;  %v1166_v29 = vand.u32 2147483647, %v1165_v22  ;;  %v1261_v60 = vsel %vm4267_vm8, 0, %v4266_v57 }
 0x17a   : > { %v1354_v43 = vadd.s32 %v1353_v63, %v1349_v39  ;;  %v753_v11 = vmul.f32 %v752_v19, %v750_v12  ;;  %v1066_v62 = vxor.u32 2147483648, %v1065_v1  ;;  %v1262_v55 = vsub.s32 32, %v1261_v60 }
 0x17b   : > { %v1266_v46 = vsub.s32 4294967266, %v1261_v60  ;;  %v646_v34 = vand.u32 2147483647, %v645_v4  ;;  %v857_v40 = vmul.f32 %v856_v54, %v854_v51  ;;  %v1168_v14 = vcvt.s32.f32 %v1161_v7 }
 0x17c   : > { %v1355_v6 = vadd.s32 536870912, %v1354_v43  ;;  %vm880_vm10 = vcmp.lt.s32.totalorder %v5059_v48, 0  ;;  %vm984_vm11 = vcmp.lt.s32.totalorder %v5171_v25, 0  ;;  %v1246_v31 = vadd.s32 %v5369_v23, %v5378_v52 }
 0x17d   : > { %v1267_v41 = vadd.s32 127, %v1266_v46  ;;  %vm568_vm12 = vcmp.lt.s32.totalorder %v4945_v8, 0  ;;  %v648_v16 = vcvt.s32.f32 %v5309_v50  ;;  %v963_v53 = vsel %vm880_vm10, %v962_v18, %v961_v26 }
 0x17e   : > { %v1169_v38 = vmul.f32 %v1168_v14, %v1166_v29  ;;  %v5476_v20 = vshrl.u32 %v1355_v6, 30  ;;  %v754_v3 = vxor.u32 2147483648, %v753_v11  ;;  %v1067_v59 = vsel %vm984_vm11, %v1066_v62, %v1065_v1 }
 0x17f   : > { %v1264_v28 = vshrl.u32 %v1246_v31, %v1262_v55  ;;  %v1268_v49 = vshll.u32 %v1267_v41, 23  ;;  %v649_v24 = vmul.f32 %v648_v16, %v646_v34  ;;  %v858_v27 = vxor.u32 2147483648, %v857_v40 }
 0x180   : > { %v7693_v23 = vand.u32 2147483647, %v5059_v48  ;;  %v1357_v50 = vshll.u32 %v5476_v20, 30  ;;  %v7696_v17 = vand.u32 2147483647, %v5171_v25  ;;  %v1263_v37 = vshll.u32 %v5428_v2, %v1261_v60 }
 0x181   : > { %v1269_v5 = vor.u32 4788187, %v1268_v49  ;;  %vm776_vm15 = vcmp.lt.s32.totalorder %v4954_v21, 0  ;;  %v1170_v33 = vxor.u32 2147483648, %v1169_v38  ;;  %v652_v45 = vsub.s32 4, %v5107_v30 }
 0x182   : > { %vm5482_vm13 = vcmp.le.f32.partialorder %v7693_v23, 0.7853982  ;;  %vm5492_vm14 = vcmp.le.f32.partialorder %v7696_v17, 0.7853982  ;;  %v5501_v22 = vsub.s32 %v1354_v43, %v1357_v50  ;;  %v7699_v58 = vand.u32 2147483647, %v4948_v10 }
 0x183   : > { %v966_v35 = vsel %vm5482_vm13, %v5059_v48, %v963_v53  ;;  %v1070_v26 = vsel %vm5492_vm14, %v5171_v25, %v1067_v59  ;;  %v755_v2 = vsel %vm672_vm9, %v754_v3, %v753_v11  ;;  %v1265_v12 = vor.u32 %v1264_v28, %v1263_v37 }
 0x184   : > { %vm5506_vm0 = vcmp.le.f32.partialorder %v7699_v58, 0.7853982  ;;  %v650_v1 = vxor.u32 2147483648, %v649_v24  ;;  %v859_v57 = vsel %vm776_vm15, %v858_v27, %v857_v40  ;;  %4442 = vcosq.f32 %v966_v35 }
 0x185   : > { %v1360_v51 = vsub.s32 0, %v5501_v22  ;;  %v7702_v7 = vand.u32 2147483647, %v4954_v21  ;;  %4444 = vsinq.f32 %v1070_v26  ;;  %vm1088_vm2 = vcmp.lt.s32.totalorder %v5195_v44, 0 }
 0x186   : > { %v1270_v19 = vand.u32 2147483647, %v1269_v5  ;;  %v758_v54 = vsel %vm5506_vm0, %v4948_v10, %v755_v2  ;;  %4446 = vsinq.f32 %v966_v35  ;;  %v1171_v63 = vsel %vm1088_vm2, %v1170_v33, %v1169_v38  ;;  %v7711_v5 = vld [vmem:[#allocation6_spill] sm:$0xff] }
 0x187   : > { %vm5517_vm1 = vcmp.le.f32.partialorder %v7702_v7, 0.7853982  ;;  %v4269_v18 = vmin.u32 %v1360_v51, %v5501_v22  ;;  %v653_v29 = vsel %vm568_vm12, %v652_v45, %v5107_v30  ;;  %4448 = vcosq.f32 %v1070_v26 }
 0x188   : > { %v862_v60 = vsel %vm5517_vm1, %v4954_v21, %v859_v57  ;;  %v1272_v43 = vcvt.s32.f32 %v1265_v12  ;;  %v7705_v11 = vand.u32 2147483647, %v4945_v8  ;;  %v651_v55 = vsel %vm568_vm12, %v650_v1, %v649_v24 }
 0x189   : > { %v7708_v46 = vand.u32 2147483647, %v5195_v44  ;;  %v1362_v30 = vclz %v4269_v18  ;;  %4450 = vsinq.f32 %v758_v54  ;;  %v1068_v40 = vsub.s32 4, %v5280_v0 }
 0x18a   : > { %vm5536_vm3 = vcmp.le.f32.partialorder %v7705_v11, 0.7853982  ;;  %v1273_v6 = vmul.f32 %v1272_v43, %v1270_v19  ;;  %4452 = vcosq.f32 %v862_v60  ;;  %v1172_v41 = vsub.s32 4, %v5345_v13 }
 0x18b   : > { %vm5544_vm4 = vcmp.le.f32.partialorder %v7708_v46, 0.7853982  ;;  %v5554_v31 = vsel %vm5536_vm3, 0, %v653_v29  ;;  %v4270_v16 = vadd.s32 4294967294, %v1362_v30  ;;  %v756_v53 = vsub.s32 4, %v5160_v36 }
 0x18c   : > { %v1174_v14 = vsel %vm5544_vm4, %v5195_v44, %v1171_v63  ;;  %v860_v38 = vsub.s32 4, %v5193_v9  ;;  %4454 = vsinq.f32 %v862_v60  ;;  %v964_v3 = vsub.s32 4, %v5206_v56 }
 0x18d   : > { %v654_v59 = vsel %vm5536_vm3, %v4945_v8, %v651_v55  ;;  %4456 = vcosq.f32 %v1174_v14  ;;  %v1276_v28 = vsub.s32 4, %v5420_v61  ;;  %vm4271_vm5 = vcmp.lt.s32.totalorder %v4270_v16, 0 }
 0x18e   : > { %v1069_v49 = vsel %vm984_vm11, %v1068_v40, %v5280_v0  ;;  %4458 = vsinq.f32 %v1174_v14  ;;  %v1274_v24 = vxor.u32 2147483648, %v1273_v6  ;;  %v1365_v27 = vsel %vm4271_vm5, 0, %v4270_v16  ;;  %v2512_v14 = vld [vmem:[%s7571_s4 + $0x38] sm:$0xff] }
 0x18f   : > { %v1173_v23 = vsel %vm1088_vm2, %v1172_v41, %v5345_v13  ;;  %v1350_v50 = vadd.s32 %v5440_v15, %v5448_v47  ;;  %v1366_v35 = vsub.s32 32, %v1365_v27  ;;  %v1370_v17 = vsub.s32 4294967266, %v1365_v27 }
 0x190   : > { %4460 = vcosq.f32 %v758_v54  ;;  %v861_v37 = vsel %vm776_vm15, %v860_v38, %v5193_v9  ;;  %v965_v0 = vsel %vm880_vm10, %v964_v3, %v5206_v56  ;;  %vm1192_vm6 = vcmp.lt.s32.totalorder %v7711_v5, 0 }
 0x191   : > { %v1277_v26 = vsel %vm1192_vm6, %v1276_v28, %v5420_v61  ;;  %v1367_v13 = vshll.u32 %v5501_v22, %v1365_v27  ;;  %v1368_v33 = vshrl.u32 %v1350_v50, %v1366_v35  ;;  %v1371_v45 = vadd.s32 127, %v1370_v17  ;;  %v5581_v15 = vpop.eup %4442  ;;  %v2511_v50 = vld [vmem:[%s7571_s4 + $0x30] sm:$0xff]  ;;  %v2509_v35 = vld [vmem:[%s7571_s4 + $0x20] sm:$0xff] }
 0x192   : > { %4462 = vsinq.f32 %v654_v59  ;;  %v5585_v47 = vsel %vm5492_vm14, 0, %v1069_v49  ;;  %v1275_v9 = vsel %vm1192_vm6, %v1274_v24, %v1273_v6  ;;  %v5589_v58 = vsel %vm5544_vm4, 0, %v1173_v23  ;;  %v5591_v56 = vpop.eup %4444  ;;  %v2510_v6 = vld [vmem:[%s7571_s4 + $0x28] sm:$0xff] }
 0x193   : > { %v7712_v61 = vand.u32 2147483647, %v7711_v5  ;;  %v1369_v22 = vor.u32 %v1368_v33, %v1367_v13  ;;  %v1372_v2 = vshll.u32 %v1371_v45, 23  ;;  %v5597_v12 = vsel %vm5482_vm13, 0, %v965_v0  ;;  %v5599_v1 = vpop.eup %4446 }
 0x194   : > { %4464 = vcosq.f32 %v654_v59  ;;  %v757_v32 = vsel %vm672_vm9, %v756_v53, %v5160_v36  ;;  %v5606_v57 = vsel %vm5517_vm1, 0, %v861_v37  ;;  %v5610_v7 = vpop.eup %4448  ;;  %v5614_v54 = vand.u32 3, %v5589_v58  ;;  %v2507_v36 = vld [vmem:[%s7571_s4 + $0x10] sm:$0xff] }
 0x195   : > { %vm1191_vm7 = vcmp.le.f32.partialorder %v7712_v61, 0.7853982  ;;  %v1373_v52 = vor.u32 4788187, %v1372_v2  ;;  %v5617_v63 = vand.u32 3, %v5585_v47  ;;  %vm1296_vm9 = vcmp.lt.s32.totalorder %v5318_v42, 0 }
 0x196   : > { %v5608_v51 = vsel %vm1191_vm7, 0, %v1277_v26  ;;  %v1278_v19 = vsel %vm1191_vm7, %v7711_v5, %v1275_v9  ;;  %v7713_v18 = vand.u32 2147483647, %v5318_v42  ;;  %v1079_v39 = vxor.u32 2147483648, %v5591_v56  ;;  %v5628_v60 = vpop.eup %4450 }
 0x197   : > { %v1808_v29 = vand.u32 3, %v5597_v12  ;;  %v1374_v43 = vand.u32 2147483647, %v1373_v52  ;;  %v1376_v11 = vcvt.s32.f32 %v1369_v22  ;;  %v1380_v62 = vsub.s32 4, %v5476_v20  ;;  %v5634_v46 = vpop.eup %4452 }
 0x198   : > { %vm5621_vm8 = vcmp.le.f32.partialorder %v7713_v18, 0.7853982  ;;  %v5632_v55 = vand.u32 3, %v5608_v51  ;;  %4466 = vcosq.f32 %v1278_v19  ;;  %v1082_v34 = vxor.u32 2147483648, %v5610_v7  ;;  %v2508_v18 = vld [vmem:[%s7571_s4 + $0x18] sm:$0xff] }
 0x199   : > { %v975_v30 = vxor.u32 2147483648, %v5599_v1  ;;  %v978_v40 = vxor.u32 2147483648, %v5581_v15  ;;  %v5645_v41 = vpop.eup %4454  ;;  %4468 = vsinq.f32 %v1278_v19  ;;  %v1377_v16 = vmul.f32 %v1376_v11, %v1374_v43 }
 0x19a   : > { %vm2016_vm10 = vcmp.eq.s32.totalorder %v5614_v54, 0  ;;  %vm1913_vm11 = vcmp.eq.s32.totalorder %v5617_v63, 0  ;;  %v5649_v53 = vpop.eup %4456  ;;  %vm2019_vm12 = vcmp.eq.s32.totalorder %v5614_v54, 2  ;;  %vm1916_vm13 = vcmp.eq.s32.totalorder %v5617_v63, 2 }
 0x19b   : > { %v1915_v38 = vsel %vm1913_vm11, %v5610_v7, %v1079_v39  ;;  %vm1810_vm14 = vcmp.eq.s32.totalorder %v1808_v29, 0  ;;  %v4799_v3 = vmov 0   ;;  %v5656_v59 = vpop.eup %4458  ;;  %v1378_v28 = vxor.u32 2147483648, %v1377_v16 }
 0x19c   : > { %4439 = vset.pattern.permute.xlu0 %v4799_v3  ;;  %4440 = vset.pattern.permute.xlu1 %v4799_v3  ;;  %v1381_v49 = vsel %vm1296_vm9, %v1380_v62, %v5476_v20  ;;  %vm1813_vm15 = vcmp.eq.s32.totalorder %v1808_v29, 2  ;;  %v5663_v24 = vsel %vm5506_vm0, 0, %v757_v32  ;;  %vm7604_vm1 = vweird.f32 %v5171_v25 }
 0x19d   : > { %2550 = vperm.xlu0 %4439, %v2512_v14   ;;  %2540 = vperm.xlu1 %4440, %v2510_v6   ;;  %v1918_v27 = vsel %vm1916_vm13, %v1082_v34, %v5591_v56  ;;  %vm7603_vm2 = vweird.f32 %v5059_v48  ;;  %v1812_v23 = vsel %vm1810_vm14, %v5581_v15, %v975_v30  ;;  %v1815_v20 = vsel %vm1813_vm15, %v978_v40, %v5599_v1  ;;  %v5683_v17 = vpop.eup %4460 }
 0x19e   : > { %v871_v4 = vxor.u32 2147483648, %v5645_v41  ;;  %v1379_v37 = vsel %vm1296_vm9, %v1378_v28, %v1377_v16  ;;  %v1186_v0 = vxor.u32 2147483648, %v5649_v53  ;;  %vm2015_vm0 = vcmp.lt.s32.totalorder %v5614_v54, 2 }
 0x19f   : > { %v874_v26 = vxor.u32 2147483648, %v5634_v46  ;;  %v1705_v13 = vand.u32 3, %v5606_v57  ;;  %v1382_v33 = vsel %vm5621_vm8, %v5318_v42, %v1379_v37  ;;  %v1383_v45 = vsel %vm5621_vm8, 0, %v1381_v49  ;;  %v5698_v22 = vpop.eup %4462 }
 0x1a0   : > { %v1183_v9 = vxor.u32 2147483648, %v5656_v59  ;;  %v1602_v61 = vand.u32 3, %v5663_v24  ;;  %4470 = vcosq.f32 %v1382_v33  ;;  %vm1912_vm3 = vcmp.lt.s32.totalorder %v5617_v63, 2 }
 0x1a1   : > { %vm1809_vm4 = vcmp.lt.s32.totalorder %v1808_v29, 2  ;;  %v7609_v2 = vxor.u32 2147483648, %v5628_v60  ;;  %2545 = vperm.xlu0 %4439, %v2511_v50   ;;  %2535 = vperm.xlu1 %4440, %v2509_v35   ;;  %4472 = vsinq.f32 %v1382_v33  ;;  %v1919_v32 = vsel %vm1912_vm3, %v1915_v38, %v1918_v27  ;;  %v5709_v43 = vpop.eup %4464 }
 0x1a2   : > { %v1816_v19 = vsel %vm1809_vm4, %v1812_v23, %v1815_v20  ;;  %v7608_v52 = vxor.u32 2147483648, %v5683_v17  ;;  %v5711_v63 = vand.u32 3, %v1383_v45  ;;  %vm7605_vm5 = vweird.f32 %v5195_v44  ;;  %v2506_v23 = vld [vmem:[%s7571_s4 + $0x8] sm:$0xff]  ;;  %v2505_v20 = vld [vmem:[%s7571_s4] sm:$0xff] }
 0x1a3   : > { %v2021_v29 = vsel %vm2019_vm12, %v1186_v0, %v5656_v59  ;;  %vm1707_vm6 = vcmp.eq.s32.totalorder %v1705_v13, 0  ;;  %vm1710_vm7 = vcmp.eq.s32.totalorder %v1705_v13, 2  ;;  %v2018_v11 = vsel %vm2016_vm10, %v5649_v53, %v1183_v9 }
 0x1a4   : > { %v1709_v62 = vsel %vm1707_vm6, %v5634_v46, %v871_v4  ;;  %v1712_v14 = vsel %vm1710_vm7, %v874_v26, %v5645_v41  ;;  %vm1604_vm8 = vcmp.eq.s32.totalorder %v1602_v61, 0  ;;  %vm1607_vm9 = vcmp.eq.s32.totalorder %v1602_v61, 2 }
 0x1a5   : > { %v1606_v6 = vsel %vm1604_vm8, %v5683_v17, %v7609_v2  ;;  %v7607_v16 = vxor.u32 2147483648, %v5698_v22  ;;  %v1499_v38 = vand.u32 3, %v5554_v31  ;;  %2530 = vperm.xlu0 %4439, %v2508_v18   ;;  %2525 = vperm.xlu1 %4440, %v2507_v36   ;;  %vm2119_vm10 = vcmp.eq.s32.totalorder %v5632_v55, 0  ;;  %v5747_v50 = vpop.eup %4466  ;;  %v2808_v18 = vld [vmem:[%s7573_s6 + $0x38] sm:$0xff]  ;;  %v2807_v36 = vld [vmem:[%s7573_s6 + $0x30] sm:$0xff] }
 0x1a6   : > { %v1609_v3 = vsel %vm1607_vm9, %v7608_v52, %v5628_v60  ;;  %v7606_v28 = vxor.u32 2147483648, %v5709_v43  ;;  %v1387_v49 = vadd.s32 3, %v1383_v45  ;;  %v1283_v27 = vadd.s32 3, %v5608_v51  ;;  %v5759_v51 = vpop.eup %4468 }
 0x1a7   : > { %vm2122_vm11 = vcmp.eq.s32.totalorder %v5632_v55, 2  ;;  %v5752_v35 = vsel %vm7604_vm1, nan, %v1919_v32  ;;  %v5756_v37 = vsel %vm7603_vm2, nan, %v1816_v19  ;;  %vm866_vm12 = vweird.f32 %v4954_v21  ;;  %v1402_v21 = vld [vmem:[%s7570_s3 + $0x20] sm:$0xff] }
 0x1a8   : > { %v2022_v33 = vsel %vm2015_vm0, %v2018_v11, %v2021_v29  ;;  %vm1706_vm13 = vcmp.lt.s32.totalorder %v1705_v13, 2  ;;  %vm7610_vm14 = vweird.f32 %v4948_v10  ;;  %vm1603_vm15 = vcmp.lt.s32.totalorder %v1602_v61, 2 }
 0x1a9   : > { %vm2222_vm3 = vcmp.eq.s32.totalorder %v5711_v63, 0  ;;  %vm2118_vm4 = vcmp.lt.s32.totalorder %v5632_v55, 2  ;;  %v1713_v45 = vsel %vm1706_vm13, %v1709_v62, %v1712_v14  ;;  %v1610_v32 = vsel %vm1603_vm15, %v1606_v6, %v1609_v3  ;;  %2520 = vperm.xlu0 %4439, %v2506_v23   ;;  %2515 = vperm.xlu1 %4440, %v2505_v20  }
 0x1aa   : > { %vm1501_vm6 = vcmp.eq.s32.totalorder %v1499_v38, 0  ;;  %vm1504_vm7 = vcmp.eq.s32.totalorder %v1499_v38, 2  ;;  %vm2221_vm8 = vcmp.lt.s32.totalorder %v5711_v63, 2  ;;  %v5773_v61 = vand.u32 3, %v1387_v49 }
 0x1ab   : > { %v1503_v54 = vsel %vm1501_vm6, %v5709_v43, %v7607_v16  ;;  %v1506_v13 = vsel %vm1504_vm7, %v7606_v28, %v5698_v22  ;;  %v1284_v19 = vand.u32 3, %v1283_v27  ;;  %vm1386_vm0 = vweird.f32 %v5318_v42 }
 0x1ac   : > { %vm2225_vm9 = vcmp.eq.s32.totalorder %v5711_v63, 2  ;;  %v1287_v29 = vxor.u32 2147483648, %v5759_v51  ;;  %v1290_v11 = vxor.u32 2147483648, %v5747_v50  ;;  %v1179_v62 = vadd.s32 3, %v5589_v58 }
 0x1ad   : > { %vm1282_vm13 = vweird.f32 %v7711_v5  ;;  %v2023_v14 = vsel %vm7605_vm5, nan, %v2022_v33  ;;  %vm1500_vm15 = vcmp.lt.s32.totalorder %v1499_v38, 2  ;;  %v1075_v6 = vadd.s32 3, %v5585_v47  ;;  %2846 = vperm.xlu0 %4439, %v2808_v18   ;;  %2841 = vperm.xlu1 %4440, %v2807_v36   ;;  %v4471_v20 = vpop.eup %4470  ;;  %v2806_v47 = vld [vmem:[%s7573_s6 + $0x28] sm:$0xff]  ;;  %v1398_v5 = vld [vmem:[%s7570_s3] sm:$0xff] }
 0x1ae   : > { %v971_v3 = vadd.s32 3, %v5597_v12  ;;  %v5793_v49 = vsel %vm866_vm12, nan, %v1713_v45  ;;  %v5797_v27 = vsel %vm7610_vm14, nan, %v1610_v32  ;;  %v1507_v23 = vsel %vm1500_vm15, %v1503_v54, %v1506_v13  ;;  %v2805_v12 = vld [vmem:[%s7573_s6 + $0x20] sm:$0xff] }
 0x1af   : > { %v867_v58 = vadd.s32 3, %v5606_v57  ;;  %vm658_vm6 = vweird.f32 %v4945_v8  ;;  %vm1390_vm7 = vcmp.eq.s32.totalorder %v5773_v61, 0  ;;  %vm1393_vm2 = vcmp.eq.s32.totalorder %v5773_v61, 2  ;;  %v4473_v57 = vpop.eup %4472  ;;  %v559_v8 = vld [vmem:[%s7725_s2 + $0x8] sm:$0xff] }
 0x1b0   : > { %vm1285_vm1 = vcmp.lt.s32.totalorder %v1284_v19, 2  ;;  %vm1286_vm5 = vcmp.eq.s32.totalorder %v1284_v19, 0  ;;  %v1394_v38 = vxor.u32 2147483648, %v4471_v20  ;;  %v2121_v33 = vsel %vm2119_vm10, %v5747_v50, %v1287_v29 }
 0x1b1   : > { %v2124_v45 = vsel %vm2122_vm11, %v1290_v11, %v5759_v51  ;;  %v1180_v32 = vand.u32 3, %v1179_v62  ;;  %v1391_v54 = vxor.u32 2147483648, %v4473_v57  ;;  %vm1289_vm15 = vcmp.eq.s32.totalorder %v1284_v19, 2  ;;  %2836 = vperm.xlu0 %4439, %v2806_v47   ;;  %2831 = vperm.xlu1 %4440, %v2805_v12   ;;  %v2802_v47 = vld [vmem:[%s7573_s6 + $0x8] sm:$0xff]  ;;  %v2801_v12 = vld [vmem:[%s7573_s6] sm:$0xff] }
 0x1b2   : > { %v1076_v13 = vand.u32 3, %v1075_v6  ;;  %v5815_v18 = vand.u32 3, %v971_v3  ;;  %v2227_v36 = vsel %vm2225_vm9, %v1394_v38, %v4473_v57  ;;  %v5819_v28 = vand.u32 3, %v867_v58 }
 0x1b3   : > { %v763_v16 = vadd.s32 3, %v5663_v24  ;;  %v659_v52 = vadd.s32 3, %v5554_v31  ;;  %v2224_v2 = vsel %vm2222_vm3, %v4471_v20, %v1391_v54  ;;  %v2125_v62 = vsel %vm2118_vm4, %v2121_v33, %v2124_v45  ;;  %v3226_v33 = vld [vmem:[%s7575_s8 + $0x38] sm:$0xff]  ;;  %v3225_v45 = vld [vmem:[%s7575_s8 + $0x30] sm:$0xff] }
 0x1b4   : > { %vm2230_vm10 = vcmask 261120   ;;  %v1288_v6 = vsel %vm1286_vm5, %v5747_v50, %v1287_v29  ;;  %v1291_v3 = vsel %vm1289_vm15, %v1290_v11, %v5759_v51  ;;  %v2228_v58 = vsel %vm2221_vm8, %v2224_v2, %v2227_v36  ;;  %v1399_v11 = vld [vmem:[%s7570_s3 + $0x8] sm:$0xff]  ;;  %v1405_v36 = vld [vmem:[%s7570_s3 + $0x38] sm:$0xff] }
 0x1b5   : > { %vm1181_vm11 = vcmp.lt.s32.totalorder %v1180_v32, 2  ;;  %vm1182_vm9 = vcmp.eq.s32.totalorder %v1180_v32, 0  ;;  %vm1185_vm14 = vcmp.eq.s32.totalorder %v1180_v32, 2  ;;  %v2229_v31 = vsel %vm1386_vm0, nan, %v2228_v58  ;;  %v1404_v32 = vld [vmem:[%s7570_s3 + $0x30] sm:$0xff]  ;;  %v563_v58 = vld [vmem:[%s7725_s2 + $0x28] sm:$0xff] }
 0x1b6   : > { %v1184_v55 = vsel %vm1182_vm9, %v5649_v53, %v1183_v9  ;;  %v1187_v24 = vsel %vm1185_vm14, %v1186_v0, %v5656_v59  ;;  %vm1078_vm5 = vcmp.eq.s32.totalorder %v1076_v13, 0  ;;  %2279 = vmatprep.subr.mxu0 %v2229_v31  ;;  %4351 = vmatprep.subr.mxu1 %v2229_v31  ;;  %v2126_v2 = vsel %vm1282_vm13, nan, %v2125_v62  ;;  %v562_v62 = vld [vmem:[%s7725_s2 + $0x20] sm:$0xff]  ;;  %v3220_v31 = vld [vmem:[%s7575_s8 + $0x8] sm:$0xff] }
 0x1b7   : > { %v1292_v63 = vsel %vm1285_vm1, %v1288_v6, %v1291_v3  ;;  %v1080_v50 = vsel %vm1078_vm5, %v5610_v7, %v1079_v39  ;;  %vm1081_vm3 = vcmp.eq.s32.totalorder %v1076_v13, 2  ;;  %2280 = vmatpush1.msra.mxu0 %v2126_v2  ;;  %4355 = vmatpush1.msra.mxu1 %v2126_v2  ;;  %v1392_v9 = vsel %vm1390_vm7, %v4471_v20, %v1391_v54  ;;  %v561_v54 = vld [vmem:[%s7725_s2 + $0x18] sm:$0xff]  ;;  %v3221_v3 = vld [vmem:[%s7575_s8 + $0x10] sm:$0xff] }
 0x1b8   : > { %v1395_v53 = vsel %vm1393_vm2, %v1394_v38, %v4473_v57  ;;  %v1083_v59 = vsel %vm1081_vm3, %v1082_v34, %v5591_v56  ;;  %v764_v0 = vand.u32 3, %v763_v16  ;;  %2281 = vmatprep.subr.mxu0 %v2023_v14  ;;  %4352 = vmatprep.subr.mxu1 %v2023_v14  ;;  %v1508_v51 = vsel %vm658_vm6, nan, %v1507_v23  ;;  %v2804_v23 = vld [vmem:[%s7573_s6 + $0x18] sm:$0xff]  ;;  %v1403_v57 = vld [vmem:[%s7570_s3 + $0x28] sm:$0xff]  ;;  %v560_v38 = vld [vmem:[%s7725_s2 + $0x10] sm:$0xff] }
 0x1b9   : > { %vm1389_vm1 = vcmp.lt.s32.totalorder %v5773_v61, 2  ;;  %v1188_v39 = vsel %vm1181_vm11, %v1184_v55, %v1187_v24  ;;  %vm1077_vm14 = vcmp.lt.s32.totalorder %v1076_v13, 2  ;;  %2282 = vmatpush1.msra.mxu0 %v5752_v35  ;;  %4356 = vmatpush1.msra.mxu1 %v5752_v35  ;;  %v1293_v19 = vsel %vm1282_vm13, nan, %v1292_v63  ;;  %v3224_v13 = vld [vmem:[%s7575_s8 + $0x28] sm:$0xff]  ;;  %v3222_v6 = vld [vmem:[%s7575_s8 + $0x18] sm:$0xff]  ;;  %v3219_v55 = vld [vmem:[%s7575_s8] sm:$0xff] }
 0x1ba   : > { %vm973_vm2 = vcmp.lt.s32.totalorder %v5815_v18, 2  ;;  %vm974_vm4 = vcmp.eq.s32.totalorder %v5815_v18, 0  ;;  %v660_v56 = vand.u32 3, %v659_v52  ;;  %2283 = vmatprep.subr.mxu0 %v5756_v37  ;;  %4353 = vmatprep.subr.mxu1 %v5756_v37  ;;  %v1396_v7 = vsel %vm1389_vm1, %v1392_v9, %v1395_v53  ;;  %v564_v24 = vld [vmem:[%s7725_s2 + $0x30] sm:$0xff]  ;;  %v3643_v2 = vld [vmem:[%s7577_s10 + $0x38] sm:$0xff]  ;;  %v3641_v9 = vld [vmem:[%s7577_s10 + $0x28] sm:$0xff] }
 0x1bb   : > { %v1084_v34 = vsel %vm1077_vm14, %v1080_v50, %v1083_v59  ;;  %v976_v16 = vsel %vm974_vm4, %v5581_v15, %v975_v30  ;;  %vm977_vm8 = vcmp.eq.s32.totalorder %v5815_v18, 2  ;;  %2284 = vmatpush1.msra.mxu0 %v5793_v49  ;;  %4357 = vmatpush1.msra.mxu1 %v5793_v49  ;;  %vm870_vm13 = vcmp.eq.s32.totalorder %v5819_v28, 0  ;;  %v3223_v18 = vld [vmem:[%s7575_s8 + $0x20] sm:$0xff]  ;;  %v3642_v63 = vld [vmem:[%s7577_s10 + $0x30] sm:$0xff]  ;;  %v565_v50 = vld [vmem:[%s7725_s2 + $0x38] sm:$0xff] }
 0x1bc   : > { %v979_v52 = vsel %vm977_vm8, %v978_v40, %v5599_v1  ;;  %vm873_vm7 = vcmp.eq.s32.totalorder %v5819_v28, 2  ;;  %vm766_vm15 = vcmp.eq.s32.totalorder %v764_v0, 0  ;;  %2285 = vmatprep.subr.mxu0 %v5797_v27  ;;  %4354 = vmatprep.subr.mxu1 %v5797_v27  ;;  %v872_v30 = vsel %vm870_vm13, %v5634_v46, %v871_v4  ;;  %v1400_v46 = vld [vmem:[%s7570_s3 + $0x10] sm:$0xff]  ;;  %v3640_v53 = vld [vmem:[%s7577_s10 + $0x20] sm:$0xff]  ;;  %v3639_v59 = vld [vmem:[%s7577_s10 + $0x18] sm:$0xff] }
 0x1bd   : > { %v875_v35 = vsel %vm873_vm7, %v874_v26, %v5645_v41  ;;  %v7716_v15 = vxor.u32 2147483648, %v5628_v60  ;;  %vm769_vm11 = vcmp.eq.s32.totalorder %v764_v0, 2  ;;  %2286 = vmatpush1.msra.mxu0 %v1508_v51  ;;  %4358 = vmatpush1.msra.mxu1 %v1508_v51  ;;  %v1397_v40 = vsel %vm1386_vm0, nan, %v1396_v7  ;;  %v3637_v51 = vld [vmem:[%s7577_s10 + $0x8] sm:$0xff] }
 0x1be   : > { %v7717_v37 = vxor.u32 2147483648, %v5683_v17  ;;  %vm662_vm9 = vcmp.eq.s32.totalorder %v660_v56, 0  ;;  %vm665_vm5 = vcmp.eq.s32.totalorder %v660_v56, 2  ;;  %4304 = vmatmul.mubr.msk.f32.vlgmr.msra.gmra.mxu0 %vm2230_vm10, %v1398_v5  ;;  %2416 = vmatprep.subr.mxu0 %v1397_v40  ;;  %v980_v41 = vsel %vm973_vm2, %v976_v16, %v979_v52 }
 0x1bf   : > { %v768_v1 = vsel %vm766_vm15, %v5683_v17, %v7716_v15  ;;  %vm869_vm3 = vcmp.lt.s32.totalorder %v5819_v28, 2  ;;  %v7718_v42 = vxor.u32 2147483648, %v5698_v22  ;;  %2417 = vmatpush1.msra.mxu0 %v1293_v19  ;;  %vm7720_vm0 = vweird.f32 %v5195_v44  ;;  %4306 = vmatmul.mubr.msk.f32.vlgmr.msra.gmra.mxu1 %vm2230_vm10, %v1400_v46  ;;  %v4046_v19 = vld [vmem:[#allocation2] sm:$0x1] }
 0x1c0   : > { %v771_v61 = vsel %vm769_vm11, %v7717_v37, %v5628_v60  ;;  %v7719_v60 = vxor.u32 2147483648, %v5709_v43  ;;  %v1189_v26 = vsel %vm7720_vm0, nan, %v1188_v39  ;;  %v7721_v29 = vmov 0.0   ;;  %2826 = vperm.xlu0 %4439, %v2804_v23   ;;  %v3636_v39 = vld [vmem:[%s7577_s10] sm:$0xff] }
 0x1c1   : > { %v664_v4 = vsel %vm662_vm9, %v5709_v43, %v7718_v42  ;;  %2325 = vmatprep.mubr.f32.mxu0 %v7721_v29  ;;  %v876_v14 = vsel %vm869_vm3, %v872_v30, %v875_v35  ;;  %vm765_vm1 = vcmp.lt.s32.totalorder %v764_v0, 2  ;;  %2418 = vmatprep.subr.mxu0 %v1189_v26  ;;  %vm7722_vm14 = vweird.f32 %v5171_v25  ;;  %v1401_v43 = vld [vmem:[%s7570_s3 + $0x18] sm:$0xff]  ;;  %v3638_v0 = vld [vmem:[%s7577_s10 + $0x10] sm:$0xff] }
 0x1c2   : > { %v667_v17 = vsel %vm665_vm5, %v7719_v60, %v5698_v22  ;;  %v1085_v28 = vsel %vm7722_vm14, nan, %v1084_v34  ;;  %v772_v49 = vsel %vm765_vm1, %v768_v1, %v771_v61  ;;  %vm661_vm2 = vcmp.lt.s32.totalorder %v660_v56, 2  ;;  %2337 = vmatprep.mubr.f32.mxu1 %v7721_v29  ;;  %4305 = vmatmul.mubr.msk.f32.gmra.mxu0 %vm2230_vm10, %v1399_v11 }
 0x1c3   : > { %2419 = vmatpush1.msra.mxu0 %v1085_v28  ;;  %vm7723_vm4 = vweird.f32 %v5059_v48  ;;  %v668_v22 = vsel %vm661_vm2, %v664_v4, %v667_v17  ;;  %v877_v25 = vsel %vm866_vm12, nan, %v876_v14  ;;  %vm7724_vm8 = vweird.f32 %v4948_v10  ;;  %2456 = vmatprep.mubr.f32.mxu0 %v7721_v29  ;;  %v558_v48 = vld [vmem:[%s7725_s2] sm:$0xff]  ;;  %v2803_v10 = vld [vmem:[%s7573_s6 + $0x10] sm:$0xff]  ;;  %s4734_s2 = sshll.u32 %s4801_s1, 4  ;;  %s4735_s2 = int_to_ptr.vmem [resolvable:$false] %s4734_s2 }
 0x1c4   : > { %v981_v44 = vsel %vm7723_vm4, nan, %v980_v41  ;;  %v773_v27 = vsel %vm7724_vm8, nan, %v772_v49  ;;  %v669_v20 = vsel %vm658_vm6, nan, %v668_v22  ;;  %4307 = vmatmul.mubr.msk.f32.gmra.mxu1 %vm2230_vm10, %v1401_v43  ;;  %2821 = vperm.xlu1 %4440, %v2803_v10   ;;  %s4736_s12 = scalar_lea.vmem %s4735_s2, 64  ;;  %p4737_p0 = scmp.lt.s32.totalorder %s4169_s22, %s4735_s2 }
 0x1c5   : > { %2420 = vmatprep.subr.mxu0 %v981_v44  ;;  %2343 = vmatprep.mubr.f32.mxu1 %v7721_v29  ;;  %p4738_p1 = scmp.lt.s32.totalorder %s4736_s12, %s4730_s0 }
 0x1c6   : > { %2421 = vmatpush1.msra.mxu0 %v877_v25  ;;  %2816 = vperm.xlu0 %4439, %v2802_v47  }
 0x1c7   : > { %2422 = vmatprep.subr.mxu0 %v773_v27  ;;  %p4739_p2 = por %p4738_p1, %p4737_p0 }
 0x1c8   : > { %2423 = vmatpush1.msra.mxu0 %v669_v20  ;;  %4308 = vmatmul.mubr.msk.f32.gmra.mxu1 %vm2230_vm10, %v1402_v21 }
 0x1c9   : > { %4312 = vmatmul.mubr.msk.f32.vlgmr.msra.gmra.mxu0 %vm2230_vm10, %v558_v48  ;;  %2349 = vmatprep.mubr.f32.mxu1 %v7721_v29  ;;  %p4740_p3 = pnand %p4739_p2, %p4733_p13 }
 0x1ca   : > { %2462 = vmatprep.mubr.f32.mxu0 %v7721_v29  ;;  %2811 = vperm.xlu1 %4440, %v2801_v12  }
 0x1cb   : > { %3264 = vperm.xlu0 %4439, %v3226_v33  }
 0x1cc   : > { %4309 = vmatmul.mubr.msk.f32.gmra.mxu1 %vm2230_vm10, %v1403_v57 }
 0x1cd   : > { %4313 = vmatmul.mubr.msk.f32.gmra.mxu0 %vm2230_vm10, %v559_v8  ;;  %2355 = vmatprep.mubr.f32.mxu1 %v7721_v29 }
 0x1ce   : > { %2468 = vmatprep.mubr.f32.mxu0 %v7721_v29  ;;  %3259 = vperm.xlu1 %4440, %v3225_v45  }
 0x1cf   : > { %3254 = vperm.xlu0 %4439, %v3224_v13  }
 0x1d0   : > { %4310 = vmatmul.mubr.msk.f32.gmra.mxu1 %vm2230_vm10, %v1404_v32 }
 0x1d1   : > { %4314 = vmatmul.mubr.msk.f32.gmra.mxu0 %vm2230_vm10, %v560_v38  ;;  %2361 = vmatprep.mubr.f32.mxu1 %v7721_v29 }
 0x1d2   : > { %2474 = vmatprep.mubr.f32.mxu0 %v7721_v29  ;;  %3249 = vperm.xlu1 %4440, %v3223_v18  }
 0x1d3   : > { %3244 = vperm.xlu0 %4439, %v3222_v6  }
 0x1d4   : > { %4311 = vmatmul.mubr.msk.f32.gmra.mxu1 %vm2230_vm10, %v1405_v36 }
 0x1d5   : > { %4315 = vmatmul.mubr.msk.f32.gmra.mxu0 %vm2230_vm10, %v561_v54  ;;  %2938 = vmatprep.mubr.f32.mxu1 %v7721_v29 }
 0x1d6   : > { %2480 = vmatprep.mubr.f32.mxu0 %v7721_v29  ;;  %3239 = vperm.xlu1 %4440, %v3221_v3  }
 0x1d7   : > { %3234 = vperm.xlu0 %4439, %v3220_v31  }
 0x1d9   : > { %4316 = vmatmul.mubr.msk.f32.gmra.mxu0 %vm2230_vm10, %v562_v62 }
 0x1da   : > { %2486 = vmatprep.mubr.f32.mxu0 %v7721_v29  ;;  %3229 = vperm.xlu1 %4440, %v3219_v55  }
 0x1db   : > { %3681 = vperm.xlu0 %4439, %v3643_v2  }
 0x1dd   : > { %4317 = vmatmul.mubr.msk.f32.gmra.mxu0 %vm2230_vm10, %v563_v58 }
 0x1de   : > { %2492 = vmatprep.mubr.f32.mxu0 %v7721_v29  ;;  %3676 = vperm.xlu1 %4440, %v3642_v63  }
 0x1df   : > { %3671 = vperm.xlu0 %4439, %v3641_v9  }
 0x1e1   : > { %4318 = vmatmul.mubr.msk.f32.gmra.mxu0 %vm2230_vm10, %v564_v24 }
 0x1e2   : > { %2498 = vmatprep.mubr.f32.mxu0 %v7721_v29  ;;  %3666 = vperm.xlu1 %4440, %v3640_v53  }
 0x1e3   : > { %3661 = vperm.xlu0 %4439, %v3639_v59  }
 0x1e5   : > { %4319 = vmatmul.mubr.msk.f32.gmra.mxu0 %vm2230_vm10, %v565_v50 }
 0x1e6   : > { %3355 = vmatprep.mubr.f32.mxu0 %v7721_v29  ;;  %3656 = vperm.xlu1 %4440, %v3638_v0  }
 0x1e7   : > { %3651 = vperm.xlu0 %4439, %v3637_v51  }
 0x1ea   : > { %3646 = vperm.xlu1 %4440, %v3636_v39  }
 0x1eb   : > { %4049 = vperm.xlu0 %4439, %v4046_v19  }
 0x218   : > { %v6053_v56 = vpop.permute.xlu1 %2540  ;;  %v6055_v46 = vpop.permute.xlu0 %2550 }
 0x21c   : > { %v2536_v30 = vpop.permute.xlu1 %2535  ;;  %v6057_v14 = vpop.permute.xlu0 %2545 }
 0x220   : > { %v2526_v41 = vpop.permute.xlu1 %2525  ;;  %v2531_v21 = vpop.permute.xlu0 %2530 }
 0x224   : > { %v2516_v28 = vpop.permute.xlu1 %2515  ;;  %v2521_v2 = vpop.permute.xlu0 %2520 }
 0x27e   : > { %v2321_v7 = vpop.f32.mrf.mxu0 }
 0x27f   : > { %v2333_v16 = vpop.f32.mrf.mxu1 }
 0x280   : > { %v2323_v34 = vpop.f32.mrf.mxu0 }
 0x281   : > { %v2335_v52 = vpop.f32.mrf.mxu1 }
 0x282   : > { %v2327_v5 = vpop.f32.mrf.mxu0 }
 0x284   : > { %v2329_v35 = vpop.f32.mrf.mxu0  ;;  %v2339_v15 = vpop.f32.mrf.mxu1 }
 0x286   : > { %v2341_v40 = vpop.f32.mrf.mxu1 }
 0x288   : > { %v2345_v61 = vpop.f32.mrf.mxu1 }
 0x289   : > { %v2458_v1 = vpop.f32.mrf.mxu0 }
 0x28a   : > { %v2347_v60 = vpop.f32.mrf.mxu1  ;;  %v2459_v17 = vadd.f32 %v2458_v1, %v2321_v7 }
 0x28b   : > { %v2460_v37 = vpop.f32.mrf.mxu0 }
 0x28c   : > { %v2461_v26 = vadd.f32 %v2460_v37, %v2323_v34  ;;  %v2351_v44 = vpop.f32.mrf.mxu1  ;;  %v6059_v22 = vadd.f32 %v2516_v28, %v2459_v17 }
 0x28d   : > { %v2464_v42 = vpop.f32.mrf.mxu0 }
 0x28e   : > { %7726 = vst [vmem:[#allocation6_spill] sm:$0xff] %v6059_v22  ;;  %v6061_v25 = vadd.f32 %v2516_v28, %v2461_v26  ;;  %v2353_v10 = vpop.f32.mrf.mxu1  ;;  %v2585_v8 = vmin.f32 %v6059_v22, 20.0  ;;  %v2465_v32 = vadd.f32 %v2464_v42, %v2327_v5 }
 0x28f   : > { %v2466_v4 = vpop.f32.mrf.mxu0 }
 0x290   : > { %7727 = vst [vmem:[#allocation7_spill] sm:$0xff] %v6061_v25  ;;  %v2586_v12 = vmin.f32 %v6061_v25, 20.0  ;;  %v2357_v18 = vpop.f32.mrf.mxu1  ;;  %v2601_v36 = vmul.f32 1.442695, %v2585_v8  ;;  %v2467_v62 = vadd.f32 %v2466_v4, %v2329_v35  ;;  %v6076_v53 = vadd.f32 %v2521_v2, %v2465_v32 }
 0x291   : > { %v2470_v11 = vpop.f32.mrf.mxu0 }
 0x292   : > { %v2603_v58 = vmul.f32 1.442695, %v2586_v12  ;;  %v2471_v31 = vadd.f32 %v2470_v11, %v2333_v16  ;;  %7728 = vst [vmem:[#allocation8_spill] sm:$0xff] %v6076_v53  ;;  %v2359_v19 = vpop.f32.mrf.mxu1  ;;  %4474 = vpow2.f32 %v2601_v36  ;;  %v6081_v7 = vadd.f32 %v2521_v2, %v2467_v62 }
 0x293   : > { %v2472_v49 = vpop.f32.mrf.mxu0  ;;  %v2587_v37 = vmin.f32 %v6076_v53, 20.0 }
 0x294   : > { %v2473_v43 = vadd.f32 %v2472_v49, %v2335_v52  ;;  %7729 = vst [vmem:[#allocation9_spill] sm:$0xff] %v6081_v7  ;;  %4476 = vpow2.f32 %v2603_v58  ;;  %v6086_v5 = vadd.f32 %v2526_v41, %v2471_v31  ;;  %v2363_v4 = vpop.f32.mrf.mxu1  ;;  %v2588_v28 = vmin.f32 %v6081_v7, 20.0 }
 0x295   : > { %v2476_v27 = vpop.f32.mrf.mxu0 }
 0x296   : > { %v6063_v48 = vadd.f32 %v2526_v41, %v2473_v43  ;;  %v2477_v23 = vadd.f32 %v2476_v27, %v2339_v15 }
 0x297   : > { %v2478_v20 = vpop.f32.mrf.mxu0 }
 0x298   : > { %v2479_v47 = vadd.f32 %v2478_v20, %v2341_v40  ;;  %v2590_v38 = vmin.f32 %v6063_v48, 20.0  ;;  %v6070_v54 = vadd.f32 %v2531_v21, %v2477_v23  ;;  %v2605_v23 = vmul.f32 1.442695, %v2587_v37  ;;  %v2365_v20 = vpop.f32.mrf.mxu1 }
 0x299   : > { %v2482_v57 = vpop.f32.mrf.mxu0 }
 0x29a   : > { %v6068_v33 = vadd.f32 %v2531_v21, %v2479_v47  ;;  %v2483_v45 = vadd.f32 %v2482_v57, %v2345_v61  ;;  %v2611_v63 = vmul.f32 1.442695, %v2590_v38  ;;  %v2591_v59 = vmin.f32 %v6070_v54, 20.0 }
 0x29b   : > { %v2484_v13 = vpop.f32.mrf.mxu0  ;;  %v2607_v57 = vmul.f32 1.442695, %v2588_v28 }
 0x29c   : > { %v2592_v6 = vmin.f32 %v6068_v33, 20.0  ;;  %v6073_v3 = vadd.f32 %v2536_v30, %v2483_v45  ;;  %v2485_v55 = vadd.f32 %v2484_v13, %v2347_v60  ;;  %4478 = vpow2.f32 %v2611_v63 }
 0x29d   : > { %v2488_v24 = vpop.f32.mrf.mxu0  ;;  %v2613_v61 = vmul.f32 1.442695, %v2591_v59  ;;  %vm2576_vm5 = vcmp.gt.f32.partialorder %v6068_v33, 20.0 }
 0x29e   : > { %v2593_v50 = vmin.f32 %v6073_v3, 20.0  ;;  %v2489_v9 = vadd.f32 %v2488_v24, %v2351_v44  ;;  %v2615_v0 = vmul.f32 1.442695, %v2592_v6  ;;  %v6079_v51 = vadd.f32 %v2536_v30, %v2485_v55 }
 0x29f   : > { %v2490_v39 = vpop.f32.mrf.mxu0  ;;  %v6113_v36 = vpop.eup %4474 }
 0x2a0   : > { %v6084_v34 = vadd.f32 %v6053_v56, %v2489_v9  ;;  %v2491_v16 = vadd.f32 %v2490_v39, %v2353_v10  ;;  %v2617_v52 = vmul.f32 1.442695, %v2593_v50  ;;  %v2594_v35 = vmin.f32 %v6079_v51, 20.0  ;;  %7730 = vst [vmem:[#allocation10_spill] sm:$0xff] %v6113_v36 }
 0x2a1   : > { %v2494_v15 = vpop.f32.mrf.mxu0  ;;  %4480 = vpow2.f32 %v2615_v0  ;;  %v6115_v6 = vpop.eup %4476 }
 0x2a2   : > { %v2595_v30 = vmin.f32 %v6084_v34, 20.0  ;;  %v6091_v1 = vadd.f32 %v6053_v56, %v2491_v16  ;;  %v2495_v40 = vadd.f32 %v2494_v15, %v2357_v18  ;;  %v2619_v42 = vmul.f32 1.442695, %v2594_v35  ;;  %7731 = vst [vmem:[#allocation11_spill] sm:$0xff] %v6115_v6 }
 0x2a3   : > { %v2496_v60 = vpop.f32.mrf.mxu0  ;;  %v2589_v56 = vmin.f32 %v6086_v5, 20.0  ;;  %4482 = vpow2.f32 %v2617_v52  ;;  %vm2579_vm14 = vcmp.gt.f32.partialorder %v6084_v34, 20.0 }
 0x2a4   : > { %v2621_v41 = vmul.f32 1.442695, %v2595_v30  ;;  %v2596_v17 = vmin.f32 %v6091_v1, 20.0  ;;  %v6096_v26 = vadd.f32 %v6057_v14, %v2495_v40  ;;  %v2497_v11 = vadd.f32 %v2496_v60, %v2359_v19 }
 0x2a5   : > { %v2500_v49 = vpop.f32.mrf.mxu0  ;;  %4484 = vpow2.f32 %v2619_v42  ;;  %v2609_v45 = vmul.f32 1.442695, %v2589_v56  ;;  %v6154_v60 = vadd.f32 1.0, %v6113_v36  ;;  %v6166_v56 = vmul.f32 -0.5, %v6115_v6 }
 0x2a6   : > { %v2623_v44 = vmul.f32 1.442695, %v2596_v17  ;;  %v2597_v43 = vmin.f32 %v6096_v26, 20.0  ;;  %v6102_v27 = vadd.f32 %v6057_v14, %v2497_v11  ;;  %4486 = vpow2.f32 %v2621_v41 }
 0x2a7   : > { %v2501_v10 = vadd.f32 %v2500_v49, %v2363_v4  ;;  %v2502_v21 = vpop.f32.mrf.mxu0  ;;  %4488 = vpow2.f32 %v2613_v61  ;;  %v6151_v4 = vadd.f32 1.0, %v6115_v6  ;;  %v6157_v41 = vmul.f32 -0.5, %v6113_v36 }
 0x2a8   : > { %v2625_v8 = vmul.f32 1.442695, %v2597_v43  ;;  %v2598_v47 = vmin.f32 %v6102_v27, 20.0  ;;  %v2503_v12 = vadd.f32 %v2502_v21, %v2365_v20  ;;  %4490 = vpow2.f32 %v2623_v44 }
 0x2a9   : > { %v6106_v38 = vadd.f32 %v6055_v46, %v2501_v10  ;;  %v6117_v31 = vpop.eup %4478  ;;  %7732 = vst [vmem:[#allocation12_spill] sm:$0xff] %v6157_v41  ;;  %vm2582_vm3 = vcmp.gt.f32.partialorder %v6102_v27, 20.0 }
 0x2aa   : > { %4492 = vpow2.f32 %v2625_v8  ;;  %v2627_v32 = vmul.f32 1.442695, %v2598_v47  ;;  %v6109_v14 = vadd.f32 %v6055_v46, %v2503_v12  ;;  %v2678_v2 = vadd.f32 1.0, %v6117_v31 }
 0x2ab   : > { %4494 = vpow2.f32 %v2605_v23  ;;  %v2599_v13 = vmin.f32 %v6106_v38, 20.0  ;;  %v2681_v43 = vmul.f32 -0.5, %v6117_v31  ;;  %vm2583_vm7 = vcmp.gt.f32.partialorder %v6106_v38, 20.0 }
 0x2ac   : > { %4496 = vpow2.f32 %v2627_v32  ;;  %v2600_v18 = vmin.f32 %v6109_v14, 20.0  ;;  %vm2584_vm10 = vcmp.gt.f32.partialorder %v6109_v14, 20.0 }
 0x2ad   : > { %4498 = vpow2.f32 %v2607_v57  ;;  %v2629_v62 = vmul.f32 1.442695, %v2599_v13 }
 0x2ae   : > { %4500 = vpow2.f32 %v2609_v45  ;;  %v2631_v58 = vmul.f32 1.442695, %v2600_v18  ;;  %v6119_v55 = vpop.eup %4480  ;;  %v2684_v45 = vand.u32 2147483647, %v6117_v31 }
 0x2af   : > { %4502 = vpow2.f32 %v2629_v62  ;;  %v2696_v50 = vadd.f32 1.0, %v6119_v55  ;;  %v2699_v10 = vmul.f32 -0.5, %v6119_v55  ;;  %v2702_v13 = vand.u32 2147483647, %v6119_v55 }
 0x2b0   : > { %4504 = vpow2.f32 %v2631_v58  ;;  %v6121_v46 = vpop.eup %4482  ;;  %v2682_v62 = vadd.f32 1.0, %v2681_v43  ;;  %vm6222_vm13 = vcmp.lt.f32.partialorder %v2684_v45, 0.0004427343 }
 0x2b1   : > { %v2705_v59 = vadd.f32 1.0, %v6121_v46  ;;  %4506 = vlog2.f32 %v2678_v2  ;;  %v2708_v8 = vmul.f32 -0.5, %v6121_v46  ;;  %vm6201_vm12 = vcmp.lt.f32.partialorder %v2702_v13, 0.0004427343 }
 0x2b2   : > { %v6123_v24 = vpop.eup %4484  ;;  %4508 = vlog2.f32 %v2696_v50  ;;  %v2711_v50 = vand.u32 2147483647, %v6121_v46  ;;  %v6216_v41 = vmul.f32 %v6117_v31, %v2682_v62 }
 0x2b3   : > { %v6126_v63 = vpop.eup %4486  ;;  %v2714_v39 = vadd.f32 1.0, %v6123_v24  ;;  %4510 = vlog2.f32 %v2705_v59  ;;  %v2717_v57 = vmul.f32 -0.5, %v6123_v24  ;;  %v2700_v59 = vadd.f32 1.0, %v2699_v10 }
 0x2b4   : > { %v6129_v9 = vpop.eup %4488  ;;  %v2723_v16 = vadd.f32 1.0, %v6126_v63  ;;  %v2726_v2 = vmul.f32 -0.5, %v6126_v63  ;;  %vm6208_vm6 = vcmp.lt.f32.partialorder %v2711_v50, 0.0004427343 }
 0x2b5   : > { %v6132_v0 = vpop.eup %4490  ;;  %4512 = vlog2.f32 %v2714_v39  ;;  %v2690_v61 = vmul.f32 -0.5, %v6129_v9  ;;  %v2687_v47 = vadd.f32 1.0, %v6129_v9 }
 0x2b6   : > { %v2732_v37 = vadd.f32 1.0, %v6132_v0  ;;  %4514 = vlog2.f32 %v2723_v16  ;;  %v2729_v16 = vand.u32 2147483647, %v6126_v63  ;;  %v2735_v43 = vmul.f32 -0.5, %v6132_v0 }
 0x2b7   : > { %v6135_v19 = vpop.eup %4492  ;;  %v2691_v21 = vadd.f32 1.0, %v2690_v61  ;;  %v2738_v29 = vand.u32 2147483647, %v6132_v0  ;;  %v2727_v25 = vadd.f32 1.0, %v2726_v2 }
 0x2b8   : > { %v6138_v52 = vpop.eup %4494  ;;  %v2741_v15 = vadd.f32 1.0, %v6135_v19  ;;  %v2736_v6 = vadd.f32 1.0, %v2735_v43  ;;  %vm6250_vm1 = vcmp.lt.f32.partialorder %v2729_v16, 0.0004427343 }
 0x2b9   : > { %v6140_v35 = vpop.eup %4496  ;;  %v2651_v11 = vadd.f32 1.0, %v6138_v52  ;;  %v6163_v28 = vmul.f32 -0.5, %v6138_v52  ;;  %v6189_v39 = vmul.f32 %v6129_v9, %v2691_v21  ;;  %v2747_v21 = vand.u32 2147483647, %v6135_v19 }
 0x2ba   : > { %v6143_v30 = vpop.eup %4498  ;;  %v2750_v40 = vadd.f32 1.0, %v6140_v35  ;;  %v2753_v61 = vmul.f32 -0.5, %v6140_v35  ;;  %vm6232_vm11 = vcmp.lt.f32.partialorder %v2738_v29, 0.0004427343  ;;  %v6248_v29 = vmul.f32 %v6126_v63, %v2727_v25 }
 0x2bb   : > { %v6148_v42 = vpop.eup %4500  ;;  %v2660_v23 = vadd.f32 1.0, %v6143_v30  ;;  %v6178_v12 = vmul.f32 -0.5, %v6143_v30  ;;  %7733 = vst [vmem:[#allocation13_spill] sm:$0xff] %v6189_v39  ;;  %vm6228_vm15 = vcmp.lt.f32.partialorder %v2747_v21, 0.0004427343 }
 0x2bc   : > { %v6159_v17 = vpop.eup %4502  ;;  %4516 = vlog2.f32 %v2750_v40  ;;  %v2669_v32 = vadd.f32 1.0, %v6148_v42  ;;  %v2672_v58 = vmul.f32 -0.5, %v6148_v42  ;;  %v2709_v40 = vadd.f32 1.0, %v2708_v8 }
 0x2bd   : > { %v6168_v49 = vpop.eup %4504  ;;  %v2759_v44 = vadd.f32 1.0, %v6159_v17  ;;  %4518 = vlog2.f32 %v2741_v15  ;;  %v2720_v15 = vand.u32 2147483647, %v6123_v24  ;;  %v2762_v10 = vmul.f32 -0.5, %v6159_v17 }
 0x2be   : > { %v2768_v20 = vadd.f32 1.0, %v6168_v49  ;;  %4520 = vlog2.f32 %v2732_v37  ;;  %v4507_v37 = vpop.eup %4506  ;;  %v2771_v8 = vmul.f32 -0.5, %v6168_v49  ;;  %v6206_v7 = vmul.f32 %v6121_v46, %v2709_v40 }
 0x2bf   : > { %4522 = vlog2.f32 %v2759_v44  ;;  %v2744_v44 = vmul.f32 -0.5, %v6135_v19  ;;  %v4509_v18 = vpop.eup %4508  ;;  %v2754_v2 = vadd.f32 1.0, %v2753_v61  ;;  %v2765_v31 = vand.u32 2147483647, %v6159_v17 }
 0x2c0   : > { %4524 = vlog2.f32 %v2768_v20  ;;  %v2718_v20 = vadd.f32 1.0, %v2717_v57  ;;  %v4511_v22 = vpop.eup %4510  ;;  %vm6236_vm9 = vcmp.lt.f32.partialorder %v2720_v15, 0.0004427343  ;;  %v2774_v43 = vand.u32 2147483647, %v6168_v49 }
 0x2c1   : > { %4526 = vlog2.f32 %v2687_v47  ;;  %v2756_v47 = vand.u32 2147483647, %v6140_v35  ;;  %v2755_v63 = vmul.f32 %v6140_v35, %v2754_v2  ;;  %vm6265_vm2 = vcmp.lt.f32.partialorder %v2765_v31, 0.0004427343 }
 0x2c2   : > { %4528 = vlog2.f32 %v2669_v32  ;;  %v4513_v57 = vpop.eup %4512  ;;  %v6213_v32 = vmul.f32 %v6119_v55, %v2700_v59  ;;  %v6220_v46 = vmul.f32 %v6123_v24, %v2718_v20  ;;  %v2763_v55 = vadd.f32 1.0, %v2762_v10 }
 0x2c3   : > { %4530 = vlog2.f32 %v2660_v23  ;;  %v4515_v13 = vpop.eup %4514  ;;  %v2745_v23 = vadd.f32 1.0, %v2744_v44  ;;  %v2772_v59 = vadd.f32 1.0, %v2771_v8  ;;  %vm6243_vm0 = vcmp.lt.f32.partialorder %v2756_v47, 0.0004427343 }
 0x2c4   : > { %4532 = vlog2.f32 %v2651_v11  ;;  %v6255_v44 = vmul.f32 0.6931472, %v4507_v37  ;;  %v2698_v20 = vmul.f32 0.6931472, %v4509_v18  ;;  %v2673_v10 = vadd.f32 1.0, %v2672_v58 }
 0x2c5   : > { %4534 = vlog2.f32 %v6151_v4  ;;  %v2746_v16 = vmul.f32 %v6135_v19, %v2745_v23  ;;  %v2707_v37 = vmul.f32 0.6931472, %v4511_v22  ;;  %v2764_v39 = vmul.f32 %v6159_v17, %v2763_v55 }
 0x2c6   : > { %4536 = vlog2.f32 %v6154_v60  ;;  %v2773_v35 = vmul.f32 %v6168_v49, %v2772_v59  ;;  %v2716_v2 = vmul.f32 0.6931472, %v4513_v57  ;;  %v7752_v23 = vand.u32 2147483647, %v6129_v9 }
 0x2c7   : > { %vm2775_vm4 = vcmp.lt.f32.partialorder %v2774_v43, 0.0004427343  ;;  %v2704_v55 = vsel %vm6201_vm12, %v6213_v32, %v2698_v20  ;;  %v2737_v9 = vmul.f32 %v6132_v0, %v2736_v6  ;;  %v2713_v57 = vsel %vm6208_vm6, %v6206_v7, %v2707_v37  ;;  %v7760_v20 = vld [vmem:[#allocation11_spill] sm:$0xff] }
 0x2c8   : > { %vm6273_vm8 = vcmp.lt.f32.partialorder %v7752_v23, 0.0004427343  ;;  %vm2575_vm12 = vcmp.gt.f32.partialorder %v6070_v54, 20.0  ;;  %v2686_v53 = vsel %vm6222_vm13, %v6216_v41, %v6255_v44  ;;  %v2674_v6 = vmul.f32 %v6148_v42, %v2673_v10 }
 0x2c9   : > { %v4517_v40 = vpop.eup %4516  ;;  %v2722_v36 = vsel %vm6236_vm9, %v6220_v46, %v2716_v2  ;;  %v2784_v32 = vsel %vm2576_vm5, %v6068_v33, %v2704_v55  ;;  %vm2574_vm6 = vcmp.gt.f32.partialorder %v6063_v48, 20.0  ;;  %vm2573_vm13 = vcmp.gt.f32.partialorder %v6086_v5, 20.0  ;;  %v7772_v55 = vld [vmem:[#allocation8_spill] sm:$0xff] }
 0x2ca   : > { %v4519_v45 = vpop.eup %4518  ;;  %v2752_v25 = vmul.f32 0.6931472, %v4517_v40  ;;  %v2725_v40 = vmul.f32 0.6931472, %v4515_v13  ;;  %v2675_v24 = vand.u32 2147483647, %v6148_v42 }
 0x2cb   : > { %v4521_v4 = vpop.eup %4520  ;;  %v2743_v60 = vmul.f32 0.6931472, %v4519_v45  ;;  %v2666_v59 = vand.u32 2147483647, %v6143_v30  ;;  %v2655_v15 = vadd.f32 1.0, %v6163_v28  ;;  %v7761_v28 = vld [vmem:[#allocation12_spill] sm:$0xff] }
 0x2cc   : > { %v4523_v21 = vpop.eup %4522  ;;  %v2734_v19 = vmul.f32 0.6931472, %v4521_v4  ;;  %v2758_v49 = vsel %vm6243_vm0, %v2755_v63, %v2752_v25  ;;  %v2646_v4 = vadd.f32 1.0, %v6166_v56  ;;  %v2648_v10 = vand.u32 2147483647, %v7760_v20  ;;  %v7764_v56 = vld [vmem:[#allocation10_spill] sm:$0xff] }
 0x2cd   : > { %v4525_v8 = vpop.eup %4524  ;;  %v2761_v47 = vmul.f32 0.6931472, %v4523_v21  ;;  %v2749_v13 = vsel %vm6228_vm15, %v2746_v16, %v2743_v60  ;;  %v2790_v50 = vsel %vm2582_vm3, %v6102_v27, %v2758_v49  ;;  %v2664_v27 = vadd.f32 1.0, %v6178_v12  ;;  %v7773_v49 = vld [vmem:[#allocation7_spill] sm:$0xff] }
 0x2ce   : > { %v2770_v58 = vmul.f32 0.6931472, %v4525_v8  ;;  %v4527_v31 = vpop.eup %4526  ;;  %vm7757_vm15 = vcmp.gt.f32.partialorder %v6091_v1, 20.0  ;;  %v2657_v12 = vand.u32 2147483647, %v6138_v52  ;;  %v2637_v21 = vadd.f32 1.0, %v7761_v28 }
 0x2cf   : > { %v2767_v17 = vsel %vm6265_vm2, %v2764_v39, %v2761_v47  ;;  %v4529_v0 = vpop.eup %4528  ;;  %v2689_v11 = vmul.f32 0.6931472, %v4527_v31  ;;  %vm6344_vm9 = vcmp.lt.f32.partialorder %v2675_v24, 0.0004427343  ;;  %v2639_v37 = vand.u32 2147483647, %v7764_v56 }
 0x2d0   : > { %v2776_v45 = vsel %vm2775_vm4, %v2773_v35, %v2770_v58  ;;  %v2791_v7 = vsel %vm2583_vm7, %v6106_v38, %v2767_v17  ;;  %v4531_v41 = vpop.eup %4530  ;;  %v2731_v38 = vsel %vm6250_vm1, %v6248_v29, %v2725_v40  ;;  %vm7756_vm7 = vcmp.gt.f32.partialorder %v6096_v26, 20.0  ;;  %v7771_v17 = vld [vmem:[#allocation9_spill] sm:$0xff] }
 0x2d1   : > { %v2792_v39 = vsel %vm2584_vm10, %v6109_v14, %v2776_v45  ;;  %v2740_v14 = vsel %vm6232_vm11, %v2737_v9, %v2734_v19  ;;  %vm7755_vm10 = vcmp.gt.f32.partialorder %v6073_v3, 20.0  ;;  %v4533_v33 = vpop.eup %4532  ;;  %v2789_v62 = vsel %vm7756_vm7, %v6096_v26, %v2749_v13  ;;  %v7774_v9 = vld [vmem:[#allocation6_spill] sm:$0xff] }
 0x2d2   : > { %2890 = vmatprep.subr.mxu1 %v2792_v39  ;;  %v2785_v46 = vsel %vm7755_vm10, %v6073_v3, %v2713_v57  ;;  %v2788_v3 = vsel %vm7757_vm15, %v6091_v1, %v2740_v14  ;;  %vm7758_vm11 = vcmp.gt.f32.partialorder %v6079_v51, 20.0  ;;  %v2671_v29 = vmul.f32 0.6931472, %v4529_v0  ;;  %v4535_v44 = vpop.eup %4534  ;;  %v7759_v1 = vld [vmem:[#allocation13_spill] sm:$0xff]  ;;  %v2798_v14 = vld [vmem:[%s7572_s5 + $0x28] sm:$0xff] }
 0x2d3   : > { %2891 = vmatpush1.msra.mxu1 %v2791_v7  ;;  %v2786_v61 = vsel %vm7758_vm11, %v6079_v51, %v2722_v36  ;;  %v2787_v26 = vsel %vm2579_vm14, %v6084_v34, %v2731_v38  ;;  %v2662_v42 = vmul.f32 0.6931472, %v4531_v41  ;;  %v2695_v43 = vsel %vm6273_vm8, %v7759_v1, %v2689_v11  ;;  %v4537_v25 = vpop.eup %4536  ;;  %v2793_v57 = vld [vmem:[%s7572_s5] sm:$0xff]  ;;  %v2796_v0 = vld [vmem:[%s7572_s5 + $0x18] sm:$0xff]  ;;  %v2799_v36 = vld [vmem:[%s7572_s5 + $0x30] sm:$0xff]  ;;  %v2842_v41 = vpop.permute.xlu1 %2841 }
 0x2d4   : > { %2892 = vmatprep.subr.mxu1 %v2790_v50  ;;  %v2653_v51 = vmul.f32 0.6931472, %v4533_v33  ;;  %v2665_v34 = vmul.f32 %v6143_v30, %v2664_v27  ;;  %v2644_v16 = vmul.f32 0.6931472, %v4535_v44  ;;  %v2677_v8 = vsel %vm6344_vm9, %v2674_v6, %v2671_v29  ;;  %v2795_v6 = vld [vmem:[%s7572_s5 + $0x10] sm:$0xff]  ;;  %v2797_v7 = vld [vmem:[%s7572_s5 + $0x20] sm:$0xff]  ;;  %v6430_v50 = vpop.permute.xlu0 %2846 }
 0x2d5   : > { %2893 = vmatpush1.msra.mxu1 %v2789_v62  ;;  %vm6352_vm5 = vcmp.lt.f32.partialorder %v2666_v59, 0.0004427343  ;;  %v2656_v18 = vmul.f32 %v6138_v52, %v2655_v15  ;;  %v2635_v60 = vmul.f32 0.6931472, %v4537_v25  ;;  %v2783_v58 = vsel %vm2575_vm12, %v6070_v54, %v2695_v43 }
 0x2d6   : > { %2894 = vmatprep.subr.mxu1 %v2788_v3  ;;  %v2668_v30 = vsel %vm6352_vm5, %v2665_v34, %v2662_v42  ;;  %vm6362_vm3 = vcmp.lt.f32.partialorder %v2657_v12, 0.0004427343  ;;  %v2647_v19 = vmul.f32 %v7760_v20, %v2646_v4  ;;  %v2782_v52 = vsel %vm2574_vm6, %v6063_v48, %v2686_v53  ;;  %v2794_v53 = vld [vmem:[%s7572_s5 + $0x8] sm:$0xff] }
 0x2d7   : > { %2895 = vmatpush1.msra.mxu1 %v2787_v26  ;;  %v2659_v2 = vsel %vm6362_vm3, %v2656_v18, %v2653_v51  ;;  %vm6372_vm0 = vcmp.lt.f32.partialorder %v2648_v10, 0.0004427343  ;;  %v2638_v54 = vmul.f32 %v7764_v56, %v2637_v21  ;;  %v2781_v22 = vsel %vm2573_vm13, %v6086_v5, %v2677_v8  ;;  %v2832_v38 = vpop.permute.xlu1 %2831 }
 0x2d8   : > { %2896 = vmatprep.subr.mxu1 %v2786_v61  ;;  %vm2572_vm1 = vcmp.gt.f32.partialorder %v7771_v17, 20.0  ;;  %v2650_v40 = vsel %vm6372_vm0, %v2647_v19, %v2644_v16  ;;  %vm2640_vm14 = vcmp.lt.f32.partialorder %v2639_v37, 0.0004427343  ;;  %vm2571_vm2 = vcmp.gt.f32.partialorder %v7772_v55, 20.0  ;;  %v2837_v33 = vpop.permute.xlu0 %2836 }
 0x2d9   : > { %2897 = vmatpush1.msra.mxu1 %v2785_v46  ;;  %v2780_v48 = vsel %vm2572_vm1, %v7771_v17, %v2668_v30  ;;  %v2641_v31 = vsel %vm2640_vm14, %v2638_v54, %v2635_v60  ;;  %v2779_v45 = vsel %vm2571_vm2, %v7772_v55, %v2659_v2  ;;  %vm2570_vm4 = vcmp.gt.f32.partialorder %v7773_v49, 20.0 }
 0x2da   : > { %2898 = vmatprep.subr.mxu1 %v2784_v32  ;;  %v2778_v5 = vsel %vm2570_vm4, %v7773_v49, %v2650_v40  ;;  %vm2569_vm8 = vcmp.gt.f32.partialorder %v7774_v9, 20.0  ;;  %vm7639_vm12 = vcmask 523264   ;;  %v7775_v13 = vmov 0.0   ;;  %v2800_v32 = vld [vmem:[%s7572_s5 + $0x38] sm:$0xff] }
 0x2db   : > { %2899 = vmatpush1.msra.mxu1 %v2783_v58  ;;  %v2777_v39 = vsel %vm2569_vm8, %v7774_v9, %v2641_v31  ;;  %v2822_v62 = vpop.permute.xlu1 %2821 }
 0x2dc   : > { %2900 = vmatprep.subr.mxu1 %v2782_v52  ;;  %v2827_v3 = vpop.permute.xlu0 %2826 }
 0x2dd   : > { %2901 = vmatpush1.msra.mxu1 %v2781_v22 }
 0x2de   : > { %2902 = vmatprep.subr.mxu1 %v2780_v48 }
 0x2df   : > { %2903 = vmatpush1.msra.mxu1 %v2779_v45  ;;  %v2812_v61 = vpop.permute.xlu1 %2811 }
 0x2e0   : > { %2904 = vmatprep.subr.mxu1 %v2778_v5  ;;  %v2817_v43 = vpop.permute.xlu0 %2816 }
 0x2e1   : > { %2905 = vmatpush1.msra.mxu1 %v2777_v39 }
 0x2e2   : > { %4320 = vmatmul.mubr.msk.f32.vlgmr.msra.gmra.mxu1 %vm7639_vm12, %v2793_v57 }
 0x2e3   : > { %2944 = vmatprep.mubr.f32.mxu1 %v7775_v13 }
 0x2e6   : > { %4321 = vmatmul.mubr.msk.f32.gmra.mxu1 %vm7639_vm12, %v2794_v53 }
 0x2e7   : > { %2950 = vmatprep.mubr.f32.mxu1 %v7775_v13 }
 0x2ea   : > { %4322 = vmatmul.mubr.msk.f32.gmra.mxu1 %vm7639_vm12, %v2795_v6 }
 0x2eb   : > { %2956 = vmatprep.mubr.f32.mxu1 %v7775_v13 }
 0x2ee   : > { %4323 = vmatmul.mubr.msk.f32.gmra.mxu1 %vm7639_vm12, %v2796_v0 }
 0x2ef   : > { %2962 = vmatprep.mubr.f32.mxu1 %v7775_v13 }
 0x2f2   : > { %4324 = vmatmul.mubr.msk.f32.gmra.mxu1 %vm7639_vm12, %v2797_v7 }
 0x2f3   : > { %2968 = vmatprep.mubr.f32.mxu1 %v7775_v13 }
 0x2f6   : > { %4325 = vmatmul.mubr.msk.f32.gmra.mxu1 %vm7639_vm12, %v2798_v14 }
 0x2f7   : > { %2974 = vmatprep.mubr.f32.mxu1 %v7775_v13 }
 0x2fa   : > { %4326 = vmatmul.mubr.msk.f32.gmra.mxu1 %vm7639_vm12, %v2799_v36 }
 0x2fb   : > { %2980 = vmatprep.mubr.f32.mxu1 %v7775_v13 }
 0x2fe   : > { %4327 = vmatmul.mubr.msk.f32.gmra.mxu1 %vm7639_vm12, %v2800_v32 }
 0x2ff   : > { %3772 = vmatprep.mubr.f32.mxu1 %v7775_v13 }
 0x3a2   : > { %v2940_v46 = vpop.f32.mrf.mxu1 }
 0x3a3   : > { %v6432_v15 = vadd.f32 %v2940_v46, %v2812_v61 }
 0x3a4   : > { %v2942_v11 = vpop.f32.mrf.mxu1 }
 0x3a5   : > { %7776 = vst [vmem:[#allocation13_spill] sm:$0xff] %v6432_v15  ;;  %v6434_v44 = vadd.f32 %v2942_v11, %v2812_v61  ;;  %v3003_v1 = vmin.f32 %v6432_v15, 20.0 }
 0x3a6   : > { %v2946_v24 = vpop.f32.mrf.mxu1 }
 0x3a7   : > { %7777 = vst [vmem:[#allocation11_spill] sm:$0xff] %v6434_v44  ;;  %v3004_v51 = vmin.f32 %v6434_v44, 20.0  ;;  %v6442_v10 = vadd.f32 %v2946_v24, %v2817_v43  ;;  %v3019_v34 = vmul.f32 1.442695, %v3003_v1 }
 0x3a8   : > { %v2948_v27 = vpop.f32.mrf.mxu1 }
 0x3a9   : > { %7778 = vst [vmem:[#allocation12_spill] sm:$0xff] %v6442_v10  ;;  %v3021_v37 = vmul.f32 1.442695, %v3004_v51  ;;  %v3005_v47 = vmin.f32 %v6442_v10, 20.0  ;;  %4538 = vpow2.f32 %v3019_v34  ;;  %v6458_v23 = vadd.f32 %v2948_v27, %v2817_v43 }
 0x3aa   : > { %v2952_v59 = vpop.f32.mrf.mxu1 }
 0x3ab   : > { %4540 = vpow2.f32 %v3021_v37  ;;  %7779 = vst [vmem:[#allocation10_spill] sm:$0xff] %v6458_v23  ;;  %v3023_v40 = vmul.f32 1.442695, %v3005_v47  ;;  %v6466_v5 = vadd.f32 %v2952_v59, %v2822_v62  ;;  %v3006_v39 = vmin.f32 %v6458_v23, 20.0 }
 0x3ac   : > { %v2954_v29 = vpop.f32.mrf.mxu1 }
 0x3ad   : > { %v6436_v42 = vadd.f32 %v2954_v29, %v2822_v62 }
 0x3ae   : > { %v2958_v26 = vpop.f32.mrf.mxu1 }
 0x3af   : > { %v6438_v12 = vadd.f32 %v2958_v26, %v2827_v3  ;;  %v3008_v28 = vmin.f32 %v6436_v42, 20.0 }
 0x3b0   : > { %v2960_v4 = vpop.f32.mrf.mxu1 }
 0x3b1   : > { %v3009_v25 = vmin.f32 %v6438_v12, 20.0  ;;  %v3029_v18 = vmul.f32 1.442695, %v3008_v28  ;;  %v6455_v35 = vadd.f32 %v2960_v4, %v2827_v3  ;;  %vm2993_vm9 = vcmp.gt.f32.partialorder %v6438_v12, 20.0 }
 0x3b2   : > { %v2964_v20 = vpop.f32.mrf.mxu1 }
 0x3b3   : > { %v6445_v21 = vadd.f32 %v2964_v20, %v2832_v38  ;;  %v3031_v30 = vmul.f32 1.442695, %v3009_v25  ;;  %4542 = vpow2.f32 %v3029_v18  ;;  %v3010_v55 = vmin.f32 %v6455_v35, 20.0 }
 0x3b4   : > { %v2966_v63 = vpop.f32.mrf.mxu1  ;;  %vm2994_vm8 = vcmp.gt.f32.partialorder %v6455_v35, 20.0 }
 0x3b5   : > { %v3011_v16 = vmin.f32 %v6445_v21, 20.0  ;;  %v6449_v56 = vadd.f32 %v2966_v63, %v2832_v38  ;;  %4544 = vpow2.f32 %v3031_v30  ;;  %v3033_v36 = vmul.f32 1.442695, %v3010_v55 }
 0x3b6   : > { %v2970_v8 = vpop.f32.mrf.mxu1  ;;  %v3007_v38 = vmin.f32 %v6466_v5, 20.0  ;;  %v6482_v59 = vpop.eup %4538 }
 0x3b7   : > { %v3012_v60 = vmin.f32 %v6449_v56, 20.0  ;;  %v6453_v58 = vadd.f32 %v2970_v8, %v2837_v33  ;;  %v3035_v52 = vmul.f32 1.442695, %v3011_v16  ;;  %7780 = vst [vmem:[#allocation9_spill] sm:$0xff] %v6482_v59  ;;  %v6513_v18 = vadd.f32 1.0, %v6482_v59 }
 0x3b8   : > { %v2972_v19 = vpop.f32.mrf.mxu1  ;;  %v3027_v27 = vmul.f32 1.442695, %v3007_v38  ;;  %v6484_v61 = vpop.eup %4540  ;;  %vm2996_vm4 = vcmp.gt.f32.partialorder %v6449_v56, 20.0 }
 0x3b9   : > { %v3013_v2 = vmin.f32 %v6453_v58, 20.0  ;;  %v3037_v54 = vmul.f32 1.442695, %v3012_v60  ;;  %v6460_v22 = vadd.f32 %v2972_v19, %v2837_v33  ;;  %4546 = vpow2.f32 %v3035_v52  ;;  %7781 = vst [vmem:[#allocation8_spill] sm:$0xff] %v6484_v61 }
 0x3ba   : > { %v2976_v17 = vpop.f32.mrf.mxu1  ;;  %v3025_v33 = vmul.f32 1.442695, %v3006_v39  ;;  %v6519_v19 = vmul.f32 -0.5, %v6482_v59 }
 0x3bb   : > { %v6462_v48 = vadd.f32 %v2976_v17, %v2842_v41  ;;  %v3039_v31 = vmul.f32 1.442695, %v3013_v2  ;;  %v3014_v45 = vmin.f32 %v6460_v22, 20.0  ;;  %4548 = vpow2.f32 %v3037_v54 }
 0x3bc   : > { %v2978_v49 = vpop.f32.mrf.mxu1  ;;  %4550 = vpow2.f32 %v3023_v40  ;;  %v3060_v17 = vadd.f32 1.0, %v6484_v61 }
 0x3bd   : > { %v3015_v9 = vmin.f32 %v6462_v48, 20.0  ;;  %v6469_v57 = vadd.f32 %v2978_v49, %v2842_v41  ;;  %v3041_v53 = vmul.f32 1.442695, %v3014_v45  ;;  %4552 = vpow2.f32 %v3039_v31 }
 0x3be   : > { %v2982_v6 = vpop.f32.mrf.mxu1  ;;  %v6529_v31 = vmul.f32 -0.5, %v6484_v61 }
 0x3bf   : > { %v3043_v0 = vmul.f32 1.442695, %v3015_v9  ;;  %v3016_v7 = vmin.f32 %v6469_v57, 20.0  ;;  %v6474_v14 = vadd.f32 %v2982_v6, %v6430_v50  ;;  %vm3000_vm13 = vcmp.gt.f32.partialorder %v6469_v57, 20.0 }
 0x3c0   : > { %v2984_v32 = vpop.f32.mrf.mxu1  ;;  %v6486_v29 = vpop.eup %4542 }
 0x3c1   : > { %4554 = vpow2.f32 %v3043_v0  ;;  %v3045_v41 = vmul.f32 1.442695, %v3016_v7  ;;  %v3017_v46 = vmin.f32 %v6474_v14, 20.0  ;;  %v6479_v11 = vadd.f32 %v2984_v32, %v6430_v50 }
 0x3c2   : > { %4556 = vpow2.f32 %v3041_v53  ;;  %v6488_v26 = vpop.eup %4544  ;;  %v3096_v1 = vadd.f32 1.0, %v6486_v29  ;;  %v3099_v7 = vmul.f32 -0.5, %v6486_v29  ;;  %vm3001_vm10 = vcmp.gt.f32.partialorder %v6474_v14, 20.0 }
 0x3c3   : > { %4558 = vpow2.f32 %v3045_v41  ;;  %v3047_v62 = vmul.f32 1.442695, %v3017_v46  ;;  %v3018_v24 = vmin.f32 %v6479_v11, 20.0  ;;  %v3105_v51 = vadd.f32 1.0, %v6488_v26 }
 0x3c4   : > { %4560 = vpow2.f32 %v3033_v36  ;;  %v3108_v55 = vmul.f32 -0.5, %v6488_v26  ;;  %vm3002_vm6 = vcmp.gt.f32.partialorder %v6479_v11, 20.0 }
 0x3c5   : > { %4562 = vpow2.f32 %v3047_v62  ;;  %v3049_v3 = vmul.f32 1.442695, %v3018_v24 }
 0x3c6   : > { %4564 = vpow2.f32 %v3025_v33  ;;  %v6490_v50 = vpop.eup %4546  ;;  %v3109_v33 = vadd.f32 1.0, %v3108_v55 }
 0x3c7   : > { %4566 = vpow2.f32 %v3049_v3  ;;  %v3123_v28 = vadd.f32 1.0, %v6490_v50  ;;  %v3126_v46 = vmul.f32 -0.5, %v6490_v50 }
 0x3c8   : > { %4568 = vpow2.f32 %v3027_v27  ;;  %v6492_v4 = vpop.eup %4548 }
 0x3c9   : > { %v6495_v43 = vpop.eup %4550  ;;  %v3132_v63 = vadd.f32 1.0, %v6492_v4  ;;  %4570 = vlog2.f32 %v3096_v1  ;;  %v3111_v1 = vand.u32 2147483647, %v6488_v26 }
 0x3ca   : > { %7782 = vst [vmem:[#allocation7_spill] sm:$0xff] %v6495_v43  ;;  %v6498_v20 = vpop.eup %4552  ;;  %4572 = vlog2.f32 %v3105_v51  ;;  %v3069_v53 = vadd.f32 1.0, %v6495_v43  ;;  %v6542_v36 = vmul.f32 -0.5, %v6495_v43  ;;  %v3100_v51 = vadd.f32 1.0, %v3099_v7 }
 0x3cb   : > { %4574 = vlog2.f32 %v3123_v28  ;;  %v3141_v54 = vadd.f32 1.0, %v6498_v20  ;;  %v3102_v28 = vand.u32 2147483647, %v6486_v29  ;;  %vm6618_vm0 = vcmp.lt.f32.partialorder %v3111_v1, 0.0004427343 }
 0x3cc   : > { %4576 = vlog2.f32 %v3132_v63 }
 0x3cd   : > { %vm6601_vm11 = vcmp.lt.f32.partialorder %v3102_v28, 0.0004427343 }
 0x3ce   : > { %v6501_v25 = vpop.eup %4554 }
 0x3cf   : > { %v6504_v34 = vpop.eup %4556  ;;  %v3159_v16 = vadd.f32 1.0, %v6501_v25  ;;  %v3162_v45 = vmul.f32 -0.5, %v6501_v25 }
 0x3d0   : > { %v6507_v37 = vpop.eup %4558  ;;  %v3150_v30 = vadd.f32 1.0, %v6504_v34  ;;  %v3153_v55 = vmul.f32 -0.5, %v6504_v34 }
 0x3d1   : > { %v6509_v8 = vpop.eup %4560  ;;  %v3168_v47 = vadd.f32 1.0, %v6507_v37  ;;  %4578 = vlog2.f32 %v3159_v16  ;;  %v3144_v16 = vmul.f32 -0.5, %v6498_v20  ;;  %v3171_v13 = vmul.f32 -0.5, %v6507_v37 }
 0x3d2   : > { %v6515_v60 = vpop.eup %4562  ;;  %v3114_v9 = vadd.f32 1.0, %v6509_v8  ;;  %v3117_v39 = vmul.f32 -0.5, %v6509_v8 }
 0x3d3   : > { %v3177_v2 = vadd.f32 1.0, %v6515_v60  ;;  %v6525_v40 = vpop.eup %4564  ;;  %4580 = vlog2.f32 %v3168_v47  ;;  %v3135_v47 = vmul.f32 -0.5, %v6492_v4  ;;  %v3180_v52 = vmul.f32 -0.5, %v6515_v60 }
 0x3d4   : > { %7783 = vst [vmem:[#allocation6_spill] sm:$0xff] %v6525_v40  ;;  %v6532_v49 = vpop.eup %4566  ;;  %v3078_v32 = vadd.f32 1.0, %v6525_v40  ;;  %v6546_v38 = vmul.f32 -0.5, %v6525_v40  ;;  %v3118_v24 = vadd.f32 1.0, %v3117_v39  ;;  %v3127_v39 = vadd.f32 1.0, %v3126_v46 }
 0x3d5   : > { %4582 = vlog2.f32 %v3177_v2  ;;  %v6537_v6 = vpop.eup %4568  ;;  %v3186_v0 = vadd.f32 1.0, %v6532_v49  ;;  %v3120_v2 = vand.u32 2147483647, %v6509_v8  ;;  %v3189_v3 = vmul.f32 -0.5, %v6532_v49 }
 0x3d6   : > { %4584 = vlog2.f32 %v3150_v30  ;;  %v3087_v27 = vadd.f32 1.0, %v6537_v6  ;;  %v6556_v63 = vmul.f32 -0.5, %v6537_v6  ;;  %v3129_v30 = vand.u32 2147483647, %v6490_v50 }
 0x3d7   : > { %4586 = vlog2.f32 %v3141_v54  ;;  %v4571_v54 = vpop.eup %4570  ;;  %v6572_v41 = vmul.f32 %v6509_v8, %v3118_v24  ;;  %v3147_v46 = vand.u32 2147483647, %v6498_v20  ;;  %v3145_v15 = vadd.f32 1.0, %v3144_v16 }
 0x3d8   : > { %4588 = vlog2.f32 %v3186_v0  ;;  %v6565_v0 = vmul.f32 %v6488_v26, %v3109_v33  ;;  %v6567_v7 = vpop.eup %4572  ;;  %v3165_v33 = vand.u32 2147483647, %v6501_v25  ;;  %v6578_v44 = vadd.f32 1.0, %v3135_v47 }
 0x3d9   : > { %4590 = vlog2.f32 %v3114_v9  ;;  %v3138_v9 = vand.u32 2147483647, %v6492_v4  ;;  %v4575_v62 = vpop.eup %4574  ;;  %v3174_v8 = vand.u32 2147483647, %v6507_v37  ;;  %v3154_v24 = vadd.f32 1.0, %v3153_v55 }
 0x3da   : > { %4592 = vlog2.f32 %v3087_v27  ;;  %v4577_v26 = vpop.eup %4576  ;;  %v6583_v27 = vmul.f32 %v6490_v50, %v3127_v39  ;;  %v3183_v59 = vand.u32 2147483647, %v6515_v60  ;;  %v3163_v16 = vadd.f32 1.0, %v3162_v45 }
 0x3db   : > { %4594 = vlog2.f32 %v3078_v32  ;;  %v3181_v32 = vadd.f32 1.0, %v3180_v52  ;;  %v3190_v47 = vadd.f32 1.0, %v3189_v3  ;;  %v3172_v61 = vadd.f32 1.0, %v3171_v13 }
 0x3dc   : > { %4596 = vlog2.f32 %v3069_v53  ;;  %v3156_v55 = vand.u32 2147483647, %v6504_v34  ;;  %vm6590_vm7 = vcmp.lt.f32.partialorder %v3147_v46, 0.0004427343  ;;  %vm6594_vm15 = vcmp.lt.f32.partialorder %v3129_v30, 0.0004427343 }
 0x3dd   : > { %4598 = vlog2.f32 %v3060_v17  ;;  %v6599_v52 = vmul.f32 %v6486_v29, %v3100_v51  ;;  %v3192_v13 = vand.u32 2147483647, %v6532_v49  ;;  %vm6607_vm5 = vcmp.lt.f32.partialorder %v3165_v33, 0.0004427343 }
 0x3de   : > { %v4579_v10 = vpop.eup %4578  ;;  %4600 = vlog2.f32 %v6513_v18  ;;  %v6612_v30 = vmul.f32 %v6498_v20, %v3145_v15  ;;  %vm6614_vm3 = vcmp.lt.f32.partialorder %v3138_v9, 0.0004427343  ;;  %vm6622_vm1 = vcmp.lt.f32.partialorder %v3174_v8, 0.0004427343 }
 0x3df   : > { %v3155_v33 = vmul.f32 %v6504_v34, %v3154_v24  ;;  %vm6628_vm2 = vcmp.lt.f32.partialorder %v3120_v2, 0.0004427343  ;;  %v6632_v20 = vmul.f32 0.6931472, %v4571_v54  ;;  %vm6637_vm12 = vcmp.lt.f32.partialorder %v3183_v59, 0.0004427343 }
 0x3e0   : > { %v4581_v23 = vpop.eup %4580  ;;  %v3161_v8 = vmul.f32 0.6931472, %v4579_v10  ;;  %v3164_v34 = vmul.f32 %v6501_v25, %v3163_v16  ;;  %v3173_v54 = vmul.f32 %v6507_v37, %v3172_v61  ;;  %vm3193_vm14 = vcmp.lt.f32.partialorder %v3192_v13, 0.0004427343 }
 0x3e1   : > { %v3170_v46 = vmul.f32 0.6931472, %v4581_v23  ;;  %v3182_v23 = vmul.f32 %v6515_v60, %v3181_v32  ;;  %v3125_v32 = vmul.f32 0.6931472, %v4575_v62  ;;  %v3134_v16 = vmul.f32 0.6931472, %v4577_v26 }
 0x3e2   : > { %v4583_v53 = vpop.eup %4582  ;;  %v3167_v37 = vsel %vm6607_vm5, %v3164_v34, %v3161_v8  ;;  %v3091_v26 = vadd.f32 1.0, %v6556_v63  ;;  %vm2991_vm5 = vcmp.gt.f32.partialorder %v6466_v5, 20.0  ;;  %v3055_v51 = vadd.f32 1.0, %v6519_v19  ;;  %v7819_v34 = vld [vmem:[#allocation8_spill] sm:$0xff]  ;;  %v7827_v62 = vld [vmem:[#allocation11_spill] sm:$0xff] }
 0x3e3   : > { %v4585_v45 = vpop.eup %4584  ;;  %v3179_v3 = vmul.f32 0.6931472, %v4583_v53  ;;  %v3191_v53 = vmul.f32 %v6532_v49, %v3190_v47  ;;  %v3176_v25 = vsel %vm6622_vm1, %v3173_v54, %v3170_v46  ;;  %v3107_v49 = vmul.f32 0.6931472, %v6567_v7 }
 0x3e4   : > { %v4587_v28 = vpop.eup %4586  ;;  %v3152_v40 = vmul.f32 0.6931472, %v4585_v45  ;;  %v3208_v13 = vsel %vm3000_vm13, %v6469_v57, %v3176_v25  ;;  %vm7805_vm13 = vcmp.gt.f32.partialorder %v6460_v22, 20.0 }
 0x3e5   : > { %v4589_v1 = vpop.eup %4588  ;;  %v3185_v60 = vsel %vm6637_vm12, %v3182_v23, %v3179_v3  ;;  %v3143_v59 = vmul.f32 0.6931472, %v4587_v28  ;;  %vm6657_vm12 = vcmp.lt.f32.partialorder %v3156_v55, 0.0004427343  ;;  %v3113_v50 = vsel %vm6618_vm0, %v6565_v0, %v3107_v49 }
 0x3e6   : > { %v4591_v2 = vpop.eup %4590  ;;  %v3188_v24 = vmul.f32 0.6931472, %v4589_v1  ;;  %v3209_v43 = vsel %vm3001_vm10, %v6474_v14, %v3185_v60  ;;  %v3158_v7 = vsel %vm6657_vm12, %v3155_v33, %v3152_v40  ;;  %vm7804_vm10 = vcmp.gt.f32.partialorder %v6462_v48, 20.0  ;;  %v7823_v60 = vld [vmem:[#allocation9_spill] sm:$0xff] }
 0x3e7   : > { %v3116_v47 = vmul.f32 0.6931472, %v4591_v2  ;;  %v4593_v45 = vpop.eup %4592  ;;  %v3149_v14 = vsel %vm6590_vm7, %v6612_v30, %v3143_v59  ;;  %v3207_v63 = vsel %vm7804_vm10, %v6462_v48, %v3167_v37  ;;  %v3073_v3 = vadd.f32 1.0, %v6542_v36 }
 0x3e8   : > { %v3194_v10 = vsel %vm3193_vm14, %v3191_v53, %v3188_v24  ;;  %v4595_v55 = vpop.eup %4594  ;;  %v3089_v48 = vmul.f32 0.6931472, %v4593_v45  ;;  %vm7806_vm7 = vcmp.gt.f32.partialorder %v6453_v58, 20.0  ;;  %v3092_v36 = vmul.f32 %v6537_v6, %v3091_v26  ;;  %v3211_v45 = vld [vmem:[%s7574_s7] sm:$0xff]  ;;  %v3213_v26 = vld [vmem:[%s7574_s7 + $0x10] sm:$0xff] }
 0x3e9   : > { %v3210_v61 = vsel %vm3002_vm6, %v6479_v11, %v3194_v10  ;;  %v3137_v11 = vmul.f32 %v6492_v4, %v6578_v44  ;;  %vm2992_vm6 = vcmp.gt.f32.partialorder %v6436_v42, 20.0  ;;  %v3131_v44 = vsel %vm6594_vm15, %v6583_v27, %v3125_v32  ;;  %v4597_v40 = vpop.eup %4596  ;;  %v7824_v10 = vld [vmem:[#allocation10_spill] sm:$0xff] }
 0x3ea   : > { %3307 = vmatprep.subr.mxu0 %v3210_v61  ;;  %v3104_v4 = vsel %vm6601_vm11, %v6599_v52, %v6632_v20  ;;  %v3082_v27 = vadd.f32 1.0, %v6546_v38  ;;  %v4599_v17 = vpop.eup %4598  ;;  %v3206_v52 = vsel %vm7805_vm13, %v6460_v22, %v3158_v7  ;;  %v3122_v18 = vsel %vm6628_vm2, %v6572_v41, %v3116_v47 }
 0x3eb   : > { %3308 = vmatpush1.msra.mxu0 %v3209_v43  ;;  %v3140_v57 = vsel %vm6614_vm3, %v3137_v11, %v3134_v16  ;;  %v4601_v39 = vpop.eup %4600  ;;  %v3205_v0 = vsel %vm7806_vm7, %v6453_v58, %v3149_v14  ;;  %vm7807_vm15 = vcmp.gt.f32.partialorder %v6445_v21, 20.0  ;;  %v3080_v30 = vmul.f32 0.6931472, %v4595_v55  ;;  %v7826_v16 = vld [vmem:[#allocation12_spill] sm:$0xff]  ;;  %v3212_v11 = vld [vmem:[%s7574_s7 + $0x8] sm:$0xff] }
 0x3ec   : > { %3309 = vmatprep.subr.mxu0 %v3208_v13  ;;  %v3203_v38 = vsel %vm7807_vm15, %v6445_v21, %v3131_v44  ;;  %v3064_v22 = vadd.f32 1.0, %v6529_v31  ;;  %v3204_v41 = vsel %vm2996_vm4, %v6449_v56, %v3140_v57  ;;  %v3071_v29 = vmul.f32 0.6931472, %v4597_v40  ;;  %v7811_v31 = vld [vmem:[#allocation6_spill] sm:$0xff]  ;;  %v3214_v55 = vld [vmem:[%s7574_s7 + $0x18] sm:$0xff]  ;;  %v3217_v44 = vld [vmem:[%s7574_s7 + $0x30] sm:$0xff]  ;;  %v3260_v40 = vpop.permute.xlu1 %3259 }
 0x3ed   : > { %3310 = vmatpush1.msra.mxu0 %v3207_v63  ;;  %v3202_v58 = vsel %vm2994_vm8, %v6455_v35, %v3122_v18  ;;  %v7808_v21 = vand.u32 2147483647, %v6537_v6  ;;  %v3083_v46 = vmul.f32 %v7811_v31, %v3082_v27  ;;  %v3062_v33 = vmul.f32 0.6931472, %v4599_v17  ;;  %v7815_v35 = vld [vmem:[#allocation7_spill] sm:$0xff]  ;;  %v3215_v13 = vld [vmem:[%s7574_s7 + $0x20] sm:$0xff]  ;;  %v6810_v63 = vpop.permute.xlu0 %3264 }
 0x3ee   : > { %3311 = vmatprep.subr.mxu0 %v3206_v52  ;;  %v7812_v19 = vand.u32 2147483647, %v7811_v31  ;;  %v3074_v20 = vmul.f32 %v7815_v35, %v3073_v3  ;;  %v3053_v6 = vmul.f32 0.6931472, %v4601_v39  ;;  %v3201_v1 = vsel %vm2993_vm9, %v6438_v12, %v3113_v50  ;;  %v3216_v14 = vld [vmem:[%s7574_s7 + $0x28] sm:$0xff] }
 0x3ef   : > { %3312 = vmatpush1.msra.mxu0 %v3205_v0  ;;  %vm6717_vm11 = vcmp.lt.f32.partialorder %v7808_v21, 0.0004427343  ;;  %v7816_v9 = vand.u32 2147483647, %v7815_v35  ;;  %v3065_v2 = vmul.f32 %v7819_v34, %v3064_v22  ;;  %v3200_v24 = vsel %vm2992_vm6, %v6436_v42, %v3104_v4  ;;  %v3218_v4 = vld [vmem:[%s7574_s7 + $0x38] sm:$0xff] }
 0x3f0   : > { %3313 = vmatprep.subr.mxu0 %v3204_v41  ;;  %v3095_v56 = vsel %vm6717_vm11, %v3092_v36, %v3089_v48  ;;  %vm6726_vm3 = vcmp.lt.f32.partialorder %v7812_v19, 0.0004427343  ;;  %v7820_v12 = vand.u32 2147483647, %v7819_v34  ;;  %v3056_v59 = vmul.f32 %v7823_v60, %v3055_v51  ;;  %v3250_v57 = vpop.permute.xlu1 %3249 }
 0x3f1   : > { %3314 = vmatpush1.msra.mxu0 %v3203_v38  ;;  %v3086_v23 = vsel %vm6726_vm3, %v3083_v46, %v3080_v30  ;;  %vm6738_vm0 = vcmp.lt.f32.partialorder %v7816_v9, 0.0004427343  ;;  %v3199_v32 = vsel %vm2991_vm5, %v6466_v5, %v3095_v56  ;;  %vm2990_vm1 = vcmp.gt.f32.partialorder %v7824_v10, 20.0  ;;  %v7828_v5 = vld [vmem:[#allocation13_spill] sm:$0xff]  ;;  %v3255_v17 = vpop.permute.xlu0 %3254 }
 0x3f2   : > { %3315 = vmatprep.subr.mxu0 %v3202_v58  ;;  %v3077_v53 = vsel %vm6738_vm0, %v3074_v20, %v3071_v29  ;;  %vm6750_vm9 = vcmp.lt.f32.partialorder %v7820_v12, 0.0004427343  ;;  %v7825_v25 = vand.u32 2147483647, %v7823_v60  ;;  %vm2989_vm2 = vcmp.gt.f32.partialorder %v7826_v16, 20.0 }
 0x3f3   : > { %3316 = vmatpush1.msra.mxu0 %v3201_v1  ;;  %v3068_v42 = vsel %vm6750_vm9, %v3065_v2, %v3062_v33  ;;  %v3198_v49 = vsel %vm2990_vm1, %v7824_v10, %v3086_v23  ;;  %v3197_v37 = vsel %vm2989_vm2, %v7826_v16, %v3077_v53  ;;  %vm2988_vm4 = vcmp.gt.f32.partialorder %v7827_v62, 20.0 }
 0x3f4   : > { %3317 = vmatprep.subr.mxu0 %v3200_v24  ;;  %vm3058_vm14 = vcmp.lt.f32.partialorder %v7825_v25, 0.0004427343  ;;  %vm2987_vm8 = vcmp.gt.f32.partialorder %v7828_v5, 20.0  ;;  %v3196_v47 = vsel %vm2988_vm4, %v7827_v62, %v3068_v42  ;;  %vm7829_vm12 = vcmask 523264   ;;  %v3240_v52 = vpop.permute.xlu1 %3239 }
 0x3f5   : > { %3318 = vmatpush1.msra.mxu0 %v3199_v32  ;;  %v3059_v61 = vsel %vm3058_vm14, %v3056_v59, %v3053_v6  ;;  %v7830_v7 = vmov 0.0   ;;  %vm7831_vm6 = vmmov %vm7829_vm12  ;;  %v3245_v39 = vpop.permute.xlu0 %3244 }
 0x3f6   : > { %3319 = vmatprep.subr.mxu0 %v3198_v49  ;;  %v3195_v43 = vsel %vm2987_vm8, %v7828_v5, %v3059_v61  ;;  %vm7832_vm5 = vmmov %vm7831_vm6 }
 0x3f7   : > { %3320 = vmatpush1.msra.mxu0 %v3197_v37  ;;  %vm7833_vm10 = vmmov %vm7832_vm5 }
 0x3f8   : > { %3321 = vmatprep.subr.mxu0 %v3196_v47  ;;  %vm7834_vm13 = vmmov %vm7832_vm5  ;;  %v3230_v0 = vpop.permute.xlu1 %3229 }
 0x3f9   : > { %3322 = vmatpush1.msra.mxu0 %v3195_v43  ;;  %vm7835_vm7 = vmmov %vm7832_vm5  ;;  %v3235_v21 = vpop.permute.xlu0 %3234 }
 0x3fa   : > { %4328 = vmatmul.mubr.msk.f32.vlgmr.msra.gmra.mxu0 %vm7829_vm12, %v3211_v45  ;;  %vm7836_vm15 = vmmov %vm7832_vm5 }
 0x3fb   : > { %3361 = vmatprep.mubr.f32.mxu0 %v7830_v7  ;;  %vm7837_vm11 = vmmov %vm7832_vm5 }
 0x3fe   : > { %4329 = vmatmul.mubr.msk.f32.gmra.mxu0 %vm7831_vm6, %v3212_v11 }
 0x3ff   : > { %3367 = vmatprep.mubr.f32.mxu0 %v7830_v7 }
 0x402   : > { %4330 = vmatmul.mubr.msk.f32.gmra.mxu0 %vm7832_vm5, %v3213_v26 }
 0x403   : > { %3373 = vmatprep.mubr.f32.mxu0 %v7830_v7 }
 0x406   : > { %4331 = vmatmul.mubr.msk.f32.gmra.mxu0 %vm7833_vm10, %v3214_v55 }
 0x407   : > { %3379 = vmatprep.mubr.f32.mxu0 %v7830_v7 }
 0x40a   : > { %4332 = vmatmul.mubr.msk.f32.gmra.mxu0 %vm7834_vm13, %v3215_v13 }
 0x40b   : > { %3385 = vmatprep.mubr.f32.mxu0 %v7830_v7 }
 0x40e   : > { %4333 = vmatmul.mubr.msk.f32.gmra.mxu0 %vm7835_vm7, %v3216_v14 }
 0x40f   : > { %3391 = vmatprep.mubr.f32.mxu0 %v7830_v7 }
 0x412   : > { %4334 = vmatmul.mubr.msk.f32.gmra.mxu0 %vm7836_vm15, %v3217_v44 }
 0x413   : > { %3397 = vmatprep.mubr.f32.mxu0 %v7830_v7 }
 0x416   : > { %4335 = vmatmul.mubr.msk.f32.gmra.mxu0 %vm7837_vm11, %v3218_v4 }
 0x417   : > { %4123 = vmatprep.mubr.f32.mxu0 %v7830_v7 }
 0x4ba   : > { %v3357_v50 = vpop.f32.mrf.mxu0 }
 0x4bb   : > { %v6812_v30 = vadd.f32 %v3357_v50, %v3230_v0 }
 0x4bc   : > { %v3359_v27 = vpop.f32.mrf.mxu0 }
 0x4bd   : > { %7838 = vst [vmem:[#allocation6_spill] sm:$0xff] %v6812_v30  ;;  %v6814_v22 = vadd.f32 %v3359_v27, %v3230_v0  ;;  %v3420_v58 = vmin.f32 %v6812_v30, 20.0 }
 0x4be   : > { %v3363_v18 = vpop.f32.mrf.mxu0 }
 0x4bf   : > { %7839 = vst [vmem:[#allocation7_spill] sm:$0xff] %v6814_v22  ;;  %v3421_v28 = vmin.f32 %v6814_v22, 20.0  ;;  %v6822_v46 = vadd.f32 %v3363_v18, %v3235_v21  ;;  %v3436_v35 = vmul.f32 1.442695, %v3420_v58 }
 0x4c0   : > { %v3365_v48 = vpop.f32.mrf.mxu0 }
 0x4c1   : > { %7840 = vst [vmem:[#allocation8_spill] sm:$0xff] %v6822_v46  ;;  %v3438_v1 = vmul.f32 1.442695, %v3421_v28  ;;  %v3422_v9 = vmin.f32 %v6822_v46, 20.0  ;;  %4602 = vpow2.f32 %v3436_v35  ;;  %v6838_v59 = vadd.f32 %v3365_v48, %v3235_v21 }
 0x4c2   : > { %v3369_v3 = vpop.f32.mrf.mxu0 }
 0x4c3   : > { %4604 = vpow2.f32 %v3438_v1  ;;  %7841 = vst [vmem:[#allocation9_spill] sm:$0xff] %v6838_v59  ;;  %v3440_v25 = vmul.f32 1.442695, %v3422_v9  ;;  %v6846_v5 = vadd.f32 %v3369_v3, %v3240_v52  ;;  %v3423_v43 = vmin.f32 %v6838_v59, 20.0 }
 0x4c4   : > { %v3371_v38 = vpop.f32.mrf.mxu0 }
 0x4c5   : > { %v6816_v36 = vadd.f32 %v3371_v38, %v3240_v52 }
 0x4c6   : > { %v3375_v41 = vpop.f32.mrf.mxu0 }
 0x4c7   : > { %v6818_v29 = vadd.f32 %v3375_v41, %v3245_v39  ;;  %v3425_v33 = vmin.f32 %v6816_v36, 20.0 }
 0x4c8   : > { %v3377_v51 = vpop.f32.mrf.mxu0 }
 0x4c9   : > { %v3426_v19 = vmin.f32 %v6818_v29, 20.0  ;;  %v3446_v8 = vmul.f32 1.442695, %v3425_v33  ;;  %v6835_v53 = vadd.f32 %v3377_v51, %v3245_v39  ;;  %vm3410_vm4 = vcmp.gt.f32.partialorder %v6818_v29, 20.0 }
 0x4ca   : > { %v3381_v31 = vpop.f32.mrf.mxu0 }
 0x4cb   : > { %v6825_v56 = vadd.f32 %v3381_v31, %v3250_v57  ;;  %v3448_v24 = vmul.f32 1.442695, %v3426_v19  ;;  %4606 = vpow2.f32 %v3446_v8  ;;  %v3427_v49 = vmin.f32 %v6835_v53, 20.0 }
 0x4cc   : > { %v3383_v15 = vpop.f32.mrf.mxu0  ;;  %vm3411_vm15 = vcmp.gt.f32.partialorder %v6835_v53, 20.0 }
 0x4cd   : > { %v3428_v20 = vmin.f32 %v6825_v56, 20.0  ;;  %v6829_v6 = vadd.f32 %v3383_v15, %v3250_v57  ;;  %4608 = vpow2.f32 %v3448_v24  ;;  %v3450_v44 = vmul.f32 1.442695, %v3427_v49 }
 0x4ce   : > { %v3387_v23 = vpop.f32.mrf.mxu0  ;;  %v3424_v57 = vmin.f32 %v6846_v5, 20.0  ;;  %v6862_v3 = vpop.eup %4602 }
 0x4cf   : > { %v3429_v34 = vmin.f32 %v6829_v6, 20.0  ;;  %v6833_v2 = vadd.f32 %v3387_v23, %v3255_v17  ;;  %v3452_v54 = vmul.f32 1.442695, %v3428_v20  ;;  %7842 = vst [vmem:[#allocation10_spill] sm:$0xff] %v6862_v3  ;;  %v6893_v8 = vadd.f32 1.0, %v6862_v3 }
 0x4d0   : > { %v3389_v12 = vpop.f32.mrf.mxu0  ;;  %v3444_v48 = vmul.f32 1.442695, %v3424_v57  ;;  %v6864_v0 = vpop.eup %4604  ;;  %vm3413_vm7 = vcmp.gt.f32.partialorder %v6829_v6, 20.0 }
 0x4d1   : > { %v3430_v60 = vmin.f32 %v6833_v2, 20.0  ;;  %v3454_v32 = vmul.f32 1.442695, %v3429_v34  ;;  %v6840_v10 = vadd.f32 %v3389_v12, %v3255_v17  ;;  %4610 = vpow2.f32 %v3452_v54  ;;  %7843 = vst [vmem:[#allocation12_spill] sm:$0xff] %v6864_v0 }
 0x4d2   : > { %v3393_v42 = vpop.f32.mrf.mxu0  ;;  %v3442_v17 = vmul.f32 1.442695, %v3423_v43  ;;  %v6899_v12 = vmul.f32 -0.5, %v6862_v3 }
 0x4d3   : > { %v6842_v16 = vadd.f32 %v3393_v42, %v3260_v40  ;;  %v3456_v61 = vmul.f32 1.442695, %v3430_v60  ;;  %v3431_v37 = vmin.f32 %v6840_v10, 20.0  ;;  %4612 = vpow2.f32 %v3454_v32 }
 0x4d4   : > { %v3395_v62 = vpop.f32.mrf.mxu0  ;;  %4614 = vpow2.f32 %v3440_v25  ;;  %v3477_v42 = vadd.f32 1.0, %v6864_v0 }
 0x4d5   : > { %v3432_v47 = vmin.f32 %v6842_v16, 20.0  ;;  %v6849_v45 = vadd.f32 %v3395_v62, %v3260_v40  ;;  %v3458_v11 = vmul.f32 1.442695, %v3431_v37  ;;  %4616 = vpow2.f32 %v3456_v61 }
 0x4d6   : > { %v3399_v26 = vpop.f32.mrf.mxu0  ;;  %v6909_v61 = vmul.f32 -0.5, %v6864_v0 }
 0x4d7   : > { %v3460_v55 = vmul.f32 1.442695, %v3432_v47  ;;  %v3433_v13 = vmin.f32 %v6849_v45, 20.0  ;;  %v6854_v14 = vadd.f32 %v3399_v26, %v6810_v63  ;;  %vm3417_vm9 = vcmp.gt.f32.partialorder %v6849_v45, 20.0 }
 0x4d8   : > { %v3401_v4 = vpop.f32.mrf.mxu0  ;;  %v6866_v38 = vpop.eup %4606 }
 0x4d9   : > { %4618 = vpow2.f32 %v3460_v55  ;;  %v3462_v40 = vmul.f32 1.442695, %v3433_v13  ;;  %v3434_v50 = vmin.f32 %v6854_v14, 20.0  ;;  %v6859_v27 = vadd.f32 %v3401_v4, %v6810_v63 }
 0x4da   : > { %4620 = vpow2.f32 %v3458_v11  ;;  %v6868_v41 = vpop.eup %4608  ;;  %v3513_v58 = vadd.f32 1.0, %v6866_v38  ;;  %v3516_v13 = vmul.f32 -0.5, %v6866_v38  ;;  %vm3418_vm0 = vcmp.gt.f32.partialorder %v6854_v14, 20.0 }
 0x4db   : > { %4622 = vpow2.f32 %v3462_v40  ;;  %v3464_v52 = vmul.f32 1.442695, %v3434_v50  ;;  %v3435_v18 = vmin.f32 %v6859_v27, 20.0  ;;  %v3522_v28 = vadd.f32 1.0, %v6868_v41 }
 0x4dc   : > { %4624 = vpow2.f32 %v3450_v44  ;;  %v3525_v49 = vmul.f32 -0.5, %v6868_v41  ;;  %vm3419_vm3 = vcmp.gt.f32.partialorder %v6859_v27, 20.0 }
 0x4dd   : > { %4626 = vpow2.f32 %v3464_v52  ;;  %v3466_v39 = vmul.f32 1.442695, %v3435_v18 }
 0x4de   : > { %4628 = vpow2.f32 %v3442_v17  ;;  %v6870_v63 = vpop.eup %4610  ;;  %v3526_v17 = vadd.f32 1.0, %v3525_v49 }
 0x4df   : > { %4630 = vpow2.f32 %v3466_v39  ;;  %v3540_v33 = vadd.f32 1.0, %v6870_v63  ;;  %v3543_v50 = vmul.f32 -0.5, %v6870_v63 }
 0x4e0   : > { %4632 = vpow2.f32 %v3444_v48  ;;  %v6872_v51 = vpop.eup %4612 }
 0x4e1   : > { %v6875_v21 = vpop.eup %4614  ;;  %v3549_v15 = vadd.f32 1.0, %v6872_v51  ;;  %4634 = vlog2.f32 %v3513_v58  ;;  %v3528_v58 = vand.u32 2147483647, %v6868_v41 }
 0x4e2   : > { %7844 = vst [vmem:[#allocation11_spill] sm:$0xff] %v6875_v21  ;;  %v6878_v31 = vpop.eup %4616  ;;  %4636 = vlog2.f32 %v3522_v28  ;;  %v3486_v11 = vadd.f32 1.0, %v6875_v21  ;;  %v6922_v44 = vmul.f32 -0.5, %v6875_v21  ;;  %v3517_v28 = vadd.f32 1.0, %v3516_v13 }
 0x4e3   : > { %4638 = vlog2.f32 %v3540_v33  ;;  %v3558_v32 = vadd.f32 1.0, %v6878_v31  ;;  %v3519_v33 = vand.u32 2147483647, %v6866_v38  ;;  %vm6998_vm6 = vcmp.lt.f32.partialorder %v3528_v58, 0.0004427343 }
 0x4e4   : > { %4640 = vlog2.f32 %v3549_v15 }
 0x4e5   : > { %vm6981_vm2 = vcmp.lt.f32.partialorder %v3519_v33, 0.0004427343 }
 0x4e6   : > { %v6881_v19 = vpop.eup %4618 }
 0x4e7   : > { %v6884_v35 = vpop.eup %4620  ;;  %v3576_v20 = vadd.f32 1.0, %v6881_v19  ;;  %v3579_v37 = vmul.f32 -0.5, %v6881_v19 }
 0x4e8   : > { %v6887_v1 = vpop.eup %4622  ;;  %v3567_v24 = vadd.f32 1.0, %v6884_v35  ;;  %v3570_v49 = vmul.f32 -0.5, %v6884_v35 }
 0x4e9   : > { %v6889_v23 = vpop.eup %4624  ;;  %v3585_v9 = vadd.f32 1.0, %v6887_v1  ;;  %4642 = vlog2.f32 %v3576_v20  ;;  %v3561_v20 = vmul.f32 -0.5, %v6878_v31  ;;  %v3588_v7 = vmul.f32 -0.5, %v6887_v1 }
 0x4ea   : > { %v6895_v34 = vpop.eup %4626  ;;  %v3531_v47 = vadd.f32 1.0, %v6889_v23  ;;  %v3534_v43 = vmul.f32 -0.5, %v6889_v23 }
 0x4eb   : > { %v3594_v60 = vadd.f32 1.0, %v6895_v34  ;;  %v6905_v25 = vpop.eup %4628  ;;  %4644 = vlog2.f32 %v3585_v9  ;;  %v3552_v9 = vmul.f32 -0.5, %v6872_v51  ;;  %v3597_v54 = vmul.f32 -0.5, %v6895_v34 }
 0x4ec   : > { %7845 = vst [vmem:[#allocation13_spill] sm:$0xff] %v6905_v25  ;;  %v6912_v62 = vpop.eup %4630  ;;  %v3495_v4 = vadd.f32 1.0, %v6905_v25  ;;  %v6926_v57 = vmul.f32 -0.5, %v6905_v25  ;;  %v3535_v18 = vadd.f32 1.0, %v3534_v43  ;;  %v3544_v43 = vadd.f32 1.0, %v3543_v50 }
 0x4ed   : > { %4646 = vlog2.f32 %v3594_v60  ;;  %v6917_v26 = vpop.eup %4632  ;;  %v3603_v55 = vadd.f32 1.0, %v6912_v62  ;;  %v3537_v60 = vand.u32 2147483647, %v6889_v23  ;;  %v3606_v39 = vmul.f32 -0.5, %v6912_v62 }
 0x4ee   : > { %4648 = vlog2.f32 %v3567_v24  ;;  %v3504_v48 = vadd.f32 1.0, %v6917_v26  ;;  %v6936_v15 = vmul.f32 -0.5, %v6917_v26  ;;  %v3546_v24 = vand.u32 2147483647, %v6870_v63 }
 0x4ef   : > { %4650 = vlog2.f32 %v3558_v32  ;;  %v4635_v32 = vpop.eup %4634  ;;  %v6952_v40 = vmul.f32 %v6889_v23, %v3535_v18  ;;  %v3564_v50 = vand.u32 2147483647, %v6878_v31  ;;  %v3562_v30 = vadd.f32 1.0, %v3561_v20 }
 0x4f0   : > { %4652 = vlog2.f32 %v3603_v55  ;;  %v6945_v55 = vmul.f32 %v6868_v41, %v3526_v17  ;;  %v6947_v13 = vpop.eup %4636  ;;  %v3582_v17 = vand.u32 2147483647, %v6881_v19  ;;  %v6958_v22 = vadd.f32 1.0, %v3552_v9 }
 0x4f1   : > { %4654 = vlog2.f32 %v3531_v47  ;;  %v3555_v47 = vand.u32 2147483647, %v6872_v51  ;;  %v4639_v52 = vpop.eup %4638  ;;  %v3591_v23 = vand.u32 2147483647, %v6887_v1  ;;  %v3571_v18 = vadd.f32 1.0, %v3570_v49 }
 0x4f2   : > { %4656 = vlog2.f32 %v3504_v48  ;;  %v4641_v41 = vpop.eup %4640  ;;  %v6963_v48 = vmul.f32 %v6870_v63, %v3544_v43  ;;  %v3600_v3 = vand.u32 2147483647, %v6895_v34  ;;  %v3580_v20 = vadd.f32 1.0, %v3579_v37 }
 0x4f3   : > { %4658 = vlog2.f32 %v3495_v4  ;;  %v3598_v4 = vadd.f32 1.0, %v3597_v54  ;;  %v3607_v9 = vadd.f32 1.0, %v3606_v39  ;;  %v3589_v0 = vadd.f32 1.0, %v3588_v7 }
 0x4f4   : > { %4660 = vlog2.f32 %v3486_v11  ;;  %v3573_v49 = vand.u32 2147483647, %v6884_v35  ;;  %vm6970_vm1 = vcmp.lt.f32.partialorder %v3564_v50, 0.0004427343  ;;  %vm6974_vm14 = vcmp.lt.f32.partialorder %v3546_v24, 0.0004427343 }
 0x4f5   : > { %4662 = vlog2.f32 %v3477_v42  ;;  %v6979_v54 = vmul.f32 %v6866_v38, %v3517_v28  ;;  %v3609_v7 = vand.u32 2147483647, %v6912_v62  ;;  %vm6987_vm8 = vcmp.lt.f32.partialorder %v3582_v17, 0.0004427343 }
 0x4f6   : > { %v4643_v46 = vpop.eup %4642  ;;  %4664 = vlog2.f32 %v6893_v8  ;;  %v6992_v24 = vmul.f32 %v6878_v31, %v3562_v30  ;;  %vm6994_vm12 = vcmp.lt.f32.partialorder %v3555_v47, 0.0004427343  ;;  %vm7002_vm5 = vcmp.lt.f32.partialorder %v3591_v23, 0.0004427343 }
 0x4f7   : > { %v3572_v17 = vmul.f32 %v6884_v35, %v3571_v18  ;;  %vm7008_vm13 = vcmp.lt.f32.partialorder %v3537_v60, 0.0004427343  ;;  %v7012_v31 = vmul.f32 0.6931472, %v4635_v32  ;;  %vm7017_vm11 = vcmp.lt.f32.partialorder %v3600_v3, 0.0004427343 }
 0x4f8   : > { %v4645_v59 = vpop.eup %4644  ;;  %v3578_v23 = vmul.f32 0.6931472, %v4643_v46  ;;  %v3581_v35 = vmul.f32 %v6881_v19, %v3580_v20  ;;  %v3590_v32 = vmul.f32 %v6887_v1, %v3589_v0  ;;  %vm3610_vm10 = vcmp.lt.f32.partialorder %v3609_v7, 0.0004427343 }
 0x4f9   : > { %v3587_v50 = vmul.f32 0.6931472, %v4645_v59  ;;  %v3599_v59 = vmul.f32 %v6895_v34, %v3598_v4  ;;  %v3542_v4 = vmul.f32 0.6931472, %v4639_v52  ;;  %v3551_v20 = vmul.f32 0.6931472, %v4641_v41 }
 0x4fa   : > { %v4647_v11 = vpop.eup %4646  ;;  %v3584_v1 = vsel %vm6987_vm8, %v3581_v35, %v3578_v23  ;;  %v3508_v41 = vadd.f32 1.0, %v6936_v15  ;;  %vm3408_vm8 = vcmp.gt.f32.partialorder %v6846_v5, 20.0  ;;  %v3472_v28 = vadd.f32 1.0, %v6899_v12  ;;  %v7881_v35 = vld [vmem:[#allocation12_spill] sm:$0xff]  ;;  %v7889_v52 = vld [vmem:[#allocation7_spill] sm:$0xff] }
 0x4fb   : > { %v4649_v37 = vpop.eup %4648  ;;  %v3596_v39 = vmul.f32 0.6931472, %v4647_v11  ;;  %v3608_v11 = vmul.f32 %v6912_v62, %v3607_v9  ;;  %v3593_v19 = vsel %vm7002_vm5, %v3590_v32, %v3587_v50  ;;  %v3524_v62 = vmul.f32 0.6931472, %v6947_v13 }
 0x4fc   : > { %v4651_v33 = vpop.eup %4650  ;;  %v3569_v25 = vmul.f32 0.6931472, %v4649_v37  ;;  %v3625_v7 = vsel %vm3417_vm9, %v6849_v45, %v3593_v19  ;;  %vm7867_vm9 = vcmp.gt.f32.partialorder %v6840_v10, 20.0 }
 0x4fd   : > { %v4653_v58 = vpop.eup %4652  ;;  %v3602_v34 = vsel %vm7017_vm11, %v3599_v59, %v3596_v39  ;;  %v3560_v3 = vmul.f32 0.6931472, %v4651_v33  ;;  %vm7037_vm11 = vcmp.lt.f32.partialorder %v3573_v49, 0.0004427343  ;;  %v3530_v63 = vsel %vm6998_vm6, %v6945_v55, %v3524_v62 }
 0x4fe   : > { %v4655_v60 = vpop.eup %4654  ;;  %v3605_v18 = vmul.f32 0.6931472, %v4653_v58  ;;  %v3626_v21 = vsel %vm3418_vm0, %v6854_v14, %v3602_v34  ;;  %v3575_v13 = vsel %vm7037_vm11, %v3572_v17, %v3569_v25  ;;  %vm7866_vm0 = vcmp.gt.f32.partialorder %v6842_v16, 20.0  ;;  %v7885_v34 = vld [vmem:[#allocation10_spill] sm:$0xff] }
 0x4ff   : > { %v3533_v9 = vmul.f32 0.6931472, %v4655_v60  ;;  %v4657_v37 = vpop.eup %4656  ;;  %v3566_v14 = vsel %vm6970_vm1, %v6992_v24, %v3560_v3  ;;  %v3624_v15 = vsel %vm7866_vm0, %v6842_v16, %v3584_v1  ;;  %v3490_v39 = vadd.f32 1.0, %v6922_v44 }
 0x500   : > { %v3611_v46 = vsel %vm3610_vm10, %v3608_v11, %v3605_v18  ;;  %v4659_v49 = vpop.eup %4658  ;;  %v3506_v16 = vmul.f32 0.6931472, %v4657_v37  ;;  %vm7868_vm1 = vcmp.gt.f32.partialorder %v6833_v2, 20.0  ;;  %v3509_v44 = vmul.f32 %v6917_v26, %v3508_v41  ;;  %v3628_v37 = vld [vmem:[%s7576_s9] sm:$0xff]  ;;  %v3630_v41 = vld [vmem:[%s7576_s9 + $0x10] sm:$0xff] }
 0x501   : > { %v3627_v0 = vsel %vm3419_vm3, %v6859_v27, %v3611_v46  ;;  %v3554_v27 = vmul.f32 %v6872_v51, %v6958_v22  ;;  %vm3409_vm3 = vcmp.gt.f32.partialorder %v6816_v36, 20.0  ;;  %v3548_v22 = vsel %vm6974_vm14, %v6963_v48, %v3542_v4  ;;  %v4661_v25 = vpop.eup %4660  ;;  %v7886_v46 = vld [vmem:[#allocation9_spill] sm:$0xff] }
 0x502   : > { %3724 = vmatprep.subr.mxu1 %v3627_v0  ;;  %v3521_v51 = vsel %vm6981_vm2, %v6979_v54, %v7012_v31  ;;  %v3499_v48 = vadd.f32 1.0, %v6926_v57  ;;  %v4663_v42 = vpop.eup %4662  ;;  %v3623_v54 = vsel %vm7867_vm9, %v6840_v10, %v3575_v13  ;;  %v3539_v8 = vsel %vm7008_vm13, %v6952_v40, %v3533_v9 }
 0x503   : > { %3725 = vmatpush1.msra.mxu1 %v3626_v21  ;;  %v3557_v45 = vsel %vm6994_vm12, %v3554_v27, %v3551_v20  ;;  %v4665_v43 = vpop.eup %4664  ;;  %v3622_v55 = vsel %vm7868_vm1, %v6833_v2, %v3566_v14  ;;  %vm7869_vm14 = vcmp.gt.f32.partialorder %v6825_v56, 20.0  ;;  %v3497_v24 = vmul.f32 0.6931472, %v4659_v49  ;;  %v7888_v20 = vld [vmem:[#allocation8_spill] sm:$0xff]  ;;  %v3629_v27 = vld [vmem:[%s7576_s9 + $0x8] sm:$0xff] }
 0x504   : > { %3726 = vmatprep.subr.mxu1 %v3625_v7  ;;  %v3620_v57 = vsel %vm7869_vm14, %v6825_v56, %v3548_v22  ;;  %v3481_v10 = vadd.f32 1.0, %v6909_v61  ;;  %v3621_v40 = vsel %vm3413_vm7, %v6829_v6, %v3557_v45  ;;  %v3488_v38 = vmul.f32 0.6931472, %v4661_v25  ;;  %v7873_v61 = vld [vmem:[#allocation13_spill] sm:$0xff]  ;;  %v3633_v14 = vld [vmem:[%s7576_s9 + $0x28] sm:$0xff]  ;;  %v3634_v22 = vld [vmem:[%s7576_s9 + $0x30] sm:$0xff]  ;;  %v3677_v25 = vpop.permute.xlu1 %3676 }
 0x505   : > { %3727 = vmatpush1.msra.mxu1 %v3624_v15  ;;  %v3619_v2 = vsel %vm3411_vm15, %v6835_v53, %v3539_v8  ;;  %v7870_v56 = vand.u32 2147483647, %v6917_v26  ;;  %v3500_v50 = vmul.f32 %v7873_v61, %v3499_v48  ;;  %v3479_v17 = vmul.f32 0.6931472, %v4663_v42  ;;  %v7877_v53 = vld [vmem:[#allocation11_spill] sm:$0xff]  ;;  %v3631_v49 = vld [vmem:[%s7576_s9 + $0x18] sm:$0xff]  ;;  %v7189_v15 = vpop.permute.xlu0 %3681 }
 0x506   : > { %3728 = vmatprep.subr.mxu1 %v3623_v54  ;;  %v7874_v12 = vand.u32 2147483647, %v7873_v61  ;;  %v3491_v31 = vmul.f32 %v7877_v53, %v3490_v39  ;;  %v3470_v26 = vmul.f32 0.6931472, %v4665_v43  ;;  %v3618_v58 = vsel %vm3410_vm4, %v6818_v29, %v3530_v63  ;;  %v3632_v7 = vld [vmem:[%s7576_s9 + $0x20] sm:$0xff] }
 0x507   : > { %3729 = vmatpush1.msra.mxu1 %v3622_v55  ;;  %vm7097_vm2 = vcmp.lt.f32.partialorder %v7870_v56, 0.0004427343  ;;  %v7878_v47 = vand.u32 2147483647, %v7877_v53  ;;  %v3482_v60 = vmul.f32 %v7881_v35, %v3481_v10  ;;  %v3617_v18 = vsel %vm3409_vm3, %v6816_v36, %v3521_v51  ;;  %v3635_v51 = vld [vmem:[%s7576_s9 + $0x38] sm:$0xff] }
 0x508   : > { %3730 = vmatprep.subr.mxu1 %v3621_v40  ;;  %v3512_v6 = vsel %vm7097_vm2, %v3509_v44, %v3506_v16  ;;  %vm7106_vm12 = vcmp.lt.f32.partialorder %v7874_v12, 0.0004427343  ;;  %v7882_v29 = vand.u32 2147483647, %v7881_v35  ;;  %v3473_v3 = vmul.f32 %v7885_v34, %v3472_v28  ;;  %v3667_v45 = vpop.permute.xlu1 %3666 }
 0x509   : > { %3731 = vmatpush1.msra.mxu1 %v3620_v57  ;;  %v3503_v59 = vsel %vm7106_vm12, %v3500_v50, %v3497_v24  ;;  %vm7118_vm6 = vcmp.lt.f32.partialorder %v7878_v47, 0.0004427343  ;;  %v3616_v4 = vsel %vm3408_vm8, %v6846_v5, %v3512_v6  ;;  %vm3407_vm5 = vcmp.gt.f32.partialorder %v7886_v46, 20.0  ;;  %v7890_v5 = vld [vmem:[#allocation6_spill] sm:$0xff]  ;;  %v3672_v42 = vpop.permute.xlu0 %3671 }
 0x50a   : > { %3732 = vmatprep.subr.mxu1 %v3619_v2  ;;  %v3494_v11 = vsel %vm7118_vm6, %v3491_v31, %v3488_v38  ;;  %vm7130_vm4 = vcmp.lt.f32.partialorder %v7882_v29, 0.0004427343  ;;  %v7887_v19 = vand.u32 2147483647, %v7885_v34  ;;  %vm3406_vm13 = vcmp.gt.f32.partialorder %v7888_v20, 20.0 }
 0x50b   : > { %3733 = vmatpush1.msra.mxu1 %v3618_v58  ;;  %v3485_v36 = vsel %vm7130_vm4, %v3482_v60, %v3479_v17  ;;  %v3615_v62 = vsel %vm3407_vm5, %v7886_v46, %v3503_v59  ;;  %v3614_v1 = vsel %vm3406_vm13, %v7888_v20, %v3494_v11  ;;  %vm3405_vm7 = vcmp.gt.f32.partialorder %v7889_v52, 20.0 }
 0x50c   : > { %3734 = vmatprep.subr.mxu1 %v3617_v18  ;;  %vm3475_vm10 = vcmp.lt.f32.partialorder %v7887_v19, 0.0004427343  ;;  %vm3404_vm15 = vcmp.gt.f32.partialorder %v7890_v5, 20.0  ;;  %v3613_v9 = vsel %vm3405_vm7, %v7889_v52, %v3485_v36  ;;  %vm7891_vm11 = vcmask 523264   ;;  %v3657_v54 = vpop.permute.xlu1 %3656 }
 0x50d   : > { %3735 = vmatpush1.msra.mxu1 %v3616_v4  ;;  %v3476_v0 = vsel %vm3475_vm10, %v3473_v3, %v3470_v26  ;;  %v7892_v13 = vmov 0.0   ;;  %vm7893_vm3 = vmmov %vm7891_vm11  ;;  %v3662_v43 = vpop.permute.xlu0 %3661 }
 0x50e   : > { %3736 = vmatprep.subr.mxu1 %v3615_v62  ;;  %v3612_v21 = vsel %vm3404_vm15, %v7890_v5, %v3476_v0  ;;  %vm7894_vm8 = vmmov %vm7893_vm3 }
 0x50f   : > { %3737 = vmatpush1.msra.mxu1 %v3614_v1  ;;  %vm7895_vm0 = vmmov %vm7893_vm3 }
 0x510   : > { %3738 = vmatprep.subr.mxu1 %v3613_v9  ;;  %vm7896_vm9 = vmmov %vm7895_vm0  ;;  %v3647_v55 = vpop.permute.xlu1 %3646 }
 0x511   : > { %3739 = vmatpush1.msra.mxu1 %v3612_v21  ;;  %vm7897_vm1 = vmmov %vm7895_vm0  ;;  %v3652_v56 = vpop.permute.xlu0 %3651 }
 0x512   : > { %4336 = vmatmul.mubr.msk.f32.vlgmr.msra.gmra.mxu1 %vm7891_vm11, %v3628_v37  ;;  %vm7898_vm14 = vmmov %vm7895_vm0 }
 0x513   : > { %3778 = vmatprep.mubr.f32.mxu1 %v7892_v13  ;;  %vm7899_vm2 = vmmov %vm7895_vm0 }
 0x516   : > { %4337 = vmatmul.mubr.msk.f32.gmra.mxu1 %vm7893_vm3, %v3629_v27 }
 0x517   : > { %3784 = vmatprep.mubr.f32.mxu1 %v7892_v13 }
 0x51a   : > { %4338 = vmatmul.mubr.msk.f32.gmra.mxu1 %vm7894_vm8, %v3630_v41 }
 0x51b   : > { %3790 = vmatprep.mubr.f32.mxu1 %v7892_v13 }
 0x51e   : > { %4339 = vmatmul.mubr.msk.f32.gmra.mxu1 %vm7895_vm0, %v3631_v49 }
 0x51f   : > { %3796 = vmatprep.mubr.f32.mxu1 %v7892_v13 }
 0x522   : > { %4340 = vmatmul.mubr.msk.f32.gmra.mxu1 %vm7896_vm9, %v3632_v7 }
 0x523   : > { %3802 = vmatprep.mubr.f32.mxu1 %v7892_v13 }
 0x526   : > { %4341 = vmatmul.mubr.msk.f32.gmra.mxu1 %vm7897_vm1, %v3633_v14 }
 0x527   : > { %3808 = vmatprep.mubr.f32.mxu1 %v7892_v13 }
 0x52a   : > { %4342 = vmatmul.mubr.msk.f32.gmra.mxu1 %vm7898_vm14, %v3634_v22 }
 0x52b   : > { %3814 = vmatprep.mubr.f32.mxu1 %v7892_v13 }
 0x52e   : > { %4343 = vmatmul.mubr.msk.f32.gmra.mxu1 %vm7899_vm2, %v3635_v51 }
 0x5d2   : > { %v3774_v63 = vpop.f32.mrf.mxu1 }
 0x5d3   : > { %v7191_v24 = vadd.f32 %v3774_v63, %v3647_v55 }
 0x5d4   : > { %v3776_v48 = vpop.f32.mrf.mxu1 }
 0x5d5   : > { %7900 = vst [vmem:[#allocation13_spill] sm:$0xff] %v7191_v24  ;;  %v7193_v10 = vadd.f32 %v3776_v48, %v3647_v55  ;;  %v3837_v2 = vmin.f32 %v7191_v24, 20.0 }
 0x5d6   : > { %v3780_v8 = vpop.f32.mrf.mxu1 }
 0x5d7   : > { %7901 = vst [vmem:[#allocation11_spill] sm:$0xff] %v7193_v10  ;;  %v3838_v33 = vmin.f32 %v7193_v10, 20.0  ;;  %v7201_v50 = vadd.f32 %v3780_v8, %v3652_v56  ;;  %v3853_v53 = vmul.f32 1.442695, %v3837_v2 }
 0x5d8   : > { %v3782_v16 = vpop.f32.mrf.mxu1 }
 0x5d9   : > { %7902 = vst [vmem:[#allocation12_spill] sm:$0xff] %v7201_v50  ;;  %v3855_v58 = vmul.f32 1.442695, %v3838_v33  ;;  %v3839_v47 = vmin.f32 %v7201_v50, 20.0  ;;  %4666 = vpow2.f32 %v3853_v53  ;;  %v7217_v3 = vadd.f32 %v3782_v16, %v3652_v56 }
 0x5da   : > { %v3786_v39 = vpop.f32.mrf.mxu1 }
 0x5db   : > { %4668 = vpow2.f32 %v3855_v58  ;;  %7903 = vst [vmem:[#allocation10_spill] sm:$0xff] %v7217_v3  ;;  %v3857_v19 = vmul.f32 1.442695, %v3839_v47  ;;  %v7225_v5 = vadd.f32 %v3786_v39, %v3657_v54  ;;  %v3840_v21 = vmin.f32 %v7217_v3, 20.0 }
 0x5dc   : > { %v3788_v57 = vpop.f32.mrf.mxu1 }
 0x5dd   : > { %v7195_v44 = vadd.f32 %v3788_v57, %v3657_v54  ;;  %v3841_v51 = vmin.f32 %v7225_v5, 20.0  ;;  %v3859_v48 = vmul.f32 1.442695, %v3840_v21 }
 0x5de   : > { %v3792_v40 = vpop.f32.mrf.mxu1 }
 0x5df   : > { %v7197_v38 = vadd.f32 %v3792_v40, %v3662_v43  ;;  %v3842_v17 = vmin.f32 %v7195_v44, 20.0  ;;  %v3861_v8 = vmul.f32 1.442695, %v3841_v51 }
 0x5e0   : > { %v3794_v28 = vpop.f32.mrf.mxu1 }
 0x5e1   : > { %v3843_v12 = vmin.f32 %v7197_v38, 20.0  ;;  %v3863_v23 = vmul.f32 1.442695, %v3842_v17  ;;  %v7214_v11 = vadd.f32 %v3794_v28, %v3662_v43  ;;  %vm3827_vm7 = vcmp.gt.f32.partialorder %v7197_v38, 20.0 }
 0x5e2   : > { %v3798_v61 = vpop.f32.mrf.mxu1 }
 0x5e3   : > { %v7204_v6 = vadd.f32 %v3798_v61, %v3667_v45  ;;  %v3865_v18 = vmul.f32 1.442695, %v3843_v12  ;;  %4670 = vpow2.f32 %v3863_v23  ;;  %v3844_v62 = vmin.f32 %v7214_v11, 20.0 }
 0x5e4   : > { %v3800_v30 = vpop.f32.mrf.mxu1  ;;  %vm3828_vm14 = vcmp.gt.f32.partialorder %v7214_v11, 20.0 }
 0x5e5   : > { %v3845_v31 = vmin.f32 %v7204_v6, 20.0  ;;  %v7208_v26 = vadd.f32 %v3800_v30, %v3667_v45  ;;  %4672 = vpow2.f32 %v3865_v18  ;;  %v3867_v14 = vmul.f32 1.442695, %v3844_v62 }
 0x5e6   : > { %v3804_v59 = vpop.f32.mrf.mxu1  ;;  %v7241_v16 = vpop.eup %4666 }
 0x5e7   : > { %v3846_v35 = vmin.f32 %v7208_v26, 20.0  ;;  %v7212_v60 = vadd.f32 %v3804_v59, %v3672_v42  ;;  %v3869_v32 = vmul.f32 1.442695, %v3845_v31  ;;  %7904 = vst [vmem:[#allocation9_spill] sm:$0xff] %v7241_v16  ;;  %v7272_v47 = vadd.f32 1.0, %v7241_v16 }
 0x5e8   : > { %v3806_v29 = vpop.f32.mrf.mxu1  ;;  %v7243_v43 = vpop.eup %4668  ;;  %v7278_v18 = vmul.f32 -0.5, %v7241_v16  ;;  %vm3830_vm1 = vcmp.gt.f32.partialorder %v7208_v26, 20.0 }
 0x5e9   : > { %v3847_v34 = vmin.f32 %v7212_v60, 20.0  ;;  %v3871_v4 = vmul.f32 1.442695, %v3846_v35  ;;  %v7219_v46 = vadd.f32 %v3806_v29, %v3672_v42  ;;  %4674 = vpow2.f32 %v3869_v32  ;;  %7905 = vst [vmem:[#allocation8_spill] sm:$0xff] %v7243_v43 }
 0x5ea   : > { %v3810_v36 = vpop.f32.mrf.mxu1  ;;  %v7288_v62 = vmul.f32 -0.5, %v7243_v43 }
 0x5eb   : > { %v7221_v20 = vadd.f32 %v3810_v36, %v3677_v25  ;;  %v3873_v0 = vmul.f32 1.442695, %v3847_v34  ;;  %v3848_v1 = vmin.f32 %v7219_v46, 20.0  ;;  %4676 = vpow2.f32 %v3871_v4 }
 0x5ec   : > { %v3812_v52 = vpop.f32.mrf.mxu1  ;;  %4678 = vpow2.f32 %v3857_v19  ;;  %v3894_v4 = vadd.f32 1.0, %v7243_v43 }
 0x5ed   : > { %v3849_v9 = vmin.f32 %v7221_v20, 20.0  ;;  %v7228_v37 = vadd.f32 %v3812_v52, %v3677_v25  ;;  %v3875_v13 = vmul.f32 1.442695, %v3848_v1  ;;  %4680 = vpow2.f32 %v3873_v0 }
 0x5ee   : > { %v3816_v27 = vpop.f32.mrf.mxu1 }
 0x5ef   : > { %v3877_v41 = vmul.f32 1.442695, %v3849_v9  ;;  %v3850_v49 = vmin.f32 %v7228_v37, 20.0  ;;  %v7233_v7 = vadd.f32 %v3816_v27, %v7189_v15  ;;  %vm3834_vm4 = vcmp.gt.f32.partialorder %v7228_v37, 20.0 }
 0x5f0   : > { %v3818_v22 = vpop.f32.mrf.mxu1  ;;  %v7245_v55 = vpop.eup %4670 }
 0x5f1   : > { %4682 = vpow2.f32 %v3877_v41  ;;  %v3879_v25 = vmul.f32 1.442695, %v3850_v49  ;;  %v3851_v45 = vmin.f32 %v7233_v7, 20.0  ;;  %v7238_v63 = vadd.f32 %v3818_v22, %v7189_v15 }
 0x5f2   : > { %4684 = vpow2.f32 %v3875_v13  ;;  %v7247_v57 = vpop.eup %4672  ;;  %v3930_v28 = vadd.f32 1.0, %v7245_v55  ;;  %v3933_v41 = vmul.f32 -0.5, %v7245_v55  ;;  %vm3835_vm6 = vcmp.gt.f32.partialorder %v7233_v7, 20.0 }
 0x5f3   : > { %4686 = vpow2.f32 %v3879_v25  ;;  %v3881_v42 = vmul.f32 1.442695, %v3851_v45  ;;  %v3852_v54 = vmin.f32 %v7238_v63, 20.0  ;;  %v3939_v56 = vadd.f32 1.0, %v7247_v57 }
 0x5f4   : > { %4688 = vpow2.f32 %v3867_v14  ;;  %v3942_v19 = vmul.f32 -0.5, %v7247_v57  ;;  %vm3836_vm12 = vcmp.gt.f32.partialorder %v7238_v63, 20.0 }
 0x5f5   : > { %4690 = vpow2.f32 %v3881_v42  ;;  %v3883_v39 = vmul.f32 1.442695, %v3852_v54 }
 0x5f6   : > { %4692 = vpow2.f32 %v3859_v48  ;;  %v7249_v15 = vpop.eup %4674  ;;  %v3943_v45 = vadd.f32 1.0, %v3942_v19 }
 0x5f7   : > { %4694 = vpow2.f32 %v3883_v39  ;;  %v3957_v61 = vadd.f32 1.0, %v7249_v15  ;;  %v3960_v25 = vmul.f32 -0.5, %v7249_v15  ;;  %v3945_v39 = vand.u32 2147483647, %v7247_v57 }
 0x5f8   : > { %4696 = vpow2.f32 %v3861_v8  ;;  %v7251_v40 = vpop.eup %4676 }
 0x5f9   : > { %v7254_v2 = vpop.eup %4678  ;;  %v3966_v12 = vadd.f32 1.0, %v7251_v40  ;;  %4698 = vlog2.f32 %v3930_v28  ;;  %v3934_v28 = vadd.f32 1.0, %v3933_v41  ;;  %v3972_v19 = vand.u32 2147483647, %v7251_v40 }
 0x5fa   : > { %7906 = vst [vmem:[#allocation7_spill] sm:$0xff] %v7254_v2  ;;  %v7257_v33 = vpop.eup %4680  ;;  %4700 = vlog2.f32 %v3939_v56  ;;  %v3903_v21 = vadd.f32 1.0, %v7254_v2  ;;  %v7301_v49 = vmul.f32 -0.5, %v7254_v2  ;;  %v3936_v56 = vand.u32 2147483647, %v7245_v55 }
 0x5fb   : > { %4702 = vlog2.f32 %v3957_v61  ;;  %v3975_v34 = vadd.f32 1.0, %v7257_v33  ;;  %vm7373_vm11 = vcmp.lt.f32.partialorder %v3972_v19, 0.0004427343  ;;  %vm7377_vm3 = vcmp.lt.f32.partialorder %v3945_v39, 0.0004427343 }
 0x5fc   : > { %4704 = vlog2.f32 %v3966_v12  ;;  %v3978_v12 = vmul.f32 -0.5, %v7257_v33  ;;  %vm7360_vm13 = vcmp.lt.f32.partialorder %v3936_v56, 0.0004427343 }
 0x5fe   : > { %v7260_v17 = vpop.eup %4682  ;;  %v3979_v24 = vadd.f32 1.0, %v3978_v12 }
 0x5ff   : > { %v7263_v30 = vpop.eup %4684  ;;  %v3993_v53 = vadd.f32 1.0, %v7260_v17  ;;  %v3996_v29 = vmul.f32 -0.5, %v7260_v17 }
 0x600   : > { %v7266_v31 = vpop.eup %4686  ;;  %v3984_v35 = vadd.f32 1.0, %v7263_v30 }
 0x601   : > { %v7268_v58 = vpop.eup %4688  ;;  %v4002_v59 = vadd.f32 1.0, %v7266_v31  ;;  %4706 = vlog2.f32 %v3993_v53  ;;  %v3969_v53 = vmul.f32 -0.5, %v7251_v40  ;;  %v4005_v8 = vmul.f32 -0.5, %v7266_v31 }
 0x602   : > { %v7274_v23 = vpop.eup %4690  ;;  %v3948_v52 = vadd.f32 1.0, %v7268_v58  ;;  %v3951_v9 = vmul.f32 -0.5, %v7268_v58  ;;  %v3997_v12 = vadd.f32 1.0, %v3996_v29 }
 0x603   : > { %v4011_v32 = vadd.f32 1.0, %v7274_v23  ;;  %v7284_v36 = vpop.eup %4692  ;;  %4708 = vlog2.f32 %v4002_v59  ;;  %v3963_v59 = vand.u32 2147483647, %v7249_v15  ;;  %v4014_v41 = vmul.f32 -0.5, %v7274_v23 }
 0x604   : > { %7907 = vst [vmem:[#allocation6_spill] sm:$0xff] %v7284_v36  ;;  %v7291_v1 = vpop.eup %4694  ;;  %v3912_v14 = vadd.f32 1.0, %v7284_v36  ;;  %v7305_v22 = vmul.f32 -0.5, %v7284_v36  ;;  %v3952_v42 = vadd.f32 1.0, %v3951_v9  ;;  %v7324_v9 = vmul.f32 %v7247_v57, %v3943_v45 }
 0x605   : > { %4710 = vlog2.f32 %v4011_v32  ;;  %v7296_v13 = vpop.eup %4696  ;;  %v4020_v27 = vadd.f32 1.0, %v7291_v1  ;;  %v4023_v48 = vmul.f32 -0.5, %v7291_v1  ;;  %v3999_v45 = vand.u32 2147483647, %v7260_v17 }
 0x606   : > { %4712 = vlog2.f32 %v3984_v35  ;;  %v3921_v54 = vadd.f32 1.0, %v7296_v13  ;;  %v7315_v61 = vmul.f32 -0.5, %v7296_v13  ;;  %v3954_v35 = vand.u32 2147483647, %v7268_v58  ;;  %v4699_v32 = vpop.eup %4698 }
 0x607   : > { %4714 = vlog2.f32 %v3975_v34  ;;  %v3987_v34 = vmul.f32 -0.5, %v7263_v30  ;;  %v7331_v0 = vmul.f32 %v7268_v58, %v3952_v42  ;;  %v7337_v10 = vadd.f32 1.0, %v3969_v53 }
 0x608   : > { %4716 = vlog2.f32 %v4020_v27  ;;  %v7326_v27 = vpop.eup %4700  ;;  %v4008_v58 = vand.u32 2147483647, %v7266_v31  ;;  %v4017_v16 = vand.u32 2147483647, %v7274_v23  ;;  %v4024_v53 = vadd.f32 1.0, %v4023_v48 }
 0x609   : > { %4718 = vlog2.f32 %v3948_v52  ;;  %v3961_v52 = vadd.f32 1.0, %v3960_v25  ;;  %v4703_v51 = vpop.eup %4702  ;;  %v3981_v25 = vand.u32 2147483647, %v7257_v33  ;;  %v3988_v42 = vadd.f32 1.0, %v3987_v34 }
 0x60a   : > { %4720 = vlog2.f32 %v3921_v54  ;;  %v4705_v57 = vpop.eup %4704  ;;  %v4006_v43 = vadd.f32 1.0, %v4005_v8  ;;  %v3990_v34 = vand.u32 2147483647, %v7263_v30  ;;  %vm7353_vm10 = vcmp.lt.f32.partialorder %v3963_v59, 0.0004427343 }
 0x60b   : > { %4722 = vlog2.f32 %v3912_v14  ;;  %v7342_v54 = vmul.f32 %v7249_v15, %v3961_v52  ;;  %v4015_v14 = vadd.f32 1.0, %v4014_v41  ;;  %vm7349_vm5 = vcmp.lt.f32.partialorder %v3981_v25, 0.0004427343 }
 0x60c   : > { %4724 = vlog2.f32 %v3903_v21  ;;  %v7358_v52 = vmul.f32 %v7245_v55, %v3934_v28  ;;  %v4026_v48 = vand.u32 2147483647, %v7291_v1  ;;  %vm7366_vm15 = vcmp.lt.f32.partialorder %v3999_v45, 0.0004427343 }
 0x60d   : > { %4726 = vlog2.f32 %v3894_v4  ;;  %v7371_v59 = vmul.f32 %v7257_v33, %v3979_v24  ;;  %vm7381_vm8 = vcmp.lt.f32.partialorder %v4008_v58, 0.0004427343  ;;  %v3989_v45 = vmul.f32 %v7263_v30, %v3988_v42 }
 0x60e   : > { %v4707_v50 = vpop.eup %4706  ;;  %4728 = vlog2.f32 %v7272_v47  ;;  %vm7387_vm9 = vcmp.lt.f32.partialorder %v3954_v35, 0.0004427343  ;;  %v7391_v33 = vmul.f32 0.6931472, %v4699_v32  ;;  %vm7396_vm2 = vcmp.lt.f32.partialorder %v4017_v16, 0.0004427343 }
 0x60f   : > { %v3995_v58 = vmul.f32 0.6931472, %v4707_v50  ;;  %v3998_v30 = vmul.f32 %v7260_v17, %v3997_v12  ;;  %v4007_v32 = vmul.f32 %v7266_v31, %v4006_v43  ;;  %vm4027_vm0 = vcmp.lt.f32.partialorder %v4026_v48, 0.0004427343 }
 0x610   : > { %v4709_v3 = vpop.eup %4708  ;;  %v3968_v12 = vmul.f32 0.6931472, %v4705_v57  ;;  %v3925_v57 = vadd.f32 1.0, %v7315_v61  ;;  %v3889_v28 = vadd.f32 1.0, %v7278_v18 }
 0x611   : > { %v4004_v25 = vmul.f32 0.6931472, %v4709_v3  ;;  %v4016_v3 = vmul.f32 %v7274_v23, %v4015_v14  ;;  %v3959_v14 = vmul.f32 0.6931472, %v4703_v51  ;;  %v4001_v31 = vsel %vm7366_vm15, %v3998_v30, %v3995_v58  ;;  %v7943_v30 = vld [vmem:[#allocation8_spill] sm:$0xff]  ;;  %v7951_v51 = vld [vmem:[#allocation11_spill] sm:$0xff] }
 0x612   : > { %v4711_v21 = vpop.eup %4710  ;;  %vm3825_vm15 = vcmp.gt.f32.partialorder %v7225_v5, 20.0 }
 0x613   : > { %v4713_v29 = vpop.eup %4712  ;;  %v4013_v8 = vmul.f32 0.6931472, %v4711_v21  ;;  %v4025_v21 = vmul.f32 %v7291_v1, %v4024_v53  ;;  %v4010_v17 = vsel %vm7381_vm8, %v4007_v32, %v4004_v25  ;;  %v3941_v1 = vmul.f32 0.6931472, %v7326_v27 }
 0x614   : > { %v4715_v56 = vpop.eup %4714  ;;  %v3986_v36 = vmul.f32 0.6931472, %v4713_v29  ;;  %v4042_v48 = vsel %vm3834_vm4, %v7228_v37, %v4010_v17  ;;  %vm7929_vm4 = vcmp.gt.f32.partialorder %v7219_v46, 20.0 }
 0x615   : > { %v4717_v39 = vpop.eup %4716  ;;  %v4019_v23 = vsel %vm7396_vm2, %v4016_v3, %v4013_v8  ;;  %v3977_v16 = vmul.f32 0.6931472, %v4715_v56  ;;  %vm7416_vm2 = vcmp.lt.f32.partialorder %v3990_v34, 0.0004427343  ;;  %v3947_v15 = vsel %vm7377_vm3, %v7324_v9, %v3941_v1 }
 0x616   : > { %v4719_v35 = vpop.eup %4718  ;;  %v4022_v42 = vmul.f32 0.6931472, %v4717_v39  ;;  %v4043_v2 = vsel %vm3835_vm6, %v7233_v7, %v4019_v23  ;;  %v3992_v27 = vsel %vm7416_vm2, %v3989_v45, %v3986_v36  ;;  %vm7928_vm6 = vcmp.gt.f32.partialorder %v7221_v20, 20.0  ;;  %v7947_v23 = vld [vmem:[#allocation9_spill] sm:$0xff] }
 0x617   : > { %v3950_v53 = vmul.f32 0.6931472, %v4719_v35  ;;  %v4721_v29 = vpop.eup %4720  ;;  %v3983_v7 = vsel %vm7349_vm5, %v7371_v59, %v3977_v16  ;;  %v4041_v61 = vsel %vm7928_vm6, %v7221_v20, %v4001_v31  ;;  %v3907_v8 = vadd.f32 1.0, %v7301_v49 }
 0x618   : > { %v4028_v50 = vsel %vm4027_vm0, %v4025_v21, %v4022_v42  ;;  %v4723_v34 = vpop.eup %4722  ;;  %v3923_v20 = vmul.f32 0.6931472, %v4721_v29  ;;  %vm7930_vm5 = vcmp.gt.f32.partialorder %v7212_v60, 20.0  ;;  %v3926_v49 = vmul.f32 %v7296_v13, %v3925_v57  ;;  %v4045_v29 = vld [vmem:[%s7578_s11] sm:$0x1] }
 0x619   : > { %v4044_v43 = vsel %vm3836_vm12, %v7238_v63, %v4028_v50  ;;  %v3971_v63 = vmul.f32 %v7251_v40, %v7337_v10  ;;  %vm3826_vm12 = vcmp.gt.f32.partialorder %v7195_v44, 20.0  ;;  %v3965_v10 = vsel %vm7353_vm10, %v7342_v54, %v3959_v14  ;;  %v4725_v36 = vpop.eup %4724  ;;  %v7948_v50 = vld [vmem:[#allocation10_spill] sm:$0xff] }
 0x61a   : > { %4075 = vmatprep.subr.mxu0 %v4044_v43  ;;  %v3938_v40 = vsel %vm7360_vm13, %v7358_v52, %v7391_v33  ;;  %v3916_v54 = vadd.f32 1.0, %v7305_v22  ;;  %v4727_v4 = vpop.eup %4726  ;;  %v4040_v52 = vsel %vm7929_vm4, %v7219_v46, %v3992_v27  ;;  %v3956_v47 = vsel %vm7387_vm9, %v7331_v0, %v3950_v53 }
 0x61b   : > { %4076 = vmatpush1.msra.mxu0 %v4043_v2  ;;  %v3974_v37 = vsel %vm7373_vm11, %v3971_v63, %v3968_v12  ;;  %v4729_v41 = vpop.eup %4728  ;;  %v4039_v9 = vsel %vm7930_vm5, %v7212_v60, %v3983_v7  ;;  %vm7931_vm10 = vcmp.gt.f32.partialorder %v7204_v6, 20.0  ;;  %v3914_v59 = vmul.f32 0.6931472, %v4723_v34  ;;  %v7950_v12 = vld [vmem:[#allocation12_spill] sm:$0xff]  ;;  %v4050_v7 = vpop.permute.xlu0 %4049 }
 0x61c   : > { %4077 = vmatprep.subr.mxu0 %v4042_v48  ;;  %v4037_v22 = vsel %vm7931_vm10, %v7204_v6, %v3965_v10  ;;  %v3898_v46 = vadd.f32 1.0, %v7288_v62  ;;  %v4038_v0 = vsel %vm3830_vm1, %v7208_v26, %v3974_v37  ;;  %v3905_v55 = vmul.f32 0.6931472, %v4725_v36  ;;  %v7935_v62 = vld [vmem:[#allocation6_spill] sm:$0xff] }
 0x61d   : > { %4078 = vmatpush1.msra.mxu0 %v4041_v61  ;;  %v4036_v60 = vsel %vm3828_vm14, %v7214_v11, %v3956_v47  ;;  %v7932_v6 = vand.u32 2147483647, %v7296_v13  ;;  %v3917_v25 = vmul.f32 %v7935_v62, %v3916_v54  ;;  %v3896_v45 = vmul.f32 0.6931472, %v4727_v4  ;;  %v7939_v11 = vld [vmem:[#allocation7_spill] sm:$0xff] }
 0x61e   : > { %4079 = vmatprep.subr.mxu0 %v4040_v52  ;;  %v7936_v18 = vand.u32 2147483647, %v7935_v62  ;;  %v3908_v33 = vmul.f32 %v7939_v11, %v3907_v8  ;;  %v3887_v13 = vmul.f32 0.6931472, %v4729_v41  ;;  %v4035_v39 = vsel %vm3827_vm7, %v7197_v38, %v3947_v15 }
 0x61f   : > { %4080 = vmatpush1.msra.mxu0 %v4039_v9  ;;  %vm7476_vm13 = vcmp.lt.f32.partialorder %v7932_v6, 0.0004427343  ;;  %v7940_v19 = vand.u32 2147483647, %v7939_v11  ;;  %v3899_v35 = vmul.f32 %v7943_v30, %v3898_v46  ;;  %v4034_v42 = vsel %vm3826_vm12, %v7195_v44, %v3938_v40 }
 0x620   : > { %4081 = vmatprep.subr.mxu0 %v4038_v0  ;;  %v3929_v26 = vsel %vm7476_vm13, %v3926_v49, %v3923_v20  ;;  %vm7485_vm11 = vcmp.lt.f32.partialorder %v7936_v18, 0.0004427343  ;;  %v7944_v38 = vand.u32 2147483647, %v7943_v30  ;;  %v3890_v16 = vmul.f32 %v7947_v23, %v3889_v28 }
 0x621   : > { %4082 = vmatpush1.msra.mxu0 %v4037_v22  ;;  %v3920_v3 = vsel %vm7485_vm11, %v3917_v25, %v3914_v59  ;;  %vm7497_vm3 = vcmp.lt.f32.partialorder %v7940_v19, 0.0004427343  ;;  %v4033_v14 = vsel %vm3825_vm15, %v7225_v5, %v3929_v26  ;;  %vm3824_vm8 = vcmp.gt.f32.partialorder %v7948_v50, 20.0  ;;  %v7952_v5 = vld [vmem:[#allocation13_spill] sm:$0xff] }
 0x622   : > { %4083 = vmatprep.subr.mxu0 %v4036_v60  ;;  %v3911_v21 = vsel %vm7497_vm3, %v3908_v33, %v3905_v55  ;;  %vm7509_vm7 = vcmp.lt.f32.partialorder %v7944_v38, 0.0004427343  ;;  %v7949_v17 = vand.u32 2147483647, %v7947_v23  ;;  %vm3823_vm9 = vcmp.gt.f32.partialorder %v7950_v12, 20.0 }
 0x623   : > { %4084 = vmatpush1.msra.mxu0 %v4035_v39  ;;  %v3902_v44 = vsel %vm7509_vm7, %v3899_v35, %v3896_v45  ;;  %v4032_v1 = vsel %vm3824_vm8, %v7948_v50, %v3920_v3  ;;  %v4031_v31 = vsel %vm3823_vm9, %v7950_v12, %v3911_v21  ;;  %vm3822_vm1 = vcmp.gt.f32.partialorder %v7951_v51, 20.0 }
 0x624   : > { %4085 = vmatprep.subr.mxu0 %v4034_v42  ;;  %vm3892_vm0 = vcmp.lt.f32.partialorder %v7949_v17, 0.0004427343  ;;  %vm3821_vm14 = vcmp.gt.f32.partialorder %v7952_v5, 20.0  ;;  %v4030_v53 = vsel %vm3822_vm1, %v7951_v51, %v3902_v44  ;;  %vm7953_vm2 = vcmask 523264  }
 0x625   : > { %4086 = vmatpush1.msra.mxu0 %v4033_v14  ;;  %v3893_v43 = vsel %vm3892_vm0, %v3890_v16, %v3887_v13  ;;  %v4052_v27 = vlaneseq  ;;  %v4800_v57 = vmov 1966171168  }
 0x626   : > { %4087 = vmatprep.subr.mxu0 %v4032_v1  ;;  %v4029_v2 = vsel %vm3821_vm14, %v7952_v5, %v3893_v43  ;;  %v4134_v34 = vunpack.c.l.s4 %v4800_v57 }
 0x627   : > { %4088 = vmatpush1.msra.mxu0 %v4031_v31  ;;  %v4053_v63 = vshrl.u32 %v4052_v27, 7  ;;  %vm4150_vm12 = vcmp.lt.s32.totalorder %v4052_v27, 256 }
 0x628   : > { %4089 = vmatprep.subr.mxu0 %v4030_v53  ;;  %v4135_v10 = vunpack.c.0.s8 %v4134_v34 }
 0x629   : > { %4090 = vmatpush1.msra.mxu0 %v4029_v2  ;;  %v4054_v48 = vsub.s32 0, %v4053_v63 }
 0x62a   : > { %4344 = vmatmul.mubr.msk.f32.vlgmr.msra.gmra.mxu0 %vm7953_vm2, %v4045_v29  ;;  %v4138_v54 = vsub.s32 %v4135_v10, %v4053_v63 }
 0x62b   : > { %v4055_v36 = vrot.slane %v4050_v7, %v4054_v48 }
 0x6ea   : > { %v4125_v40 = vpop.f32.mrf.mxu0 }
 0x6eb   : > { %v4126_v37 = vadd.f32 %v4125_v40, %v4055_v36 }
 0x6ec   : > { %v4127_v61 = vpop.f32.mrf.mxu0 }
 0x6ed   : > { %v4128_v15 = vadd.f32 %v4127_v61, %v4055_v36 }
 0x6ef   : > { %v4132_v4 = vcombine.low %v4126_v37, %v4128_v15 }
 0x6f1   : > { %v4139_v52 = vrot.slane %v4132_v4, %v4138_v54 }
 0x6f3   : > { %v4146_v47 = vrot.slane %v4139_v52, %v4138_v54 }
 0x6f5   : > { %4152 = vst.msk [vmem:[%s436_s21] sm:$0x3] %vm4150_vm12, %v4146_v47 }
 0x6f6   : > { %4743 = shalt.err (!%p4740_p3)
}
 0x6f7   : > { %s4744_s16 = scalar_lea.hbm %s4166_s25, 32  ;;  %s4748_s21 = scalar_lea.hbm %s7580_s13, 64 }
 0x6f8   : > { %p4745_p4 = scmp.ne.s32.totalorder %s4166_s25, %s4744_s16  ;;  %p4749_p9 = scmp.lt.s32.totalorder %s4166_s25, %s7580_s13 }
 0x6f9   : > { %p4750_p10 = scmp.lt.s32.totalorder %s4748_s21, %s4744_s16 }
 0x6fa   : > { %p4746_p7 = pnand %p4745_p4, %p4913_p5 }
 0x6fb   : > { %p4751_p11 = por %p4750_p10, %p4749_p9 }
 0x6fc   : > { %p4747_p8 = pneg %p4746_p7 }
 0x6fe   : > { %p4752_p12 = pnand %p4751_p11, %p4747_p8 }
 0x700   : > { %4755 = shalt.err (!%p4752_p12)
}
 0x701   : > { %4391 = dma.vmem_to_hbm [thread:$0]  (%p4913_p5), %s4169_s22, 32, %s4166_s25, %s4154_s26  }
 0x702 PF: > { %p4397_p13 = scmp.ge.s32.totalorder %s4790_s30, 2  ;;  %s4180_s0 = sand.u32 1, %s4778_s27  }
 0x703   : > { %s4181_s1 = scalar_lea.sflag [#allocation4], %s4180_s0 }
 0x704   : > { %p4394_p0 = pnand %p4397_p13, %p4917_p6 }
 0x706   : > { %p4395_p1 = pneg %p4394_p0 }
 0x708   : > { %4773 = dma.done.wait (%p4395_p1), %s4181_s1, 32  }
 0x709   : > { %4775 = vsyncadd (%p4395_p1), %s4181_s1, 4294967264  ;;  %p25_p2 = scmp.ge.s32.totalorder %s4900_s15, 4   ;;  %s7954_s27 = smov %s4782_s28 }
 0x70a   : > { %s7955_s28 = smov %s4786_s29  ;;  %s7956_s29 = smov %s4911_s18 }
 0x70b   : > { %s7957_s30 = smov %s4900_s15  ;;  %27 = sbr.rel (!%p25_p2) target bundleno = 7 (0x7), region = 107 }
 0x710   :  { %4186 = vsyncpa [#allocation4], 1 }
 0x711   :  { %4188 = vsyncpa [#allocation4 + $0x1], 1 }

</bundles_post_ra>
